<compile_context>
chip_gen: v7x
topology: tpu7x:2x2x1
jax: 0.10.0
libtpu: 0.0.40
codegen_flags: <defaults>
</compile_context>

<pallas_src>
import functools

import jax
import jax.numpy as jnp
from jax import lax
from jax.experimental import pallas as pl
from jax.experimental.pallas import tpu as pltpu

BN_EPS = 1e-5


# ----------------------------------------------------------------------------
# helpers
# ----------------------------------------------------------------------------
def _round_up(x, m):
    return (x + m - 1) // m * m


def _vmem_limit_bytes():
    # Generation-aware: v5e/v6e have 128 MiB physical VMEM, v7x only 64 MiB.
    try:
        cap = int(pltpu.get_tpu_info().vmem_capacity_bytes)
    except Exception:
        cap = 64 * 1024 * 1024
    return int(min(cap * 3 // 4, 100 * 1024 * 1024))


# ----------------------------------------------------------------------------
# fused Pallas kernel: conv1+bn1+relu -> conv2+bn2+relu -> conv3+bn3(+res)(+relu)
#                      -> center crop   (one batch image per grid step)
# ----------------------------------------------------------------------------
def _bottleneck_kernel(x_ref, w1_ref, b1_ref, w2_ref, b2_ref, w3_ref, b3_ref,
                       o_ref, p1_ref, *, H, W, d, last_relu):
    """Refs:
      x_ref : (1, H*W, Cin)  f32   one image, channels-last, rows flattened
      w1    : (Cin, C1)      bf16  folded conv1*BN1 weights; b1: (1, C1) f32
      w2    : (9*C1, C2)     bf16  folded conv2*BN2, taps (di,dj) row-major
      w3    : (C2, C3)       bf16  folded conv3*BN3
      o_ref : (1, Hc*Wc, C3) f32   cropped output, channels-last
      p1_ref: (R1, C1)       bf16  scratch: zero-padded conv1 output slab
    """
    C1 = w1_ref.shape[-1]
    C2 = w2_ref.shape[-1]
    Wp = W + 2 * d                       # padded row stride of the conv1 slab
    Hc, Wc = H - 2, W - 2                # center-cropped spatial size
    m0 = Wp + 1                          # flat index of cropped pixel (1, 1)
    Mo2 = (H - 3) * Wp + (W - 2)         # contiguous conv2 range covering crop

    # ---- conv1: 1x1 + folded BN + ReLU (f32 input cast to bf16 in-body) ----
    xin = x_ref[0].astype(jnp.bfloat16)                         # (H*W, Cin)
    a1 = jnp.dot(xin, w1_ref[...], preferred_element_type=jnp.float32)
    a1 = jnp.maximum(a1 + b1_ref[...], 0.0).astype(jnp.bfloat16)  # (H*W, C1)

    # ---- scatter conv1 rows into the zero-padded slab (padding of conv2's
    #      *input*, i.e. zeros of bn1(relu(conv1(x)))) ----
    p1_ref[...] = jnp.zeros_like(p1_ref)
    for h in range(H):
        dst = (h + d) * Wp + d
        p1_ref[dst:dst + W, :] = a1[h * W:(h + 1) * W, :]

    # ---- conv2: 3x3 dilated; 9 taps concatenated along K -> one matmul ----
    taps = []
    for di in range(3):
        for dj in range(3):
            off = m0 + d * (di * Wp + dj)          # static python int
            taps.append(p1_ref[off:off + Mo2, :])
    lhs2 = jnp.concatenate(taps, axis=-1)                        # (Mo2, 9*C1)
    a2 = jnp.dot(lhs2, w2_ref[...], preferred_element_type=jnp.float32)
    a2 = jnp.maximum(a2 + b2_ref[...], 0.0).astype(jnp.bfloat16)  # (Mo2, C2)

    # ---- gather the cropped interior pixels (crop fused: border never
    #      reaches conv3) and the matching residual rows from the same x ----
    lhs3 = jnp.concatenate(
        [a2[i * Wp:i * Wp + Wc, :] for i in range(Hc)], axis=0)   # (Hc*Wc, C2)
    res = jnp.concatenate(
        [x_ref[0, (i + 1) * W + 1:(i + 1) * W + 1 + Wc, :] for i in range(Hc)],
        axis=0)                                                   # (Hc*Wc, Cin) f32

    # ---- conv3: 1x1 + folded BN + residual add (+ last ReLU) ----
    a3 = jnp.dot(lhs3, w3_ref[...], preferred_element_type=jnp.float32)
    a3 = a3 + b3_ref[...] + res
    if last_relu:
        a3 = jnp.maximum(a3, 0.0)
    o_ref[0] = a3.astype(o_ref.dtype)


# ----------------------------------------------------------------------------
# BN folding + parameters
# ----------------------------------------------------------------------------
def fold_bn(w_hwio, gamma, beta, mean, var):
    """Fold inference-mode BatchNorm2d into the preceding bias-free conv."""
    scale = gamma / jnp.sqrt(var + BN_EPS)                    # (Cout,)
    w_f = (w_hwio * scale).astype(jnp.bfloat16)               # scale out-chans
    b_f = (beta - mean * scale).reshape(1, -1).astype(jnp.float32)
    return w_f, b_f


def init_bottleneck_params(key, inplanes, planes, expansion=4):
    def conv_w(k, shape):
        fan_in = shape[0] * shape[1] * shape[2]
        return jax.random.normal(k, shape, jnp.float32) / jnp.sqrt(
            jnp.float32(fan_in))

    def bn(k, c):
        k1, k2, k3, k4 = jax.random.split(k, 4)
        gamma = 1.0 + 0.1 * jax.random.normal(k1, (c,), jnp.float32)
        beta = 0.1 * jax.random.normal(k2, (c,), jnp.float32)
        mean = 0.1 * jax.random.normal(k3, (c,), jnp.float32)
        var = 1.0 + 0.1 * jax.random.uniform(k4, (c,), jnp.float32)
        return gamma, beta, mean, var

    keys = jax.random.split(key, 6)
    return {
        "w1": conv_w(keys[0], (1, 1, inplanes, planes)),
        "bn1": bn(keys[1], planes),
        "w2": conv_w(keys[2], (3, 3, planes, planes * 2)),
        "bn2": bn(keys[3], planes * 2),
        "w3": conv_w(keys[4], (1, 1, planes * 2, planes * expansion)),
        "bn3": bn(keys[5], planes * expansion),
    }


# ----------------------------------------------------------------------------
# forward
# ----------------------------------------------------------------------------
def bottleneck_big_ci_forward(params, x_nchw, *, last_relu=True, dilation=1):
    """x_nchw: (N, inplanes, H, W) f32 -> (N, planes*4, H-2, W-2) f32."""
    if dilation not in (1, 2, 3):
        raise ValueError("dilation must be 1, 2 or 3 (padding == dilation)")
    n, cin, h, w = x_nchw.shape
    if h < 3 or w < 3:
        raise ValueError("spatial dims must be >= 3 for the center crop")
    d = dilation

    w1, b1 = fold_bn(params["w1"], *params["bn1"])
    w2, b2 = fold_bn(params["w2"], *params["bn2"])
    w3, b3 = fold_bn(params["w3"], *params["bn3"])
    c1 = w1.shape[-1]
    c2 = w2.shape[-1]
    c3 = w3.shape[-1]
    if c3 != cin:  # downsample=None residual path
        raise ValueError("downsample=None requires inplanes == planes*expansion")

    w1m = w1.reshape(cin, c1)
    w2m = w2.reshape(9 * c1, c2)          # (di, dj, ci) row-major along K
    w3m = w3.reshape(c2, c3)

    # NCHW -> (N, H*W, Cin): single layout pass; x is read once by the kernel
    # (conv1 lhs *and* residual come from the same VMEM block).
    x_flat = jnp.transpose(x_nchw, (0, 2, 3, 1)).reshape(n, h * w, cin)
    x_flat = x_flat.astype(jnp.float32)

    hp, wp = h + 2 * d, w + 2 * d
    hc, wc = h - 2, w - 2
    r1 = _round_up(hp * wp, 8)            # padded-slab rows (tap reads fit)

    out = pl.pallas_call(
        functools.partial(_bottleneck_kernel, H=h, W=w, d=d,
                          last_relu=last_relu),
        out_shape=jax.ShapeDtypeStruct((n, hc * wc, c3), jnp.float32),
        grid_spec=pltpu.PrefetchScalarGridSpec(
            num_scalar_prefetch=0,
            grid=(n,),
            in_specs=[
                pl.BlockSpec((1, h * w, cin), lambda i: (i, 0, 0)),
                pl.BlockSpec((cin, c1), lambda i: (0, 0)),
                pl.BlockSpec((1, c1), lambda i: (0, 0)),
                pl.BlockSpec((9 * c1, c2), lambda i: (0, 0)),
                pl.BlockSpec((1, c2), lambda i: (0, 0)),
                pl.BlockSpec((c2, c3), lambda i: (0, 0)),
                pl.BlockSpec((1, c3), lambda i: (0, 0)),
            ],
            out_specs=pl.BlockSpec((1, hc * wc, c3), lambda i: (i, 0, 0)),
            scratch_shapes=[pltpu.VMEM((r1, c1), jnp.bfloat16)],
        ),
        compiler_params=pltpu.CompilerParams(
            dimension_semantics=("parallel",),
            vmem_limit_bytes=_vmem_limit_bytes(),
        ),
    )(x_flat, w1m, b1, w2m, b2, w3m, b3)

    out = out.reshape(n, hc, wc, c3)
    return jnp.transpose(out, (0, 3, 1, 2))              # NHWC -> NCHW


# ----------------------------------------------------------------------------
# pure-JAX reference (for a correctness sanity check)
# ----------------------------------------------------------------------------
def reference_forward(params, x_nchw, *, last_relu=True, dilation=1):
    x = jnp.transpose(x_nchw, (0, 2, 3, 1)).astype(jnp.float32)

    def bn(y, stats):
        gamma, beta, mean, var = stats
        return (y - mean) * (gamma / jnp.sqrt(var + BN_EPS)) + beta

    dn = ("NHWC", "HWIO", "NHWC")
    d = dilation
    y = lax.conv_general_dilated(x, params["w1"], (1, 1), "VALID",
                                 dimension_numbers=dn)
    y = jax.nn.relu(bn(y, params["bn1"]))
    y = lax.conv_general_dilated(y, params["w2"], (1, 1),
                                 padding=((d, d), (d, d)),
                                 rhs_dilation=(d, d), dimension_numbers=dn)
    y = jax.nn.relu(bn(y, params["bn2"]))
    y = lax.conv_general_dilated(y, params["w3"], (1, 1), "VALID",
                                 dimension_numbers=dn)
    y = bn(y, params["bn3"]) + x
    if last_relu:
        y = jax.nn.relu(y)
    y = y[:, 1:-1, 1:-1, :]
    return jnp.transpose(y, (0, 3, 1, 2))


# ----------------------------------------------------------------------------
if __name__ == "__main__":
    key = jax.random.PRNGKey(0)
    k_params, k_x = jax.random.split(key)

    # downsample=None requires inplanes == planes * expansion for the residual.
    inplanes, planes = 64, 16
    x = jax.random.normal(k_x, (2, inplanes, 16, 16), jnp.float32)
    params = init_bottleneck_params(k_params, inplanes, planes)

    fwd = jax.jit(functools.partial(bottleneck_big_ci_forward,
                                    last_relu=True, dilation=1))
    y = jax.block_until_ready(fwd(params, x))
    assert y.shape == (2, planes * 4, 14, 14), y.shape
    assert y.dtype == jnp.float32

    # Sanity check vs f32 XLA reference (bf16 matmul operands -> loose tol).
    y_ref = jax.block_until_ready(
        jax.jit(functools.partial(reference_forward,
                                  last_relu=True, dilation=1))(params, x))
    err = float(jnp.max(jnp.abs(y - y_ref)))
    scale = float(jnp.max(jnp.abs(y_ref)))
    assert err <= 5e-2 * scale + 5e-2, f"max abs err {err} (ref max {scale})"

    print("KERNEL_OK")
</pallas_src>

<mosaic_0001>
module attributes {stable_mosaic.version = 11 : i64} {
  func.func @_bottleneck_kernel(%arg0: i32, %arg1: memref<1x256x64xf32, #tpu.memory_space<vmem>>, %arg2: memref<64x16xbf16, #tpu.memory_space<vmem>>, %arg3: memref<1x16xf32, #tpu.memory_space<vmem>>, %arg4: memref<144x32xbf16, #tpu.memory_space<vmem>>, %arg5: memref<1x32xf32, #tpu.memory_space<vmem>>, %arg6: memref<32x64xbf16, #tpu.memory_space<vmem>>, %arg7: memref<1x64xf32, #tpu.memory_space<vmem>>, %arg8: memref<1x196x64xf32, #tpu.memory_space<vmem>>, %arg9: memref<328x16xbf16, #tpu.memory_space<vmem>>) attributes {dimension_semantics = [#tpu.dimension_semantics<parallel>], iteration_bounds = array<i64: 2>, scalar_prefetch = 0 : i64, scratch_operands = 1 : i64, tpu.core_type = #tpu.core_type<tc>, window_params = [{transform_indices = @transform_0, window_bounds = array<i64: 1, 256, 64>}, {pipeline_mode = #tpu.pipeline_mode<synchronous>, transform_indices = @transform_1, window_bounds = array<i64: 64, 16>}, {pipeline_mode = #tpu.pipeline_mode<synchronous>, transform_indices = @transform_2, window_bounds = array<i64: 1, 16>}, {pipeline_mode = #tpu.pipeline_mode<synchronous>, transform_indices = @transform_3, window_bounds = array<i64: 144, 32>}, {pipeline_mode = #tpu.pipeline_mode<synchronous>, transform_indices = @transform_4, window_bounds = array<i64: 1, 32>}, {pipeline_mode = #tpu.pipeline_mode<synchronous>, transform_indices = @transform_5, window_bounds = array<i64: 32, 64>}, {pipeline_mode = #tpu.pipeline_mode<synchronous>, transform_indices = @transform_6, window_bounds = array<i64: 1, 64>}, {transform_indices = @transform_7, window_bounds = array<i64: 1, 196, 64>}]} {
    %c0 = arith.constant 0 : index
    %c0_0 = arith.constant 0 : index
    %c0_1 = arith.constant 0 : index
    %0 = vector.load %arg1[%c0, %c0_0, %c0_1] : memref<1x256x64xf32, #tpu.memory_space<vmem>>, vector<1x256x64xf32>
    %1 = vector.shape_cast %0 : vector<1x256x64xf32> to vector<256x64xf32>
    %2 = arith.truncf %1 : vector<256x64xf32> to vector<256x64xbf16>
    %c0_2 = arith.constant 0 : index
    %c0_3 = arith.constant 0 : index
    %3 = vector.load %arg2[%c0_2, %c0_3] : memref<64x16xbf16, #tpu.memory_space<vmem>>, vector<64x16xbf16>
    %cst = arith.constant dense<0.000000e+00> : vector<256x16xf32>
    %4 = tpu.matmul %2, %3, %cst {dimension_numbers = #tpu.dot_dimension_numbers<[1], [0], [0], [1], [0, 0, 1, 1], [], []>} : vector<256x64xbf16>, vector<64x16xbf16>, vector<256x16xf32> -> vector<256x16xf32>
    %c0_4 = arith.constant 0 : index
    %c0_5 = arith.constant 0 : index
    %5 = vector.load %arg3[%c0_4, %c0_5] : memref<1x16xf32, #tpu.memory_space<vmem>>, vector<1x16xf32>
    %6 = vector.broadcast %5 : vector<1x16xf32> to vector<256x16xf32>
    %7 = arith.addf %4, %6 : vector<256x16xf32>
    %cst_6 = arith.constant 0.000000e+00 : f32
    %8 = vector.broadcast %cst_6 : f32 to vector<256x16xf32>
    %9 = arith.maximumf %7, %8 : vector<256x16xf32>
    %10 = arith.truncf %9 : vector<256x16xf32> to vector<256x16xbf16>
    %cst_7 = arith.constant 0.000000e+00 : bf16
    %11 = vector.broadcast %cst_7 : bf16 to vector<328x16xbf16>
    %c0_8 = arith.constant 0 : index
    %c0_9 = arith.constant 0 : index
    %12 = vector.load %arg9[%c0_8, %c0_9] : memref<328x16xbf16, #tpu.memory_space<vmem>>, vector<328x16xbf16>
    tpu.vector_store %arg9[%c0_8, %c0_9], %11 {strides = array<i32>} : memref<328x16xbf16, #tpu.memory_space<vmem>>, vector<328x16xbf16>,
    %13 = vector.extract_strided_slice %10 {offsets = [0, 0], sizes = [16, 16], strides = [1, 1]} : vector<256x16xbf16> to vector<16x16xbf16>
    %c19 = arith.constant 19 : index
    %c0_10 = arith.constant 0 : index
    %14 = vector.load %arg9[%c19, %c0_10] : memref<328x16xbf16, #tpu.memory_space<vmem>>, vector<16x16xbf16>
    tpu.vector_store %arg9[%c19, %c0_10], %13 {strides = array<i32>} : memref<328x16xbf16, #tpu.memory_space<vmem>>, vector<16x16xbf16>,
    %15 = vector.extract_strided_slice %10 {offsets = [16, 0], sizes = [16, 16], strides = [1, 1]} : vector<256x16xbf16> to vector<16x16xbf16>
    %c37 = arith.constant 37 : index
    %c0_11 = arith.constant 0 : index
    %16 = vector.load %arg9[%c37, %c0_11] : memref<328x16xbf16, #tpu.memory_space<vmem>>, vector<16x16xbf16>
    tpu.vector_store %arg9[%c37, %c0_11], %15 {strides = array<i32>} : memref<328x16xbf16, #tpu.memory_space<vmem>>, vector<16x16xbf16>,
    %17 = vector.extract_strided_slice %10 {offsets = [32, 0], sizes = [16, 16], strides = [1, 1]} : vector<256x16xbf16> to vector<16x16xbf16>
    %c55 = arith.constant 55 : index
    %c0_12 = arith.constant 0 : index
    %18 = vector.load %arg9[%c55, %c0_12] : memref<328x16xbf16, #tpu.memory_space<vmem>>, vector<16x16xbf16>
    tpu.vector_store %arg9[%c55, %c0_12], %17 {strides = array<i32>} : memref<328x16xbf16, #tpu.memory_space<vmem>>, vector<16x16xbf16>,
    %19 = vector.extract_strided_slice %10 {offsets = [48, 0], sizes = [16, 16], strides = [1, 1]} : vector<256x16xbf16> to vector<16x16xbf16>
    %c73 = arith.constant 73 : index
    %c0_13 = arith.constant 0 : index
    %20 = vector.load %arg9[%c73, %c0_13] : memref<328x16xbf16, #tpu.memory_space<vmem>>, vector<16x16xbf16>
    tpu.vector_store %arg9[%c73, %c0_13], %19 {strides = array<i32>} : memref<328x16xbf16, #tpu.memory_space<vmem>>, vector<16x16xbf16>,
    %21 = vector.extract_strided_slice %10 {offsets = [64, 0], sizes = [16, 16], strides = [1, 1]} : vector<256x16xbf16> to vector<16x16xbf16>
    %c91 = arith.constant 91 : index
    %c0_14 = arith.constant 0 : index
    %22 = vector.load %arg9[%c91, %c0_14] : memref<328x16xbf16, #tpu.memory_space<vmem>>, vector<16x16xbf16>
    tpu.vector_store %arg9[%c91, %c0_14], %21 {strides = array<i32>} : memref<328x16xbf16, #tpu.memory_space<vmem>>, vector<16x16xbf16>,
    %23 = vector.extract_strided_slice %10 {offsets = [80, 0], sizes = [16, 16], strides = [1, 1]} : vector<256x16xbf16> to vector<16x16xbf16>
    %c109 = arith.constant 109 : index
    %c0_15 = arith.constant 0 : index
    %24 = vector.load %arg9[%c109, %c0_15] : memref<328x16xbf16, #tpu.memory_space<vmem>>, vector<16x16xbf16>
    tpu.vector_store %arg9[%c109, %c0_15], %23 {strides = array<i32>} : memref<328x16xbf16, #tpu.memory_space<vmem>>, vector<16x16xbf16>,
    %25 = vector.extract_strided_slice %10 {offsets = [96, 0], sizes = [16, 16], strides = [1, 1]} : vector<256x16xbf16> to vector<16x16xbf16>
    %c127 = arith.constant 127 : index
    %c0_16 = arith.constant 0 : index
    %26 = vector.load %arg9[%c127, %c0_16] : memref<328x16xbf16, #tpu.memory_space<vmem>>, vector<16x16xbf16>
    tpu.vector_store %arg9[%c127, %c0_16], %25 {strides = array<i32>} : memref<328x16xbf16, #tpu.memory_space<vmem>>, vector<16x16xbf16>,
    %27 = vector.extract_strided_slice %10 {offsets = [112, 0], sizes = [16, 16], strides = [1, 1]} : vector<256x16xbf16> to vector<16x16xbf16>
    %c145 = arith.constant 145 : index
    %c0_17 = arith.constant 0 : index
    %28 = vector.load %arg9[%c145, %c0_17] : memref<328x16xbf16, #tpu.memory_space<vmem>>, vector<16x16xbf16>
    tpu.vector_store %arg9[%c145, %c0_17], %27 {strides = array<i32>} : memref<328x16xbf16, #tpu.memory_space<vmem>>, vector<16x16xbf16>,
    %29 = vector.extract_strided_slice %10 {offsets = [128, 0], sizes = [16, 16], strides = [1, 1]} : vector<256x16xbf16> to vector<16x16xbf16>
    %c163 = arith.constant 163 : index
    %c0_18 = arith.constant 0 : index
    %30 = vector.load %arg9[%c163, %c0_18] : memref<328x16xbf16, #tpu.memory_space<vmem>>, vector<16x16xbf16>
    tpu.vector_store %arg9[%c163, %c0_18], %29 {strides = array<i32>} : memref<328x16xbf16, #tpu.memory_space<vmem>>, vector<16x16xbf16>,
    %31 = vector.extract_strided_slice %10 {offsets = [144, 0], sizes = [16, 16], strides = [1, 1]} : vector<256x16xbf16> to vector<16x16xbf16>
    %c181 = arith.constant 181 : index
    %c0_19 = arith.constant 0 : index
    %32 = vector.load %arg9[%c181, %c0_19] : memref<328x16xbf16, #tpu.memory_space<vmem>>, vector<16x16xbf16>
    tpu.vector_store %arg9[%c181, %c0_19], %31 {strides = array<i32>} : memref<328x16xbf16, #tpu.memory_space<vmem>>, vector<16x16xbf16>,
    %33 = vector.extract_strided_slice %10 {offsets = [160, 0], sizes = [16, 16], strides = [1, 1]} : vector<256x16xbf16> to vector<16x16xbf16>
    %c199 = arith.constant 199 : index
    %c0_20 = arith.constant 0 : index
    %34 = vector.load %arg9[%c199, %c0_20] : memref<328x16xbf16, #tpu.memory_space<vmem>>, vector<16x16xbf16>
    tpu.vector_store %arg9[%c199, %c0_20], %33 {strides = array<i32>} : memref<328x16xbf16, #tpu.memory_space<vmem>>, vector<16x16xbf16>,
    %35 = vector.extract_strided_slice %10 {offsets = [176, 0], sizes = [16, 16], strides = [1, 1]} : vector<256x16xbf16> to vector<16x16xbf16>
    %c217 = arith.constant 217 : index
    %c0_21 = arith.constant 0 : index
    %36 = vector.load %arg9[%c217, %c0_21] : memref<328x16xbf16, #tpu.memory_space<vmem>>, vector<16x16xbf16>
    tpu.vector_store %arg9[%c217, %c0_21], %35 {strides = array<i32>} : memref<328x16xbf16, #tpu.memory_space<vmem>>, vector<16x16xbf16>,
    %37 = vector.extract_strided_slice %10 {offsets = [192, 0], sizes = [16, 16], strides = [1, 1]} : vector<256x16xbf16> to vector<16x16xbf16>
    %c235 = arith.constant 235 : index
    %c0_22 = arith.constant 0 : index
    %38 = vector.load %arg9[%c235, %c0_22] : memref<328x16xbf16, #tpu.memory_space<vmem>>, vector<16x16xbf16>
    tpu.vector_store %arg9[%c235, %c0_22], %37 {strides = array<i32>} : memref<328x16xbf16, #tpu.memory_space<vmem>>, vector<16x16xbf16>,
    %39 = vector.extract_strided_slice %10 {offsets = [208, 0], sizes = [16, 16], strides = [1, 1]} : vector<256x16xbf16> to vector<16x16xbf16>
    %c253 = arith.constant 253 : index
    %c0_23 = arith.constant 0 : index
    %40 = vector.load %arg9[%c253, %c0_23] : memref<328x16xbf16, #tpu.memory_space<vmem>>, vector<16x16xbf16>
    tpu.vector_store %arg9[%c253, %c0_23], %39 {strides = array<i32>} : memref<328x16xbf16, #tpu.memory_space<vmem>>, vector<16x16xbf16>,
    %41 = vector.extract_strided_slice %10 {offsets = [224, 0], sizes = [16, 16], strides = [1, 1]} : vector<256x16xbf16> to vector<16x16xbf16>
    %c271 = arith.constant 271 : index
    %c0_24 = arith.constant 0 : index
    %42 = vector.load %arg9[%c271, %c0_24] : memref<328x16xbf16, #tpu.memory_space<vmem>>, vector<16x16xbf16>
    tpu.vector_store %arg9[%c271, %c0_24], %41 {strides = array<i32>} : memref<328x16xbf16, #tpu.memory_space<vmem>>, vector<16x16xbf16>,
    %43 = vector.extract_strided_slice %10 {offsets = [240, 0], sizes = [16, 16], strides = [1, 1]} : vector<256x16xbf16> to vector<16x16xbf16>
    %c289 = arith.constant 289 : index
    %c0_25 = arith.constant 0 : index
    %44 = vector.load %arg9[%c289, %c0_25] : memref<328x16xbf16, #tpu.memory_space<vmem>>, vector<16x16xbf16>
    tpu.vector_store %arg9[%c289, %c0_25], %43 {strides = array<i32>} : memref<328x16xbf16, #tpu.memory_space<vmem>>, vector<16x16xbf16>,
    %c19_26 = arith.constant 19 : index
    %c0_27 = arith.constant 0 : index
    %45 = vector.load %arg9[%c19_26, %c0_27] : memref<328x16xbf16, #tpu.memory_space<vmem>>, vector<248x16xbf16>
    %c20 = arith.constant 20 : index
    %c0_28 = arith.constant 0 : index
    %46 = vector.load %arg9[%c20, %c0_28] : memref<328x16xbf16, #tpu.memory_space<vmem>>, vector<248x16xbf16>
    %c21 = arith.constant 21 : index
    %c0_29 = arith.constant 0 : index
    %47 = vector.load %arg9[%c21, %c0_29] : memref<328x16xbf16, #tpu.memory_space<vmem>>, vector<248x16xbf16>
    %c37_30 = arith.constant 37 : index
    %c0_31 = arith.constant 0 : index
    %48 = vector.load %arg9[%c37_30, %c0_31] : memref<328x16xbf16, #tpu.memory_space<vmem>>, vector<248x16xbf16>
    %c38 = arith.constant 38 : index
    %c0_32 = arith.constant 0 : index
    %49 = vector.load %arg9[%c38, %c0_32] : memref<328x16xbf16, #tpu.memory_space<vmem>>, vector<248x16xbf16>
    %c39 = arith.constant 39 : index
    %c0_33 = arith.constant 0 : index
    %50 = vector.load %arg9[%c39, %c0_33] : memref<328x16xbf16, #tpu.memory_space<vmem>>, vector<248x16xbf16>
    %c55_34 = arith.constant 55 : index
    %c0_35 = arith.constant 0 : index
    %51 = vector.load %arg9[%c55_34, %c0_35] : memref<328x16xbf16, #tpu.memory_space<vmem>>, vector<248x16xbf16>
    %c56 = arith.constant 56 : index
    %c0_36 = arith.constant 0 : index
    %52 = vector.load %arg9[%c56, %c0_36] : memref<328x16xbf16, #tpu.memory_space<vmem>>, vector<248x16xbf16>
    %c57 = arith.constant 57 : index
    %c0_37 = arith.constant 0 : index
    %53 = vector.load %arg9[%c57, %c0_37] : memref<328x16xbf16, #tpu.memory_space<vmem>>, vector<248x16xbf16>
    %54 = tpu.concatenate %45, %46, %47, %48, %49, %50, %51, %52, %53 in 1 : vector<248x16xbf16>, vector<248x16xbf16>, vector<248x16xbf16>, vector<248x16xbf16>, vector<248x16xbf16>, vector<248x16xbf16>, vector<248x16xbf16>, vector<248x16xbf16>, vector<248x16xbf16> -> vector<248x144xbf16>
    %c0_38 = arith.constant 0 : index
    %c0_39 = arith.constant 0 : index
    %55 = vector.load %arg4[%c0_38, %c0_39] : memref<144x32xbf16, #tpu.memory_space<vmem>>, vector<144x32xbf16>
    %cst_40 = arith.constant dense<0.000000e+00> : vector<248x32xf32>
    %56 = tpu.matmul %54, %55, %cst_40 {dimension_numbers = #tpu.dot_dimension_numbers<[1], [0], [0], [1], [0, 0, 1, 1], [], []>} : vector<248x144xbf16>, vector<144x32xbf16>, vector<248x32xf32> -> vector<248x32xf32>
    %c0_41 = arith.constant 0 : index
    %c0_42 = arith.constant 0 : index
    %57 = vector.load %arg5[%c0_41, %c0_42] : memref<1x32xf32, #tpu.memory_space<vmem>>, vector<1x32xf32>
    %58 = vector.broadcast %57 : vector<1x32xf32> to vector<248x32xf32>
    %59 = arith.addf %56, %58 : vector<248x32xf32>
    %cst_43 = arith.constant 0.000000e+00 : f32
    %60 = vector.broadcast %cst_43 : f32 to vector<248x32xf32>
    %61 = arith.maximumf %59, %60 : vector<248x32xf32>
    %62 = arith.truncf %61 : vector<248x32xf32> to vector<248x32xbf16>
    %63 = vector.extract_strided_slice %62 {offsets = [0, 0], sizes = [14, 32], strides = [1, 1]} : vector<248x32xbf16> to vector<14x32xbf16>
    %64 = vector.extract_strided_slice %62 {offsets = [18, 0], sizes = [14, 32], strides = [1, 1]} : vector<248x32xbf16> to vector<14x32xbf16>
    %65 = vector.extract_strided_slice %62 {offsets = [36, 0], sizes = [14, 32], strides = [1, 1]} : vector<248x32xbf16> to vector<14x32xbf16>
    %66 = vector.extract_strided_slice %62 {offsets = [54, 0], sizes = [14, 32], strides = [1, 1]} : vector<248x32xbf16> to vector<14x32xbf16>
    %67 = vector.extract_strided_slice %62 {offsets = [72, 0], sizes = [14, 32], strides = [1, 1]} : vector<248x32xbf16> to vector<14x32xbf16>
    %68 = vector.extract_strided_slice %62 {offsets = [90, 0], sizes = [14, 32], strides = [1, 1]} : vector<248x32xbf16> to vector<14x32xbf16>
    %69 = vector.extract_strided_slice %62 {offsets = [108, 0], sizes = [14, 32], strides = [1, 1]} : vector<248x32xbf16> to vector<14x32xbf16>
    %70 = vector.extract_strided_slice %62 {offsets = [126, 0], sizes = [14, 32], strides = [1, 1]} : vector<248x32xbf16> to vector<14x32xbf16>
    %71 = vector.extract_strided_slice %62 {offsets = [144, 0], sizes = [14, 32], strides = [1, 1]} : vector<248x32xbf16> to vector<14x32xbf16>
    %72 = vector.extract_strided_slice %62 {offsets = [162, 0], sizes = [14, 32], strides = [1, 1]} : vector<248x32xbf16> to vector<14x32xbf16>
    %73 = vector.extract_strided_slice %62 {offsets = [180, 0], sizes = [14, 32], strides = [1, 1]} : vector<248x32xbf16> to vector<14x32xbf16>
    %74 = vector.extract_strided_slice %62 {offsets = [198, 0], sizes = [14, 32], strides = [1, 1]} : vector<248x32xbf16> to vector<14x32xbf16>
    %75 = vector.extract_strided_slice %62 {offsets = [216, 0], sizes = [14, 32], strides = [1, 1]} : vector<248x32xbf16> to vector<14x32xbf16>
    %76 = vector.extract_strided_slice %62 {offsets = [234, 0], sizes = [14, 32], strides = [1, 1]} : vector<248x32xbf16> to vector<14x32xbf16>
    %77 = tpu.concatenate %63, %64, %65, %66, %67, %68, %69, %70, %71, %72, %73, %74, %75, %76 in 0 : vector<14x32xbf16>, vector<14x32xbf16>, vector<14x32xbf16>, vector<14x32xbf16>, vector<14x32xbf16>, vector<14x32xbf16>, vector<14x32xbf16>, vector<14x32xbf16>, vector<14x32xbf16>, vector<14x32xbf16>, vector<14x32xbf16>, vector<14x32xbf16>, vector<14x32xbf16>, vector<14x32xbf16> -> vector<196x32xbf16>
    %c0_44 = arith.constant 0 : index
    %c17 = arith.constant 17 : index
    %c0_45 = arith.constant 0 : index
    %78 = vector.load %arg1[%c0_44, %c17, %c0_45] : memref<1x256x64xf32, #tpu.memory_space<vmem>>, vector<1x14x64xf32>
    %79 = vector.shape_cast %78 : vector<1x14x64xf32> to vector<14x64xf32>
    %c0_46 = arith.constant 0 : index
    %c33 = arith.constant 33 : index
    %c0_47 = arith.constant 0 : index
    %80 = vector.load %arg1[%c0_46, %c33, %c0_47] : memref<1x256x64xf32, #tpu.memory_space<vmem>>, vector<1x14x64xf32>
    %81 = vector.shape_cast %80 : vector<1x14x64xf32> to vector<14x64xf32>
    %c0_48 = arith.constant 0 : index
    %c49 = arith.constant 49 : index
    %c0_49 = arith.constant 0 : index
    %82 = vector.load %arg1[%c0_48, %c49, %c0_49] : memref<1x256x64xf32, #tpu.memory_space<vmem>>, vector<1x14x64xf32>
    %83 = vector.shape_cast %82 : vector<1x14x64xf32> to vector<14x64xf32>
    %c0_50 = arith.constant 0 : index
    %c65 = arith.constant 65 : index
    %c0_51 = arith.constant 0 : index
    %84 = vector.load %arg1[%c0_50, %c65, %c0_51] : memref<1x256x64xf32, #tpu.memory_space<vmem>>, vector<1x14x64xf32>
    %85 = vector.shape_cast %84 : vector<1x14x64xf32> to vector<14x64xf32>
    %c0_52 = arith.constant 0 : index
    %c81 = arith.constant 81 : index
    %c0_53 = arith.constant 0 : index
    %86 = vector.load %arg1[%c0_52, %c81, %c0_53] : memref<1x256x64xf32, #tpu.memory_space<vmem>>, vector<1x14x64xf32>
    %87 = vector.shape_cast %86 : vector<1x14x64xf32> to vector<14x64xf32>
    %c0_54 = arith.constant 0 : index
    %c97 = arith.constant 97 : index
    %c0_55 = arith.constant 0 : index
    %88 = vector.load %arg1[%c0_54, %c97, %c0_55] : memref<1x256x64xf32, #tpu.memory_space<vmem>>, vector<1x14x64xf32>
    %89 = vector.shape_cast %88 : vector<1x14x64xf32> to vector<14x64xf32>
    %c0_56 = arith.constant 0 : index
    %c113 = arith.constant 113 : index
    %c0_57 = arith.constant 0 : index
    %90 = vector.load %arg1[%c0_56, %c113, %c0_57] : memref<1x256x64xf32, #tpu.memory_space<vmem>>, vector<1x14x64xf32>
    %91 = vector.shape_cast %90 : vector<1x14x64xf32> to vector<14x64xf32>
    %c0_58 = arith.constant 0 : index
    %c129 = arith.constant 129 : index
    %c0_59 = arith.constant 0 : index
    %92 = vector.load %arg1[%c0_58, %c129, %c0_59] : memref<1x256x64xf32, #tpu.memory_space<vmem>>, vector<1x14x64xf32>
    %93 = vector.shape_cast %92 : vector<1x14x64xf32> to vector<14x64xf32>
    %c0_60 = arith.constant 0 : index
    %c145_61 = arith.constant 145 : index
    %c0_62 = arith.constant 0 : index
    %94 = vector.load %arg1[%c0_60, %c145_61, %c0_62] : memref<1x256x64xf32, #tpu.memory_space<vmem>>, vector<1x14x64xf32>
    %95 = vector.shape_cast %94 : vector<1x14x64xf32> to vector<14x64xf32>
    %c0_63 = arith.constant 0 : index
    %c161 = arith.constant 161 : index
    %c0_64 = arith.constant 0 : index
    %96 = vector.load %arg1[%c0_63, %c161, %c0_64] : memref<1x256x64xf32, #tpu.memory_space<vmem>>, vector<1x14x64xf32>
    %97 = vector.shape_cast %96 : vector<1x14x64xf32> to vector<14x64xf32>
    %c0_65 = arith.constant 0 : index
    %c177 = arith.constant 177 : index
    %c0_66 = arith.constant 0 : index
    %98 = vector.load %arg1[%c0_65, %c177, %c0_66] : memref<1x256x64xf32, #tpu.memory_space<vmem>>, vector<1x14x64xf32>
    %99 = vector.shape_cast %98 : vector<1x14x64xf32> to vector<14x64xf32>
    %c0_67 = arith.constant 0 : index
    %c193 = arith.constant 193 : index
    %c0_68 = arith.constant 0 : index
    %100 = vector.load %arg1[%c0_67, %c193, %c0_68] : memref<1x256x64xf32, #tpu.memory_space<vmem>>, vector<1x14x64xf32>
    %101 = vector.shape_cast %100 : vector<1x14x64xf32> to vector<14x64xf32>
    %c0_69 = arith.constant 0 : index
    %c209 = arith.constant 209 : index
    %c0_70 = arith.constant 0 : index
    %102 = vector.load %arg1[%c0_69, %c209, %c0_70] : memref<1x256x64xf32, #tpu.memory_space<vmem>>, vector<1x14x64xf32>
    %103 = vector.shape_cast %102 : vector<1x14x64xf32> to vector<14x64xf32>
    %c0_71 = arith.constant 0 : index
    %c225 = arith.constant 225 : index
    %c0_72 = arith.constant 0 : index
    %104 = vector.load %arg1[%c0_71, %c225, %c0_72] : memref<1x256x64xf32, #tpu.memory_space<vmem>>, vector<1x14x64xf32>
    %105 = vector.shape_cast %104 : vector<1x14x64xf32> to vector<14x64xf32>
    %106 = tpu.concatenate %79, %81, %83, %85, %87, %89, %91, %93, %95, %97, %99, %101, %103, %105 in 0 : vector<14x64xf32>, vector<14x64xf32>, vector<14x64xf32>, vector<14x64xf32>, vector<14x64xf32>, vector<14x64xf32>, vector<14x64xf32>, vector<14x64xf32>, vector<14x64xf32>, vector<14x64xf32>, vector<14x64xf32>, vector<14x64xf32>, vector<14x64xf32>, vector<14x64xf32> -> vector<196x64xf32>
    %c0_73 = arith.constant 0 : index
    %c0_74 = arith.constant 0 : index
    %107 = vector.load %arg6[%c0_73, %c0_74] : memref<32x64xbf16, #tpu.memory_space<vmem>>, vector<32x64xbf16>
    %cst_75 = arith.constant dense<0.000000e+00> : vector<196x64xf32>
    %108 = tpu.matmul %77, %107, %cst_75 {dimension_numbers = #tpu.dot_dimension_numbers<[1], [0], [0], [1], [0, 0, 1, 1], [], []>} : vector<196x32xbf16>, vector<32x64xbf16>, vector<196x64xf32> -> vector<196x64xf32>
    %c0_76 = arith.constant 0 : index
    %c0_77 = arith.constant 0 : index
    %109 = vector.load %arg7[%c0_76, %c0_77] : memref<1x64xf32, #tpu.memory_space<vmem>>, vector<1x64xf32>
    %110 = vector.broadcast %109 : vector<1x64xf32> to vector<196x64xf32>
    %111 = arith.addf %108, %110 : vector<196x64xf32>
    %112 = arith.addf %111, %106 : vector<196x64xf32>
    %cst_78 = arith.constant 0.000000e+00 : f32
    %113 = vector.broadcast %cst_78 : f32 to vector<196x64xf32>
    %114 = arith.maximumf %112, %113 : vector<196x64xf32>
    %c0_79 = arith.constant 0 : index
    %c0_80 = arith.constant 0 : index
    %c0_81 = arith.constant 0 : index
    %115 = vector.load %arg8[%c0_79, %c0_80, %c0_81] : memref<1x196x64xf32, #tpu.memory_space<vmem>>, vector<1x196x64xf32>
    %116 = vector.shape_cast %115 : vector<1x196x64xf32> to vector<196x64xf32>
    %117 = vector.shape_cast %114 : vector<196x64xf32> to vector<1x196x64xf32>
    tpu.vector_store %arg8[%c0_79, %c0_80, %c0_81], %117 {strides = array<i32>} : memref<1x196x64xf32, #tpu.memory_space<vmem>>, vector<1x196x64xf32>,
    return
  }
  func.func @transform_0(%arg0: i32) -> (i32, i32, i32) {
    %c0_i32 = arith.constant 0 : i32
    %c0_i32_0 = arith.constant 0 : i32
    %c0_i32_1 = arith.constant 0 : i32
    return %arg0, %c0_i32, %c0_i32_0 : i32, i32, i32
  }
  func.func @transform_1(%arg0: i32) -> (i32, i32) {
    %c0_i32 = arith.constant 0 : i32
    %c0_i32_0 = arith.constant 0 : i32
    %c0_i32_1 = arith.constant 0 : i32
    return %c0_i32, %c0_i32_0 : i32, i32
  }
  func.func @transform_2(%arg0: i32) -> (i32, i32) {
    %c0_i32 = arith.constant 0 : i32
    %c0_i32_0 = arith.constant 0 : i32
    %c0_i32_1 = arith.constant 0 : i32
    return %c0_i32, %c0_i32_0 : i32, i32
  }
  func.func @transform_3(%arg0: i32) -> (i32, i32) {
    %c0_i32 = arith.constant 0 : i32
    %c0_i32_0 = arith.constant 0 : i32
    %c0_i32_1 = arith.constant 0 : i32
    return %c0_i32, %c0_i32_0 : i32, i32
  }
  func.func @transform_4(%arg0: i32) -> (i32, i32) {
    %c0_i32 = arith.constant 0 : i32
    %c0_i32_0 = arith.constant 0 : i32
    %c0_i32_1 = arith.constant 0 : i32
    return %c0_i32, %c0_i32_0 : i32, i32
  }
  func.func @transform_5(%arg0: i32) -> (i32, i32) {
    %c0_i32 = arith.constant 0 : i32
    %c0_i32_0 = arith.constant 0 : i32
    %c0_i32_1 = arith.constant 0 : i32
    return %c0_i32, %c0_i32_0 : i32, i32
  }
  func.func @transform_6(%arg0: i32) -> (i32, i32) {
    %c0_i32 = arith.constant 0 : i32
    %c0_i32_0 = arith.constant 0 : i32
    %c0_i32_1 = arith.constant 0 : i32
    return %c0_i32, %c0_i32_0 : i32, i32
  }
  func.func @transform_7(%arg0: i32) -> (i32, i32, i32) {
    %c0_i32 = arith.constant 0 : i32
    %c0_i32_0 = arith.constant 0 : i32
    %c0_i32_1 = arith.constant 0 : i32
    return %arg0, %c0_i32, %c0_i32_0 : i32, i32, i32
  }
}

</mosaic_0001>

<bundles_post_ra>
// kernel: bottleneck_big_ci_forward.1
= control target key start
LH: loop header
LB: loop body
LE: loop exit
PB: predicated region body
PF: predicated region fallthrough
CT: control target
= control target key end

     0   :  { %s3900_s24 = smov 0   ;;  %s5686_s0 = inlined_call_operand.vmem [shape: f32[2,256,64], index: 0, kind: input, shape index: {}]   ;;  %s5687_s1 = inlined_call_operand.vmem [shape: bf16[64,16], index: 1, kind: input, shape index: {}]   ;;  %s5688_s2 = inlined_call_operand.vmem [shape: f32[1,16], index: 2, kind: input, shape index: {}]   ;;  %s5689_s3 = inlined_call_operand.vmem [shape: bf16[144,32], index: 3, kind: input, shape index: {}]   ;;  %s5690_s4 = inlined_call_operand.vmem [shape: f32[1,32], index: 4, kind: input, shape index: {}]   ;;  %s5691_s5 = inlined_call_operand.vmem [shape: bf16[32,64], index: 5, kind: input, shape index: {}]   ;;  %s5692_s6 = inlined_call_operand.vmem [shape: f32[1,64], index: 6, kind: input, shape index: {}]   ;;  %s5693_s7 = inlined_call_operand.vmem [shape: f32[2,196,64], index: 7, kind: output, shape index: {}]  }
   0x1 LB: > { %s3454_s25 = sadd.s32 4294967295, %s3848_s24   ;;  %p3458_p0 = scmp.ge.s32.totalorder %s3848_s24, 1  ;;  %s3848_s24 = sphi %s3900_s24, %s17_s24  }
   0x2   : > { %p237_p1 = scmp.lt.s32.totalorder %s3848_s24, 3 }
   0x4   : > { %p238_p2 = pnand %p3458_p0, %p237_p1 }
   0x6   : > { %241 = sbr.rel (%p238_p2) target bundleno = 1093 (0x445), region = 48 }
   0xd   : > { %v3788_v0 = vld [vmem:[%s5687_s1] sm:$0xff]   ;;  %p269_p3 = scmp.lt.s32.totalorder %s3454_s25, 1  ;;  %v3789_v1 = vld [vmem:[%s5687_s1 + $0x8] sm:$0xff]   ;;  %v3790_v2 = vld [vmem:[%s5687_s1 + $0x10] sm:$0xff]   ;;  %vm5694_vm0 = vcmask 523264   ;;  %vm5696_vm1 = vcmask 125952  }
   0xe   : > { %3669 = vmatprep.subr.bf16.mxu0 %v3788_v0  ;;  %v3791_v6 = vld [vmem:[%s5687_s1 + $0x18] sm:$0xff]   ;;  %v3850_v52 = vmov 0   ;;  %v4054_v53 = vld [vmem:[%s5688_s2] ss:$0 sm:$0xff]  ;;  %vm739_vm2 = vcmask 125954   ;;  %vm697_vm4 = vcmask 125953  }
   0xf   : > { %s5905_s25 = smov (!%p269_p3, %s3454_s25), 1  ;;  %3670 = vmatpush3.bf16.msra.mxu0 %v3788_v0  ;;  %630 = vst.msk [vmem:[#allocation2 + $0x10] sm:$0xf] %vm5696_vm1, %v3850_v52  ;;  %628 = vst.msk [vmem:[#allocation2 + $0x8] sm:$0xf] %vm5696_vm1, %v3850_v52  ;;  %2732 = vmatprep.subr.bf16.mxu1 %v3850_v52  ;;  %vm746_vm9 = vcmask 124928  }
  0x10   : > { %3671 = vmatprep.subr.bf16.mxu0 %v3789_v1  ;;  %s3601_s9 = sshll.u32 %s5905_s25, 8  ;;  %629 = vst.msk [vmem:[#allocation2 + $0xc] sm:$0xf] %vm5696_vm1, %v3850_v52  ;;  %631 = vst.msk [vmem:[#allocation2 + $0x14] sm:$0xf] %vm5696_vm1, %v3850_v52  ;;  %vm704_vm11 = vcmask 123904  }
  0x11   : > { %s3923_s12 = scalar_lea.vmem %s5686_s0, %s3601_s9  ;;  %632 = vst.msk [vmem:[#allocation2 + $0x18] sm:$0xf] %vm5696_vm1, %v3850_v52  ;;  %633 = vst.msk [vmem:[#allocation2 + $0x1c] sm:$0xf] %vm5696_vm1, %v3850_v52  ;;  %vm740_vm3 = vsmask.f32 7946 }
  0x12   : > { %v280_v3 = vld [vmem:[%s3923_s12] sm:$0xff]  ;;  %v281_v4 = vld [vmem:[%s3923_s12 + $0x8] sm:$0xff]  ;;  %v282_v7 = vld [vmem:[%s3923_s12 + $0x10] sm:$0xff]  ;;  %634 = vst.msk [vmem:[#allocation2 + $0x20] sm:$0xf] %vm5696_vm1, %v3850_v52  ;;  %vm781_vm12 = vcmask 125955  }
  0x13   : > { %3672 = vmatpush3.bf16.msra.mxu0 %v3789_v1  ;;  %v312_v5 = vpack.c.bf16 %v281_v4, %v280_v3  ;;  %v283_v8 = vld [vmem:[%s3923_s12 + $0x18] sm:$0xff]  ;;  %v284_v9 = vld [vmem:[%s3923_s12 + $0x20] sm:$0xff]  ;;  %v285_v10 = vld [vmem:[%s3923_s12 + $0x28] sm:$0xff]  ;;  %635 = vst.msk [vmem:[#allocation2 + $0x24] sm:$0xf] %vm5696_vm1, %v3850_v52  ;;  %s3851_s21 = smov 32  }
  0x14   : > { %3673 = vmatprep.subr.bf16.mxu0 %v3790_v2  ;;  %v313_v11 = vpack.c.bf16 %v283_v8, %v282_v7  ;;  %v314_v12 = vpack.c.bf16 %v285_v10, %v284_v9  ;;  %v286_v13 = vld [vmem:[%s3923_s12 + $0x30] sm:$0xff]  ;;  %v287_v14 = vld [vmem:[%s3923_s12 + $0x38] sm:$0xff]  ;;  %v288_v15 = vld [vmem:[%s3923_s12 + $0x40] sm:$0xff]  ;;  %636 = vst.msk [vmem:[#allocation2 + $0x28] sm:$0xf] %vm5696_vm1, %v3850_v52  ;;  %s3852_s26 = smov 16  }
  0x15   : > { %3677 = vmatprep.mubr.msk.bf16.mxu0 %vm5694_vm0, %v312_v5  ;;  %v289_v16 = vld [vmem:[%s3923_s12 + $0x48] sm:$0xff]  ;;  %v315_v17 = vpack.c.bf16 %v287_v14, %v286_v13  ;;  %v290_v19 = vld [vmem:[%s3923_s12 + $0x50] sm:$0xff]  ;;  %v291_v20 = vld [vmem:[%s3923_s12 + $0x58] sm:$0xff]  ;;  %637 = vst.msk [vmem:[#allocation2 + $0x2c] sm:$0xf] %vm5696_vm1, %v3850_v52  ;;  %s3853_s8 = smov 48  }
  0x16   : > { %v316_v18 = vpack.c.bf16 %v289_v16, %v288_v15  ;;  %v292_v21 = vld [vmem:[%s3923_s12 + $0x60] sm:$0xff]  ;;  %v293_v22 = vld [vmem:[%s3923_s12 + $0x68] sm:$0xff]  ;;  %v317_v23 = vpack.c.bf16 %v291_v20, %v290_v19  ;;  %v294_v25 = vld [vmem:[%s3923_s12 + $0x70] sm:$0xff]  ;;  %638 = vst.msk [vmem:[#allocation2 + $0x30] sm:$0xf] %vm5696_vm1, %v3850_v52  ;;  %s3854_s9 = smov 80  }
  0x17   : > { %3674 = vmatpush3.bf16.msra.mxu0 %v3790_v2  ;;  %v318_v24 = vpack.c.bf16 %v293_v22, %v292_v21  ;;  %v295_v26 = vld [vmem:[%s3923_s12 + $0x78] sm:$0xff]  ;;  %v296_v27 = vld [vmem:[%s3923_s12 + $0x80] sm:$0xff]  ;;  %v297_v28 = vld [vmem:[%s3923_s12 + $0x88] sm:$0xff]  ;;  %639 = vst.msk [vmem:[#allocation2 + $0x34] sm:$0xf] %vm5696_vm1, %v3850_v52  ;;  %s3855_s15 = smov 96  }
  0x18   : > { %3675 = vmatprep.subr.bf16.mxu0 %v3791_v6  ;;  %v319_v29 = vpack.c.bf16 %v295_v26, %v294_v25  ;;  %v320_v30 = vpack.c.bf16 %v297_v28, %v296_v27  ;;  %v298_v31 = vld [vmem:[%s3923_s12 + $0x90] sm:$0xff]  ;;  %v299_v32 = vld [vmem:[%s3923_s12 + $0x98] sm:$0xff]  ;;  %v300_v33 = vld [vmem:[%s3923_s12 + $0xa0] sm:$0xff]  ;;  %640 = vst.msk [vmem:[#allocation2 + $0x38] sm:$0xf] %vm5696_vm1, %v3850_v52  ;;  %s3856_s16 = smov 64  }
  0x19   : > { %v301_v34 = vld [vmem:[%s3923_s12 + $0xa8] sm:$0xff]  ;;  %v321_v35 = vpack.c.bf16 %v299_v32, %v298_v31  ;;  %v302_v37 = vld [vmem:[%s3923_s12 + $0xb0] sm:$0xff]  ;;  %v303_v38 = vld [vmem:[%s3923_s12 + $0xb8] sm:$0xff]  ;;  %641 = vst.msk [vmem:[#allocation2 + $0x3c] sm:$0xf] %vm5696_vm1, %v3850_v52  ;;  %s3857_s22 = smov 112  }
  0x1a   : > { %v322_v36 = vpack.c.bf16 %v301_v34, %v300_v33  ;;  %v304_v39 = vld [vmem:[%s3923_s12 + $0xc0] sm:$0xff]  ;;  %v305_v40 = vld [vmem:[%s3923_s12 + $0xc8] sm:$0xff]  ;;  %v323_v41 = vpack.c.bf16 %v303_v38, %v302_v37  ;;  %v306_v43 = vld [vmem:[%s3923_s12 + $0xd0] sm:$0xff]  ;;  %642 = vst.msk [vmem:[#allocation2 + $0x40] sm:$0xf] %vm5696_vm1, %v3850_v52  ;;  %s3769_s11 = smul.u32 200, %s5905_s25 }
  0x1b   : > { %3676 = vmatpush3.bf16.msra.mxu0 %v3791_v6  ;;  %v324_v42 = vpack.c.bf16 %v305_v40, %v304_v39  ;;  %v307_v44 = vld [vmem:[%s3923_s12 + $0xd8] sm:$0xff]  ;;  %v308_v45 = vld [vmem:[%s3923_s12 + $0xe0] sm:$0xff]  ;;  %v309_v46 = vld [vmem:[%s3923_s12 + $0xe8] sm:$0xff]  ;;  %643 = vst.msk [vmem:[#allocation2 + $0x44] sm:$0xf] %vm5696_vm1, %v3850_v52 }
  0x1c   : > { %v325_v47 = vpack.c.bf16 %v307_v44, %v306_v43  ;;  %v326_v48 = vpack.c.bf16 %v309_v46, %v308_v45  ;;  %v310_v49 = vld [vmem:[%s3923_s12 + $0xf0] sm:$0xff]  ;;  %v311_v50 = vld [vmem:[%s3923_s12 + $0xf8] sm:$0xff]  ;;  %644 = vst.msk [vmem:[#allocation2 + $0x48] sm:$0xf] %vm5696_vm1, %v3850_v52  ;;  %645 = vst.msk [vmem:[#allocation2 + $0x4c] sm:$0xf] %vm5696_vm1, %v3850_v52 }
  0x1d   : > { %v327_v51 = vpack.c.bf16 %v311_v50, %v310_v49  ;;  %646 = vst.msk [vmem:[#allocation2 + $0x50] sm:$0xf] %vm5696_vm1, %v3850_v52  ;;  %647 = vst.msk [vmem:[#allocation2 + $0x54] sm:$0xf] %vm5696_vm1, %v3850_v52  ;;  %vm698_vm5 = vsmask.f32 7942 }
  0x1e   : > { %3678 = vmatmul.mubr.msk.bf16.vlgmr.msra.gmra.mrb[0].mxu0 %vm5694_vm0, %v313_v11  ;;  %648 = vst.msk [vmem:[#allocation2 + $0x58] sm:$0xf] %vm5696_vm1, %v3850_v52  ;;  %649 = vst.msk [vmem:[#allocation2 + $0x5c] sm:$0xf] %vm5696_vm1, %v3850_v52  ;;  %vm714_vm6 = vsmask.f32 2304 }
  0x1f   : > { %3681 = vmatprep.mubr.msk.bf16.mxu0 %vm5694_vm0, %v314_v12  ;;  %650 = vst.msk [vmem:[#allocation2 + $0x60] sm:$0xf] %vm5696_vm1, %v3850_v52  ;;  %651 = vst.msk [vmem:[#allocation2 + $0x64] sm:$0xf] %vm5696_vm1, %v3850_v52  ;;  %vm715_vm7 = vsmask.f32 6416 }
  0x20   : > { %652 = vst.msk [vmem:[#allocation2 + $0x68] sm:$0xf] %vm5696_vm1, %v3850_v52  ;;  %653 = vst.msk [vmem:[#allocation2 + $0x6c] sm:$0xf] %vm5696_vm1, %v3850_v52  ;;  %vm5695_vm8 = vsmask.f32 1280 }
  0x21   : > { %654 = vst.msk [vmem:[#allocation2 + $0x70] sm:$0xf] %vm5696_vm1, %v3850_v52  ;;  %655 = vst.msk [vmem:[#allocation2 + $0x74] sm:$0xf] %vm5696_vm1, %v3850_v52  ;;  %vm673_vm10 = vsmask.f32 5392 }
  0x22   : > { %656 = vst.msk [vmem:[#allocation2 + $0x78] sm:$0xf] %vm5696_vm1, %v3850_v52  ;;  %657 = vst.msk [vmem:[#allocation2 + $0x7c] sm:$0xf] %vm5696_vm1, %v3850_v52  ;;  %v742_v7 = vld [vmem:[#allocation2 + $0x10] sm:$0xc] }
  0x23   : > { %658 = vst.msk [vmem:[#allocation2 + $0x80] sm:$0xf] %vm5696_vm1, %v3850_v52  ;;  %659 = vst.msk [vmem:[#allocation2 + $0x84] sm:$0xf] %vm5696_vm1, %v3850_v52  ;;  %vm782_vm13 = vsmask.f32 7950 }
  0x24   : > { %660 = vst.msk [vmem:[#allocation2 + $0x88] sm:$0xf] %vm5696_vm1, %v3850_v52  ;;  %661 = vst.msk [vmem:[#allocation2 + $0x8c] sm:$0xf] %vm5696_vm1, %v3850_v52  ;;  %v700_v25 = vld [vmem:[#allocation2 + $0x8] sm:$0xe] }
  0x25   : > { %662 = vst.msk [vmem:[#allocation2 + $0x90] sm:$0xf] %vm5696_vm1, %v3850_v52  ;;  %663 = vst.msk [vmem:[#allocation2 + $0x94] sm:$0xf] %vm5696_vm1, %v3850_v52  ;;  %v748_v43 = vld [vmem:[#allocation2 + $0x18] sm:$0x7] }
  0x26   : > { %3682 = vmatmul.mubr.msk.bf16.gmra.mrb[4].mxu0 %vm5694_vm0, %v315_v17  ;;  %664 = vst.msk [vmem:[#allocation2 + $0x98] sm:$0xf] %vm5696_vm1, %v3850_v52  ;;  %vm4062_vm15 = vmand %vm739_vm2, %vm740_vm3  ;;  %vm799_vm3 = vsmask.f32 4368  ;;  %v706_v49 = vld [vmem:[#allocation2 + $0x10] sm:$0x3] }
  0x27   : > { %3685 = vmatprep.mubr.msk.bf16.mxu0 %vm5694_vm0, %v316_v18  ;;  %vm4075_vm14 = vmor %vm714_vm6, %vm715_vm7  ;;  %vm827_vm7 = vcmask 122880  }
  0x28   : > { %vm4084_vm2 = vmor %vm5695_vm8, %vm673_vm10 }
  0x29   : > { %vm4100_vm10 = vmand %vm704_vm11, %vm5695_vm8 }
  0x2e   : > { %3686 = vmatmul.mubr.msk.bf16.gmra.mrb[8].mxu0 %vm5694_vm0, %v317_v23 }
  0x2f   : > { %3689 = vmatprep.mubr.msk.bf16.mxu0 %vm5694_vm0, %v318_v24 }
  0x36   : > { %3690 = vmatmul.mubr.msk.bf16.gmra.mrb[12].mxu0 %vm5694_vm0, %v319_v29 }
  0x37   : > { %3693 = vmatprep.mubr.msk.bf16.mxu0 %vm5694_vm0, %v320_v30 }
  0x3e   : > { %3694 = vmatmul.mubr.msk.bf16.gmra.mrb[16].mxu0 %vm5694_vm0, %v321_v35 }
  0x3f   : > { %3697 = vmatprep.mubr.msk.bf16.mxu0 %vm5694_vm0, %v322_v36 }
  0x46   : > { %3698 = vmatmul.mubr.msk.bf16.gmra.mrb[20].mxu0 %vm5694_vm0, %v323_v41 }
  0x47   : > { %3701 = vmatprep.mubr.msk.bf16.mxu0 %vm5694_vm0, %v324_v42 }
  0x4e   : > { %3702 = vmatmul.mubr.msk.bf16.gmra.mrb[24].mxu0 %vm5694_vm0, %v325_v47 }
  0x4f   : > { %3705 = vmatprep.mubr.msk.bf16.mxu0 %vm5694_vm0, %v326_v48  ;;  %v1195_v48 = vld [vmem:[#allocation2 + $0x84] sm:$0x8] }
  0x56   : > { %3706 = vmatmul.mubr.msk.bf16.gmra.mrb[28].mxu0 %vm5694_vm0, %v327_v51  ;;  %vm4068_vm0 = vmand %vm697_vm4, %vm698_vm5  ;;  %vm757_vm5 = vsmask.f32 7440 }
  0x57   : > { %vm4092_vm4 = vmand %vm746_vm9, %vm714_vm6  ;;  %vm5733_vm9 = vsmask.f32 7938 }
  0x58   : > { %vm4116_vm6 = vmand %vm781_vm12, %vm782_vm13  ;;  %vm5736_vm12 = vsmask.f32 256 }
  0x59   : > { %vm4124_vm11 = vmand %vm5696_vm1, %vm5733_vm9  ;;  %vm5739_vm9 = vsmask.f32 3328 }
  0x5a   : > { %vm4133_vm13 = vmor %vm5736_vm12, %vm799_vm3 }
  0x5b   : > { %vm4141_vm8 = vmor %vm5739_vm9, %vm757_vm5 }
  0x5c   : > { %vm5742_vm3 = vmmov %vm5736_vm12 }
  0x5d   : > { %vm4147_vm12 = vmand %vm827_vm7, %vm5742_vm3  ;;  %vm5701_vm3 = vsmask.f32 7424 }
  0x5e   : > { %vm5745_vm5 = vmmov %vm5739_vm9  ;;  %vm5697_vm9 = vcmask 1046528  }
  0x5f   : > { %vm4161_vm7 = vmand %vm5696_vm1, %vm5745_vm5  ;;  %vm1754_vm5 = vcmask 1045504  }
  0xf1   : > { %v3679_v54 = vpop.f32.mrb[0].mxu0 }
  0xf2   : > { %v459_v55 = vadd.f32 %v3679_v54, %v4054_v53  ;;  %v450_v56 = vpop.f32.mrb[1].mxu0 }
  0xf3   : > { %v451_v57 = vadd.f32 %v4054_v53, %v450_v56  ;;  %v3680_v58 = vpop.f32.mrb[2].mxu0 }
  0xf4   : > { %v579_v59 = vmax.f32 %v459_v55, 0.0  ;;  %v462_v60 = vadd.f32 %v3680_v58, %v4054_v53  ;;  %v453_v61 = vpop.f32.mrb[3].mxu0 }
  0xf5   : > { %v577_v62 = vmax.f32 %v451_v57, 0.0  ;;  %v454_v63 = vadd.f32 %v4054_v53, %v453_v61 }
  0xf6   : > { %v3604_v0 = vpack.c.bf16 %v579_v59, %v579_v59  ;;  %v580_v1 = vmax.f32 %v462_v60, 0.0 }
  0xf7   : > { %v3602_v2 = vpack.c.bf16 %v577_v62, %v577_v62  ;;  %v578_v3 = vmax.f32 %v454_v63, 0.0 }
  0xf8   : > { %v718_v4 = vshrl.u32 %v3604_v0, 16  ;;  %v721_v5 = vshll.u32 %v3604_v0, 16  ;;  %v3605_v6 = vpack.c.bf16 %v580_v1, %v580_v1 }
  0xf9   : > { %v676_v8 = vshrl.u32 %v3602_v2, 16  ;;  %v679_v9 = vshll.u32 %v3602_v2, 16  ;;  %v3603_v10 = vpack.c.bf16 %v578_v3, %v578_v3  ;;  %v3683_v11 = vpop.f32.mrb[4].mxu0 }
  0xfa   : > { %v720_v12 = vrot.slane %v718_v4, 5  ;;  %v723_v13 = vrot.slane %v721_v5, 6  ;;  %v727_v14 = vshrl.u32 %v3605_v6, 16  ;;  %v730_v15 = vshll.u32 %v3605_v6, 16  ;;  %v466_v16 = vpop.f32.mrb[5].mxu0 }
  0xfb   : > { %v678_v18 = vrot.slane %v676_v8, 6  ;;  %v681_v19 = vrot.slane %v679_v9, 7  ;;  %v685_v20 = vshrl.u32 %v3603_v10, 16  ;;  %v688_v21 = vshll.u32 %v3603_v10, 16  ;;  %v3684_v22 = vpop.f32.mrb[6].mxu0 }
  0xfc   : > { %v724_v23 = vor.u32 %v723_v13, %v720_v12  ;;  %v729_v26 = vrot.slane %v727_v14, 5  ;;  %v732_v27 = vrot.slane %v730_v15, 6  ;;  %v475_v28 = vadd.f32 %v3683_v11, %v4054_v53  ;;  %v469_v29 = vpop.f32.mrb[7].mxu0  ;;  %v823_v13 = vld [vmem:[#allocation2 + $0x24] sm:$0xf] }
  0xfd   : > { %v682_v30 = vor.u32 %v681_v19, %v678_v18  ;;  %v687_v32 = vrot.slane %v685_v20, 6  ;;  %v690_v33 = vrot.slane %v688_v21, 7  ;;  %v467_v34 = vadd.f32 %v4054_v53, %v466_v16  ;;  %v1231_v6 = vld [vmem:[#allocation2 + $0x98] sm:$0x1] }
  0xfe   : > { %v725_v35 = vrot.slane %v724_v23, 4  ;;  %v743_v36 = vsel %vm4062_vm15, %v724_v23, %v742_v7  ;;  %v733_v37 = vor.u32 %v732_v27, %v729_v26  ;;  %v583_v39 = vmax.f32 %v475_v28, 0.0  ;;  %v784_v7 = vld [vmem:[#allocation2 + $0x18] sm:$0x8] }
  0xff   : > { %744 = vst [vmem:[#allocation2 + $0x10] sm:$0xc] %v743_v36  ;;  %v683_v40 = vrot.slane %v682_v30, 4  ;;  %v701_v41 = vsel %vm4068_vm0, %v682_v30, %v700_v25  ;;  %v691_v44 = vor.u32 %v690_v33, %v687_v32  ;;  %v581_v45 = vmax.f32 %v467_v34, 0.0  ;;  %v829_v32 = vld [vmem:[#allocation2 + $0x2c] sm:$0x1] }
 0x100   : > { %702 = vst [vmem:[#allocation2 + $0x8] sm:$0xe] %v701_v41  ;;  %v734_v46 = vsel %vm4075_vm14, %v725_v35, %v733_v37  ;;  %v735_v47 = vrot.slane %v733_v37, 4  ;;  %v3608_v50 = vpack.c.bf16 %v583_v39, %v583_v39  ;;  %v478_v51 = vadd.f32 %v3684_v22, %v4054_v53  ;;  %v1199_v37 = vld [vmem:[#allocation2 + $0x8c] sm:$0xf] }
 0x101   : > { %745 = vst.msk [vmem:[#allocation2 + $0x14] sm:$0xf] %vm5696_vm1, %v734_v46  ;;  %v692_v54 = vsel %vm4084_vm2, %v683_v40, %v691_v44  ;;  %v693_v55 = vrot.slane %v691_v44, 4  ;;  %v3606_v56 = vpack.c.bf16 %v581_v45, %v581_v45  ;;  %v470_v57 = vadd.f32 %v4054_v53, %v469_v29  ;;  %v3687_v58 = vpop.f32.mrb[8].mxu0 }
 0x102   : > { %v749_v59 = vsel %vm4092_vm4, %v735_v47, %v748_v43  ;;  %703 = vst.msk [vmem:[#allocation2 + $0xc] sm:$0xf] %vm5696_vm1, %v692_v54  ;;  %v802_v60 = vshrl.u32 %v3608_v50, 16  ;;  %v805_v61 = vshll.u32 %v3608_v50, 16  ;;  %v584_v62 = vmax.f32 %v478_v51, 0.0  ;;  %v482_v63 = vpop.f32.mrb[9].mxu0 }
 0x103   : > { %750 = vst [vmem:[#allocation2 + $0x18] sm:$0x7] %v749_v59  ;;  %v707_v0 = vsel %vm4100_vm10, %v693_v55, %v706_v49  ;;  %v760_v1 = vshll.u32 %v3606_v56, 16  ;;  %v763_v2 = vshrl.u32 %v3606_v56, 16  ;;  %v582_v3 = vmax.f32 %v470_v57, 0.0  ;;  %v3688_v4 = vpop.f32.mrb[10].mxu0 }
 0x104   : > { %708 = vst [vmem:[#allocation2 + $0x10] sm:$0x3] %v707_v0  ;;  %v804_v5 = vrot.slane %v802_v60, 7  ;;  %v3609_v8 = vpack.c.bf16 %v584_v62, %v584_v62  ;;  %v491_v9 = vadd.f32 %v3687_v58, %v4054_v53  ;;  %v483_v10 = vadd.f32 %v4054_v53, %v482_v63  ;;  %v485_v11 = vpop.f32.mrb[11].mxu0  ;;  %v790_v60 = vld [vmem:[#allocation2 + $0x20] sm:$0xf] }
 0x105   : > { %v762_v14 = vrot.slane %v760_v1, 5  ;;  %v765_v15 = vrot.slane %v763_v2, 4  ;;  %v3607_v16 = vpack.c.bf16 %v582_v3, %v582_v3  ;;  %v494_v18 = vadd.f32 %v3688_v4, %v4054_v53 }
 0x106   : > { %v807_v19 = vor.u32 %v805_v61, %v804_v5  ;;  %v808_v20 = vrot.slane %v804_v5, 4  ;;  %v810_v21 = vshrl.u32 %v3609_v8, 16  ;;  %v813_v22 = vshll.u32 %v3609_v8, 16 }
 0x107   : > { %v766_v23 = vor.u32 %v765_v15, %v762_v14  ;;  %v785_v25 = vsel %vm4116_vm6, %v762_v14, %v784_v7  ;;  %v769_v27 = vshll.u32 %v3607_v16, 16  ;;  %v773_v28 = vshrl.u32 %v3607_v16, 16  ;;  %v859_v16 = vld [vmem:[#allocation2 + $0x2c] sm:$0xe] }
 0x108   : > { %v824_v29 = vsel %vm4124_vm11, %v807_v19, %v823_v13  ;;  %786 = vst [vmem:[#allocation2 + $0x18] sm:$0x8] %v785_v25  ;;  %v812_v30 = vrot.slane %v810_v21, 7  ;;  %v587_v34 = vmax.f32 %v491_v9, 0.0  ;;  %v585_v35 = vmax.f32 %v483_v10, 0.0 }
 0x109   : > { %825 = vst [vmem:[#allocation2 + $0x24] sm:$0xf] %v824_v29  ;;  %v767_v36 = vrot.slane %v766_v23, 4  ;;  %v771_v39 = vrot.slane %v769_v27, 5  ;;  %v775_v40 = vrot.slane %v773_v28, 4  ;;  %v588_v41 = vmax.f32 %v494_v18, 0.0 }
 0x10a   : > { %v3691_v43 = vpop.f32.mrb[12].mxu0  ;;  %v815_v44 = vor.u32 %v813_v22, %v812_v30  ;;  %v817_v45 = vrot.slane %v812_v30, 4  ;;  %v3612_v46 = vpack.c.bf16 %v587_v34, %v587_v34  ;;  %v3610_v47 = vpack.c.bf16 %v585_v35, %v585_v35  ;;  %v893_v10 = vld [vmem:[#allocation2 + $0x34] sm:$0xc] }
 0x10b   : > { %v498_v49 = vpop.f32.mrb[13].mxu0  ;;  %v772_v50 = vsel %vm4141_vm8, %v767_v36, %v771_v39  ;;  %v776_v51 = vor.u32 %v775_v40, %v771_v39  ;;  %v3613_v54 = vpack.c.bf16 %v588_v41, %v588_v41  ;;  %v486_v55 = vadd.f32 %v4054_v53, %v485_v11 }
 0x10c   : > { %v3692_v56 = vpop.f32.mrb[14].mxu0  ;;  %v816_v57 = vsel %vm4133_vm13, %v808_v20, %v815_v44  ;;  %v830_v58 = vsel %vm4147_vm12, %v817_v45, %v829_v32  ;;  %787 = vst.msk [vmem:[#allocation2 + $0x1c] sm:$0xf] %vm5696_vm1, %v772_v50  ;;  %v872_v61 = vshrl.u32 %v3612_v46, 16  ;;  %v875_v62 = vshll.u32 %v3612_v46, 16 }
 0x10d   : > { %v501_v63 = vpop.f32.mrb[15].mxu0  ;;  %826 = vst.msk [vmem:[#allocation2 + $0x28] sm:$0xf] %vm5696_vm1, %v816_v57  ;;  %831 = vst [vmem:[#allocation2 + $0x2c] sm:$0x1] %v830_v58  ;;  %v777_v0 = vrot.slane %v776_v51, 4  ;;  %v507_v20 = vadd.f32 %v3691_v43, %v4054_v53  ;;  %v499_v22 = vadd.f32 %v4054_v53, %v498_v49  ;;  %v510_v23 = vadd.f32 %v3692_v56, %v4054_v53 }
 0x10e   : > { %v838_v1 = vshrl.u32 %v3610_v47, 16  ;;  %v841_v2 = vshll.u32 %v3610_v47, 16  ;;  %v881_v3 = vshrl.u32 %v3613_v54, 16  ;;  %v874_v4 = vrot.slane %v872_v61, 5  ;;  %v897_v32 = vld [vmem:[#allocation2 + $0x3c] sm:$0x7] }
 0x10f   : > { %v877_v5 = vrot.slane %v875_v62, 6  ;;  %v884_v7 = vshll.u32 %v3613_v54, 16  ;;  %v586_v8 = vmax.f32 %v486_v55, 0.0  ;;  %v791_v9 = vsel %vm4161_vm7, %v777_v0, %v790_v60  ;;  %v1236_v43 = vld [vmem:[#allocation2 + $0x10] sm:$0xf] }
 0x110   : > { %v840_v11 = vrot.slane %v838_v1, 6  ;;  %v843_v13 = vrot.slane %v841_v2, 7  ;;  %v883_v14 = vrot.slane %v881_v3, 5  ;;  %792 = vst [vmem:[#allocation2 + $0x20] sm:$0xf] %v791_v9  ;;  %v502_v25 = vadd.f32 %v4054_v53, %v501_v63 }
 0x111   : > { %v878_v15 = vor.u32 %v877_v5, %v874_v4  ;;  %v886_v18 = vrot.slane %v884_v7, 6  ;;  %v3611_v19 = vpack.c.bf16 %v586_v8, %v586_v8  ;;  %v3695_v27 = vpop.f32.mrb[16].mxu0  ;;  %v591_v41 = vmax.f32 %v507_v20, 0.0  ;;  %v4185_v57 = vld [vmem:[#allocation2 + $0x14] sm:$0xf] }
 0x112   : > { %v844_v21 = vor.u32 %v843_v13, %v840_v11  ;;  %v4174_v35 = vpop.f32.mrb[17].mxu0  ;;  %v589_v49 = vmax.f32 %v499_v22, 0.0  ;;  %v592_v55 = vmax.f32 %v510_v23, 0.0  ;;  %v590_v56 = vmax.f32 %v502_v25, 0.0  ;;  %v863_v0 = vld [vmem:[#allocation2 + $0x34] sm:$0x3] }
 0x113   : > { %v879_v28 = vrot.slane %v878_v15, 4  ;;  %v894_v29 = vsel %vm4062_vm15, %v878_v15, %v893_v10  ;;  %v887_v30 = vor.u32 %v886_v18, %v883_v14  ;;  %v847_v34 = vshrl.u32 %v3611_v19, 16  ;;  %v4178_v44 = vpop.f32.mrb[18].mxu0  ;;  %v959_v4 = vld [vmem:[#allocation2 + $0x48] sm:$0xf] }
 0x114   : > { %895 = vst [vmem:[#allocation2 + $0x34] sm:$0xc] %v894_v29  ;;  %v845_v36 = vrot.slane %v844_v21, 4  ;;  %v860_v39 = vsel %vm4068_vm0, %v844_v21, %v859_v16  ;;  %v850_v40 = vshll.u32 %v3611_v19, 16  ;;  %v4182_v50 = vpop.f32.mrb[19].mxu0  ;;  %v3616_v54 = vpack.c.bf16 %v591_v41, %v591_v41 }
 0x115   : > { %861 = vst [vmem:[#allocation2 + $0x2c] sm:$0xe] %v860_v39  ;;  %v888_v45 = vsel %vm4075_vm14, %v879_v28, %v887_v30  ;;  %v889_v46 = vrot.slane %v887_v30, 4  ;;  %v849_v47 = vrot.slane %v847_v34, 6  ;;  %v3614_v60 = vpack.c.bf16 %v589_v49, %v589_v49  ;;  %v927_v14 = vld [vmem:[#allocation2 + $0x3c] sm:$0x8] }
 0x116   : > { %896 = vst.msk [vmem:[#allocation2 + $0x38] sm:$0xf] %vm5696_vm1, %v888_v45  ;;  %v852_v51 = vrot.slane %v850_v40, 7  ;;  %v523_v61 = vadd.f32 %v3695_v27, %v4054_v53  ;;  %v4191_v62 = vcombine.low %v1236_v43, %v4185_v57  ;;  %v940_v1 = vshrl.u32 %v3616_v54, 16  ;;  %v1235_v29 = vld [vmem:[#allocation2 + $0xc] sm:$0xf] }
 0x117   : > { %v898_v58 = vsel %vm4092_vm4, %v889_v46, %v897_v32  ;;  %v943_v2 = vshll.u32 %v3616_v54, 16  ;;  %v3617_v3 = vpack.c.bf16 %v592_v55, %v592_v55  ;;  %v906_v5 = vshll.u32 %v3614_v60, 16  ;;  %v3810_v32 = vld [vmem:[%s5689_s3] sm:$0xff]   ;;  %v963_v39 = vld [vmem:[#allocation2 + $0x50] sm:$0x1] }
 0x118   : > { %899 = vst [vmem:[#allocation2 + $0x3c] sm:$0x7] %v898_v58  ;;  %v853_v63 = vor.u32 %v852_v51, %v849_v47  ;;  %v909_v7 = vshrl.u32 %v3614_v60, 16  ;;  %v3615_v8 = vpack.c.bf16 %v590_v56, %v590_v56  ;;  %v595_v9 = vmax.f32 %v523_v61, 0.0  ;;  %v1266_v51 = vld [vmem:[#allocation2 + $0x8] sm:$0xc]  ;;  %2733 = vmatpush1.bf16.msra.mxu1 %v3810_v32 }
 0x119   : > { %v942_v13 = vrot.slane %v940_v1, 7  ;;  %v948_v15 = vshrl.u32 %v3617_v3, 16  ;;  %v4195_v16 = vpop.f32.mrb[20].mxu0  ;;  %v908_v18 = vrot.slane %v906_v5, 5  ;;  %v951_v20 = vshll.u32 %v3617_v3, 16  ;;  %2734 = vmatprep.subr.bf16.mxu1 %v3850_v52 }
 0x11a   : > { %v854_v10 = vsel %vm4084_vm2, %v845_v36, %v853_v63  ;;  %v855_v11 = vrot.slane %v853_v63, 4  ;;  %v911_v19 = vrot.slane %v909_v7, 4  ;;  %v915_v21 = vshll.u32 %v3615_v8, 16  ;;  %v4198_v22 = vpop.f32.mrb[21].mxu0  ;;  %v931_v63 = vld [vmem:[#allocation2 + $0x44] sm:$0xf] }
 0x11b   : > { %862 = vst.msk [vmem:[#allocation2 + $0x30] sm:$0xf] %vm5696_vm1, %v854_v10  ;;  %v945_v25 = vor.u32 %v943_v2, %v942_v13  ;;  %v946_v27 = vrot.slane %v942_v13, 4  ;;  %v950_v28 = vrot.slane %v948_v15, 7  ;;  %v4202_v30 = vpop.f32.mrb[22].mxu0  ;;  %v928_v36 = vsel %vm4116_vm6, %v908_v18, %v927_v14  ;;  %v3811_v2 = vld [vmem:[%s5689_s3 + $0x8] sm:$0xff]  }
 0x11c   : > { %v864_v23 = vsel %vm4100_vm10, %v855_v11, %v863_v0  ;;  %v912_v34 = vor.u32 %v911_v19, %v908_v18  ;;  %v917_v40 = vrot.slane %v915_v21, 5  ;;  %v919_v41 = vshrl.u32 %v3615_v8, 16  ;;  %v4209_v43 = vpop.f32.mrb[23].mxu0  ;;  %929 = vst [vmem:[#allocation2 + $0x3c] sm:$0x8] %v928_v36  ;;  %2735 = vmatpush1.bf16.msra.mxu1 %v3811_v2 }
 0x11d   : > { %865 = vst [vmem:[#allocation2 + $0x34] sm:$0x3] %v864_v23  ;;  %v960_v45 = vsel %vm4124_vm11, %v945_v25, %v959_v4  ;;  %v953_v46 = vor.u32 %v951_v20, %v950_v28  ;;  %v955_v47 = vrot.slane %v950_v28, 4  ;;  %v3620_v49 = vpack.c.bf16 %v595_v9, %v595_v9  ;;  %v1027_v5 = vld [vmem:[#allocation2 + $0x58] sm:$0xc]  ;;  %2736 = vmatprep.subr.bf16.mxu1 %v3850_v52 }
 0x11e   : > { %961 = vst [vmem:[#allocation2 + $0x48] sm:$0xf] %v960_v45  ;;  %v913_v54 = vrot.slane %v912_v34, 4  ;;  %v921_v55 = vrot.slane %v919_v41, 4  ;;  %v3531_v56 = vcombine.low %v1266_v51, %v1235_v29  ;;  %v1526_v58 = vrot.slane %v4191_v62, 1 }
 0x11f   : > { %v954_v60 = vsel %vm4133_vm13, %v946_v27, %v953_v46  ;;  %v964_v61 = vsel %vm4147_vm12, %v955_v47, %v963_v39  ;;  %v1006_v0 = vshrl.u32 %v3620_v49, 16  ;;  %v1009_v1 = vshll.u32 %v3620_v49, 16  ;;  %v4227_v9 = vld [vmem:[#allocation2 + $0x1c] sm:$0xf]  ;;  %v1268_v10 = vld [vmem:[#allocation2 + $0x10] sm:$0xc] }
 0x120   : > { %962 = vst.msk [vmem:[#allocation2 + $0x4c] sm:$0xf] %vm5696_vm1, %v954_v60  ;;  %965 = vst [vmem:[#allocation2 + $0x50] sm:$0x1] %v964_v61  ;;  %v918_v3 = vsel %vm4141_vm8, %v913_v54, %v917_v40  ;;  %v922_v4 = vor.u32 %v921_v55, %v917_v40  ;;  %v1525_v7 = vrot.slane %v3531_v56, 1  ;;  %v515_v8 = vadd.f32 %v4054_v53, %v4174_v35  ;;  %v3812_v39 = vld [vmem:[%s5689_s3 + $0x10] sm:$0xff]  }
 0x121   : > { %930 = vst.msk [vmem:[#allocation2 + $0x40] sm:$0xf] %vm5696_vm1, %v918_v3  ;;  %v1008_v11 = vrot.slane %v1006_v0, 5  ;;  %v1011_v13 = vrot.slane %v1009_v1, 6  ;;  %v1363_v14 = vshrl.u32 %v3531_v56, 16  ;;  %v1365_v15 = vshll.u32 %v3531_v56, 16  ;;  %2737 = vmatpush1.bf16.msra.mxu1 %v3812_v39 }
 0x122   : > { %v1240_v18 = vld [vmem:[#allocation2 + $0x20] sm:$0xf]  ;;  %v923_v19 = vrot.slane %v922_v4, 4  ;;  %v1527_v20 = vsel %vm5697_vm9, %v1525_v7, %v1526_v58  ;;  %v593_v21 = vmax.f32 %v515_v8, 0.0  ;;  %v1370_v35 = vshll.u32 %v4191_v62, 16  ;;  %v4234_v25 = vpop.f32.mrb[24].mxu0  ;;  %2738 = vmatprep.subr.bf16.mxu1 %v3850_v52 }
 0x123   : > { %v1238_v23 = vld [vmem:[#allocation2 + $0x18] sm:$0xf]  ;;  %v4237_v27 = vor.u32 %v1011_v13, %v1008_v11  ;;  %1556 = vrot.lane.b32.xlu1 %v1527_v20, %s3851_s21  ;;  %v1367_v28 = vrot.slane %v1365_v15, 1  ;;  %v3533_v32 = vcombine.low %v1268_v10, %v4185_v57  ;;  %v1241_v34 = vld [vmem:[#allocation2 + $0x24] sm:$0xf]  ;;  %vm5699_vm1 = vcmask 1040384  }
 0x124   : > { %v4241_v29 = vcombine.low %v1238_v23, %v4227_v9  ;;  %v4244_v36 = vpop.f32.mrb[25].mxu0  ;;  %v932_v40 = vsel %vm4161_vm7, %v923_v19, %v931_v63  ;;  %v3618_v41 = vpack.c.bf16 %v593_v21, %v593_v21  ;;  %v1372_v45 = vrot.slane %v1370_v35, 1  ;;  %v1272_v1 = vld [vmem:[#allocation2 + $0x10] sm:$0x8]  ;;  %v4272_v8 = vld [vmem:[#allocation2 + $0x28] sm:$0xf] }
 0x125   : > { %v4251_v46 = vcombine.low %v1240_v18, %v1241_v34  ;;  %v4253_v47 = vpop.f32.mrb[26].mxu0  ;;  %933 = vst [vmem:[#allocation2 + $0x44] sm:$0xf] %v932_v40  ;;  %v1013_v49 = vrot.slane %v4237_v27, 4  ;;  %v1028_v51 = vsel %vm4062_vm15, %v4237_v27, %v1027_v5  ;;  %v1368_v54 = vor.u32 %v1367_v28, %v1363_v14  ;;  %v993_v2 = vld [vmem:[#allocation2 + $0x50] sm:$0xe] }
 0x126   : > { %v1528_v55 = vrot.slane %v4241_v29, 1  ;;  %v4260_v56 = vpop.f32.mrb[27].mxu0  ;;  %1029 = vst [vmem:[#allocation2 + $0x58] sm:$0xc] %v1028_v51  ;;  %v972_v60 = vshrl.u32 %v3618_v41, 16  ;;  %v975_v61 = vshll.u32 %v3618_v41, 16  ;;  %v4269_v5 = vcombine.low %v1272_v1, %v4185_v57 }
 0x127   : > { %v1599_v63 = vrot.slane %v3533_v32, 1  ;;  %v5700_v0 = vrot.slane %v4251_v46, 1  ;;  %v1373_v3 = vsel %vm5701_vm3, %v1368_v54, %v1372_v45  ;;  %v1756_v7 = vrot.slane %v4241_v29, 2  ;;  %v1274_v57 = vld [vmem:[#allocation2 + $0x18] sm:$0x8] }
 0x128   : > { %v1529_v4 = vsel %vm5697_vm9, %v1526_v58, %v1528_v55  ;;  %v974_v10 = vrot.slane %v972_v60, 6  ;;  %v977_v11 = vrot.slane %v975_v61, 7  ;;  %1489 = vrot.lane.b32.xlu0 %v1373_v3, %s3852_s26  ;;  %v3814_v14 = vld [vmem:[%s5689_s3 + $0x18] sm:$0xff]   ;;  %v1755_v15 = vrot.slane %v4269_v5, 2 }
 0x129   : > { %1558 = vrot.lane.b32.xlu1 %v1529_v4, %s3851_s21  ;;  %v1600_v13 = vsel %vm5697_vm9, %v1599_v63, %v1528_v55  ;;  %v4280_v58 = vsel %vm5697_vm9, %v1528_v55, %v5700_v0  ;;  %v4287_v19 = vrot.slane %v4251_v46, 2  ;;  %v1374_v20 = vshrl.u32 %v4191_v62, 16  ;;  %v4291_v35 = vpop.f32.mrb[28].mxu0  ;;  %2739 = vmatpush1.bf16.msra.mxu1 %v3814_v14 }
 0x12a   : > { %v1378_v21 = vshll.u32 %v4241_v29, 16  ;;  %v4293_v23 = vor.u32 %v977_v11, %v974_v10  ;;  %v4296_v28 = vcombine.low %v4227_v9, %v1240_v18  ;;  %v4299_v32 = vcombine.low %v1241_v34, %v4272_v8  ;;  %v4302_v40 = vpop.f32.mrb[29].mxu0  ;;  %2740 = vmatprep.subr.bf16.mxu1 %v3850_v52 }
 0x12b   : > { %v3538_v39 = vcombine.low %v1274_v57, %v4227_v9  ;;  %v1757_v41 = vsel %vm1754_vm5, %v1755_v15, %v1756_v7  ;;  %v1759_v51 = vsel %vm1754_vm5, %v1756_v7, %v4287_v19  ;;  %v1376_v54 = vor.u32 %v1374_v20, %v1372_v45  ;;  %v4309_v60 = vpop.f32.mrb[30].mxu0  ;;  %v3816_v9 = vld [vmem:[%s5689_s3 + $0x20] sm:$0xff]  }
 0x12c   : > { %v4307_v55 = vrot.slane %v1378_v21, 1  ;;  %v979_v18 = vrot.slane %v4293_v23, 4  ;;  %v994_v34 = vsel %vm4068_vm0, %v4293_v23, %v993_v2  ;;  %1605 = vrot.lane.b32.xlu0 %v1600_v13, %s3853_s8  ;;  %vm1640_vm9 = vsmask.f32 6400  ;;  %v4324_v63 = vpop.f32.mrb[31].mxu0 }
 0x12d   : > { %1607 = vrot.lane.b32.xlu1 %v4280_v58, %s3853_s8  ;;  %v2057_v45 = vrot.slane %v4296_v28, 7  ;;  %v5698_v61 = vrot.slane %v4299_v32, 7  ;;  %995 = vst [vmem:[#allocation2 + $0x50] sm:$0xe] %v994_v34  ;;  %v1826_v3 = vrot.slane %v3538_v39, 2  ;;  %v526_v2 = vadd.f32 %v4178_v44, %v4054_v53  ;;  %2741 = vmatpush1.bf16.msra.mxu1 %v3816_v9 }
 0x12e   : > { %v1381_v1 = vsel %vm5701_vm3, %v1376_v54, %v4307_v55  ;;  %v518_v4 = vadd.f32 %v4054_v53, %v4182_v50  ;;  %v1382_v13 = vshrl.u32 %v4241_v29, 16  ;;  %2742 = vmatprep.subr.bf16.mxu1 %v3850_v52  ;;  %v1386_v54 = vshll.u32 %v4251_v46, 16 }
 0x12f   : > { %v2059_v7 = vsel %vm5699_vm1, %v2057_v45, %v5698_v61  ;;  %v2360_v10 = vshrl.u32 %v2057_v45, 16  ;;  %v2363_v11 = vshll.u32 %v2057_v45, 16  ;;  %v1827_v15 = vsel %vm1754_vm5, %v1826_v3, %v4287_v19  ;;  %v3818_v3 = vld [vmem:[%s5689_s3 + $0x28] sm:$0xff]  }
 0x130   : > { %v2368_v57 = vshrl.u32 %v2059_v7, 16  ;;  %v2371_v14 = vshll.u32 %v2059_v7, 16  ;;  %v596_v20 = vmax.f32 %v526_v2, 0.0  ;;  %1786 = vrot.lane.b32.xlu0 %v1757_v41, %s3854_s9  ;;  %v594_v39 = vmax.f32 %v518_v4, 0.0 }
 0x131   : > { %1788 = vrot.lane.b32.xlu1 %v1759_v51, %s3854_s9  ;;  %v2362_v44 = vrot.slane %v2360_v10, 1  ;;  %v2365_v50 = vrot.slane %v2363_v11, 2  ;;  %v1390_v7 = vshrl.u32 %v4251_v46, 16  ;;  %v1649_v41 = vrot.slane %v1382_v13, 1  ;;  %2743 = vmatpush1.bf16.msra.mxu1 %v3818_v3 }
 0x132   : > { %v2370_v34 = vrot.slane %v2368_v57, 1  ;;  %v2373_v9 = vrot.slane %v2371_v14, 2  ;;  %v3621_v45 = vpack.c.bf16 %v596_v20, %v596_v20  ;;  %v3619_v61 = vpack.c.bf16 %v594_v39, %v594_v39  ;;  %2744 = vmatprep.subr.bf16.mxu1 %v3850_v52 }
 0x133   : > { %v2366_v2 = vor.u32 %v2365_v50, %v2362_v44  ;;  %v1650_v51 = vrot.slane %v1378_v21, 2  ;;  %v1653_v57 = vrot.slane %v1390_v7, 1  ;;  %v1654_v50 = vrot.slane %v1386_v54, 2  ;;  %v3819_v21 = vld [vmem:[%s5689_s3 + $0x30] sm:$0xff]  }
 0x134   : > { %v4348_v10 = vor.u32 %v2373_v9, %v2370_v34  ;;  %v1015_v4 = vshrl.u32 %v3621_v45, 16  ;;  %v1018_v11 = vshll.u32 %v3621_v45, 16  ;;  %1491 = vrot.lane.b32.xlu0 %v1381_v1, %s3852_s26  ;;  %v981_v14 = vshrl.u32 %v3619_v61, 16  ;;  %v4363_v45 = vld [vmem:[#allocation2 + $0x2c] sm:$0xf] }
 0x135   : > { %1560 = vrot.lane.b32.xlu1 %v4280_v58, %s3851_s21  ;;  %v984_v20 = vshll.u32 %v3619_v61, 16  ;;  %v1651_v44 = vor.u32 %v1650_v51, %v1649_v41  ;;  %v1642_v1 = vshrl.u32 %v4269_v5, 16  ;;  %vm5748_vm1 = vcmask 130048   ;;  %2745 = vmatpush1.bf16.msra.mxu1 %v3819_v21 }
 0x136   : > { %v2375_v39 = vsel %vm1640_vm9, %v2366_v2, %v4348_v10  ;;  %v1017_v34 = vrot.slane %v1015_v4, 5  ;;  %v1020_v9 = vrot.slane %v1018_v11, 6  ;;  %v983_v58 = vrot.slane %v981_v14, 6  ;;  %v1031_v11 = vld [vmem:[#allocation2 + $0x60] sm:$0x7]  ;;  %2746 = vmatprep.subr.bf16.mxu1 %v3850_v52 }
 0x137   : > { %3567 = vmatprep.mubr.msk.bf16.mxu1 %vm5748_vm1, %v2375_v39  ;;  %v986_v61 = vrot.slane %v984_v20, 7  ;;  %v4367_v3 = vor.u32 %v1654_v50, %v1653_v57  ;;  %v1645_v41 = vshll.u32 %v4269_v5, 16  ;;  %v1644_v0 = vrot.slane %v1642_v1, 1  ;;  %v997_v20 = vld [vmem:[#allocation2 + $0x58] sm:$0x3] }
 0x138   : > { %v1021_v51 = vor.u32 %v1020_v9, %v1017_v34  ;;  %v539_v2 = vadd.f32 %v4195_v16, %v4054_v53  ;;  %v531_v4 = vadd.f32 %v4054_v53, %v4198_v22  ;;  %1830 = vrot.lane.b32.xlu0 %v1827_v15, %s3855_s15  ;;  %v4379_v5 = vcombine.low %v4272_v8, %v4363_v45 }
 0x139   : > { %v987_v39 = vor.u32 %v986_v61, %v983_v58  ;;  %v1656_v57 = vsel %vm1640_vm9, %v1651_v44, %v4367_v3  ;;  %v1647_v14 = vrot.slane %v1645_v41, 2  ;;  %vm5749_vm1 = vcmask 125952  }
 0x13a   : > { %v1022_v16 = vsel %vm4075_vm14, %v1013_v49, %v1021_v51  ;;  %v1023_v22 = vrot.slane %v1021_v51, 4  ;;  %1721 = vrot.lane.b32.xlu1 %v1656_v57, %s3856_s16  ;;  %v599_v15 = vmax.f32 %v539_v2, 0.0  ;;  %v597_v50 = vmax.f32 %v531_v4, 0.0  ;;  %vm5750_vm3 = vmmov %vm5749_vm1  ;;  %v1093_v57 = vld [vmem:[#allocation2 + $0x6c] sm:$0xf] }
 0x13b   : > { %1030 = vst.msk [vmem:[#allocation2 + $0x5c] sm:$0xf] %vm5749_vm1, %v1022_v16  ;;  %v988_v8 = vsel %vm4084_vm2, %v979_v18, %v987_v39  ;;  %v989_v21 = vrot.slane %v987_v39, 4  ;;  %v1648_v34 = vor.u32 %v1647_v14, %v1644_v0  ;;  %v1760_v27 = vrot.slane %v4379_v5, 2  ;;  %v3820_v39 = vld [vmem:[%s5689_s3 + $0x38] sm:$0xff]  }
 0x13c   : > { %v1032_v49 = vsel %vm4092_vm4, %v1023_v22, %v1031_v11  ;;  %996 = vst.msk [vmem:[#allocation2 + $0x54] sm:$0xf] %vm5750_vm3, %v988_v8  ;;  %v3624_v9 = vpack.c.bf16 %v599_v15, %v599_v15  ;;  %v3622_v1 = vpack.c.bf16 %v597_v50, %v597_v50  ;;  %v1384_v58 = vor.u32 %v1382_v13, %v4307_v55  ;;  %v1061_v13 = vld [vmem:[#allocation2 + $0x60] sm:$0x8] }
 0x13d   : > { %1033 = vst [vmem:[#allocation2 + $0x60] sm:$0x7] %v1032_v49  ;;  %v998_v23 = vsel %vm4100_vm10, %v989_v21, %v997_v20  ;;  %v1652_v18 = vsel %vm1640_vm9, %v1648_v34, %v1651_v44  ;;  %v1761_v0 = vsel %vm1754_vm5, %v4287_v19, %v1760_v27  ;;  %v1388_v61 = vrot.slane %v1386_v54, 1  ;;  %2747 = vmatpush1.bf16.msra.mxu1 %v3820_v39  ;;  %v3822_v50 = vld [vmem:[%s5689_s3 + $0x40] sm:$0xff]   ;;  %v1244_v49 = vld [vmem:[#allocation2 + $0x30] sm:$0xf] }
 0x13e   : > { %999 = vst [vmem:[#allocation2 + $0x58] sm:$0x3] %v998_v23  ;;  %1719 = vrot.lane.b32.xlu0 %v1652_v18, %s3856_s16  ;;  %v1074_v41 = vshrl.u32 %v3624_v9, 16  ;;  %v1077_v51 = vshll.u32 %v3624_v9, 16  ;;  %v1040_v55 = vshll.u32 %v3622_v1, 16  ;;  %1832 = vrot.lane.b32.xlu1 %v1761_v0, %s3855_s15  ;;  %v1879_v2 = vshrl.u32 %v4296_v28, 16 }
 0x13f   : > { %v1882_v44 = vshll.u32 %v4296_v28, 16  ;;  %v1887_v4 = vshrl.u32 %v4299_v32, 16  ;;  %v1890_v54 = vshll.u32 %v4299_v32, 16  ;;  %vm5751_vm3 = vsmask.f32 7424  ;;  %2748 = vmatprep.subr.bf16.mxu1 %v3850_v52 }
 0x140   : > { %v4413_v11 = vrot.slane %v1074_v41, 7  ;;  %v4415_v19 = vrot.slane %v1040_v55, 5  ;;  %v1389_v14 = vsel %vm5751_vm3, %v1384_v58, %v1388_v61  ;;  %v1881_v16 = vrot.slane %v1879_v2, 6 }
 0x141   : > { %v1884_v22 = vrot.slane %v1882_v44, 7  ;;  %v1889_v20 = vrot.slane %v1887_v4, 6  ;;  %v1892_v21 = vrot.slane %v1890_v54, 7  ;;  %v1394_v34 = vshll.u32 %v4379_v5, 16  ;;  %2749 = vmatpush1.bf16.msra.mxu1 %v3822_v50  ;;  %v1245_v44 = vld [vmem:[#allocation2 + $0x34] sm:$0xf] }
 0x142   : > { %v1079_v28 = vor.u32 %v1077_v51, %v4413_v11  ;;  %v1062_v15 = vsel %vm4116_vm6, %v4415_v19, %v1061_v13  ;;  %1493 = vrot.lane.b32.xlu0 %v1389_v14, %s3852_s26  ;;  %v1398_v58 = vshrl.u32 %v4379_v5, 16  ;;  %v1532_v18 = vrot.slane %v4379_v5, 1 }
 0x143   : > { %1063 = vst [vmem:[#allocation2 + $0x60] sm:$0x8] %v1062_v15  ;;  %v1885_v8 = vor.u32 %v1884_v22, %v1881_v16  ;;  %v1893_v23 = vor.u32 %v1892_v21, %v1889_v20  ;;  %v4438_v41 = vcombine.low %v4363_v45, %v1244_v49  ;;  %vm5752_vm1 = vsmask.f32 1280 }
 0x144   : > { %v1094_v9 = vsel %vm4124_vm11, %v1079_v28, %v1093_v57  ;;  %v4441_v55 = vrot.slane %v1394_v34, 1  ;;  %v1657_v52 = vrot.slane %v1398_v58, 1  ;;  %v1658_v13 = vrot.slane %v1394_v34, 2  ;;  %v4470_v34 = vld [vmem:[#allocation2 + $0x3c] sm:$0xf] }
 0x145   : > { %1095 = vst [vmem:[#allocation2 + $0x6c] sm:$0xf] %v1094_v9  ;;  %v1894_v51 = vsel %vm5752_vm1, %v1885_v8, %v1893_v23  ;;  %v1043_v2 = vshrl.u32 %v3622_v1, 16  ;;  %v1392_v4 = vor.u32 %v1390_v7, %v1388_v61  ;;  %v5753_v54 = vrot.slane %v4251_v46, 1 }
 0x146   : > { %2021 = vrot.lane.b32.xlu0 %v1885_v8, %s3857_s22  ;;  %2023 = vrot.lane.b32.xlu1 %v1894_v51, %s3857_s22  ;;  %vm5754_vm3 = vcmask 1046528   ;;  %v1896_v39 = vshrl.u32 %v4438_v41, 16  ;;  %v1899_v57 = vshll.u32 %v4438_v41, 16  ;;  %vm5755_vm1 = vsmask.f32 7424 }
 0x147   : > { %v1533_v45 = vsel %vm5754_vm3, %v5753_v54, %v1532_v18  ;;  %v1397_v14 = vsel %vm5755_vm1, %v1392_v4, %v4441_v55  ;;  %v4456_v1 = vor.u32 %v1658_v13, %v1657_v52  ;;  %v4458_v16 = vcombine.low %v1244_v49, %v1245_v44  ;;  %v1246_v8 = vld [vmem:[#allocation2 + $0x38] sm:$0xf] }
 0x148   : > { %v1045_v22 = vrot.slane %v1043_v2, 4  ;;  %v542_v7 = vadd.f32 %v4202_v30, %v4054_v53  ;;  %v1898_v61 = vrot.slane %v1896_v39, 6  ;;  %v1901_v20 = vrot.slane %v1899_v57, 7 }
 0x149   : > { %5756 = vst [vmem:[#allocation3_spill] sm:$0xff] %v4458_v16  ;;  %v1660_v15 = vsel %vm1640_vm9, %v4367_v3, %v4456_v1  ;;  %v1762_v50 = vrot.slane %v4458_v16, 2  ;;  %v1534_v53 = vrot.slane %v4458_v16, 1  ;;  %v4481_v3 = vld [vmem:[%s5688_s2] ss:$0 sm:$0xff]  ;;  %v4486_v9 = vcombine.low %v1245_v44, %v1246_v8 }
 0x14a   : > { %1609 = vrot.lane.b32.xlu0 %v1533_v45, %s3853_s8  ;;  %1495 = vrot.lane.b32.xlu1 %v1397_v14, %s3852_s26  ;;  %v600_v28 = vmax.f32 %v542_v7, 0.0  ;;  %v1046_v21 = vor.u32 %v1045_v22, %v4415_v19  ;;  %v4473_v30 = vor.u32 %v1901_v20, %v1898_v61  ;;  %v534_v19 = vadd.f32 %v4481_v3, %v4209_v43  ;;  %v1097_v14 = vld [vmem:[#allocation2 + $0x74] sm:$0x1] }
 0x14b   : > { %v1763_v13 = vsel %vm1754_vm5, %v1760_v27, %v1762_v50  ;;  %v1080_v54 = vrot.slane %v4413_v11, 4  ;;  %v1402_v39 = vshll.u32 %v4458_v16, 16  ;;  %v1535_v44 = vsel %vm5754_vm3, %v1532_v18, %v1534_v53 }
 0x14c   : > { %v3625_v49 = vpack.c.bf16 %v600_v28, %v600_v28  ;;  %v598_v4 = vmax.f32 %v534_v19, 0.0  ;;  %v1047_v57 = vrot.slane %v1046_v21, 4  ;;  %vm5757_vm1 = vsmask.f32 1280 }
 0x14d   : > { %v1905_v22 = vshrl.u32 %v4486_v9, 16  ;;  %v1908_v11 = vshll.u32 %v4486_v9, 16  ;;  %v1406_v18 = vshrl.u32 %v4458_v16, 16  ;;  %vm5758_vm3 = vcmask 125952  }
 0x14e   : > { %1790 = vrot.lane.b32.xlu0 %v1761_v0, %s3854_s9  ;;  %1723 = vrot.lane.b32.xlu1 %v1660_v15, %s3856_s16  ;;  %v4476_v0 = vcombine.low %v1246_v8, %v4470_v34  ;;  %v1082_v51 = vshrl.u32 %v3625_v49, 16  ;;  %v1085_v52 = vshll.u32 %v3625_v49, 16  ;;  %v3623_v27 = vpack.c.bf16 %v598_v4, %v598_v4 }
 0x14f   : > { %v555_v49 = vadd.f32 %v4481_v3, %v4234_v25  ;;  %v1400_v4 = vor.u32 %v1398_v58, %v4441_v55  ;;  %v4530_v58 = vld [vmem:[#allocation2 + $0x44] sm:$0xf] }
 0x150   : > { %v1764_v2 = vrot.slane %v4476_v0, 2  ;;  %v1084_v43 = vrot.slane %v1082_v51, 7  ;;  %v1049_v28 = vshll.u32 %v3623_v27, 16  ;;  %v1053_v15 = vshrl.u32 %v3623_v27, 16 }
 0x151   : > { %v1410_v19 = vshll.u32 %v4476_v0, 16  ;;  %v5703_v25 = vrot.slane %v4476_v0, 1  ;;  %v5774_v59 = vshrl.u32 %v4476_v0, 16 }
 0x152   : > { %1562 = vrot.lane.b32.xlu0 %v1533_v45, %s3851_s21  ;;  %1834 = vrot.lane.b32.xlu1 %v1763_v13, %s3855_s15  ;;  %v1903_v45 = vsel %vm5757_vm1, %v1893_v23, %v4473_v30  ;;  %v1087_v7 = vor.u32 %v1085_v52, %v1084_v43  ;;  %v1089_v61 = vrot.slane %v1084_v43, 4  ;;  %v4506_v20 = vsel %vm1754_vm5, %v1762_v50, %v1764_v2 }
 0x153   : > { %v1404_v23 = vrot.slane %v1402_v39, 1  ;;  %v5702_v50 = vshrl.u32 %v4476_v0, 16  ;;  %v1051_v51 = vrot.slane %v1049_v28, 5  ;;  %v1055_v52 = vrot.slane %v1053_v15, 4 }
 0x154   : > { %v1088_v8 = vsel %vm4133_vm13, %v1080_v54, %v1087_v7  ;;  %v1098_v21 = vsel %vm4147_vm12, %v1089_v61, %v1097_v14  ;;  %v1907_v54 = vrot.slane %v1905_v22, 6  ;;  %v1910_v43 = vrot.slane %v1908_v11, 7 }
 0x155   : > { %1096 = vst.msk [vmem:[#allocation2 + $0x70] sm:$0xf] %vm5758_vm3, %v1088_v8  ;;  %1099 = vst [vmem:[#allocation2 + $0x74] sm:$0x1] %v1098_v21  ;;  %v1408_v14 = vor.u32 %v1406_v18, %v1404_v23  ;;  %v1052_v27 = vsel %vm4141_vm8, %v1047_v57, %v1051_v51  ;;  %v1056_v7 = vor.u32 %v1055_v52, %v1051_v51  ;;  %vm5759_vm1 = vsmask.f32 7424 }
 0x156   : > { %2025 = vrot.lane.b32.xlu0 %v1903_v45, %s3857_s22  ;;  %1611 = vrot.lane.b32.xlu1 %v1535_v44, %s3853_s8  ;;  %v603_v45 = vmax.f32 %v555_v49, 0.0  ;;  %v1405_v61 = vsel %vm5759_vm1, %v1400_v4, %v1404_v23  ;;  %v1661_v28 = vrot.slane %v1406_v18, 1  ;;  %v1662_v15 = vrot.slane %v1402_v39, 2  ;;  %1064 = vst.msk [vmem:[#allocation2 + $0x64] sm:$0xf] %vm5758_vm3, %v1052_v27 }
 0x157   : > { %v1065_v8 = vld [vmem:[#allocation2 + $0x68] sm:$0xf]  ;;  %v4532_v22 = vrot.slane %v1410_v19, 1  ;;  %v1665_v11 = vrot.slane %v5702_v50, 1  ;;  %v1666_v21 = vrot.slane %v1410_v19, 2  ;;  %v1057_v57 = vrot.slane %v1056_v7, 4 }
 0x158   : > { %v3628_v55 = vpack.c.bf16 %v603_v45, %v603_v45  ;;  %v4539_v23 = vld [vmem:[#allocation2 + $0x40] sm:$0xf]  ;;  %vm5760_vm1 = vcmask 1046528   ;;  %vm5761_vm3 = vsmask.f32 7424  ;;  %v1663_v4 = vor.u32 %v1662_v15, %v1661_v28 }
 0x159   : > { %v1537_v49 = vsel %vm5760_vm1, %v1534_v53, %v5703_v25  ;;  %v1413_v51 = vsel %vm5761_vm3, %v1408_v14, %v4532_v22  ;;  %v1066_v19 = vsel %vm4161_vm7, %v1057_v57, %v1065_v8  ;;  %v4552_v52 = vcombine.low %v4539_v23, %v4530_v58  ;;  %v4559_v27 = vld [vmem:[#allocation2 + $0x48] sm:$0xf]  ;;  %v4561_v14 = vld [vmem:[#allocation2 + $0x4c] sm:$0xf]  ;;  %v1161_v7 = vld [vmem:[#allocation2 + $0x7c] sm:$0xc] }
 0x15a   : > { %1836 = vrot.lane.b32.xlu0 %v4506_v20, %s3855_s15  ;;  %1792 = vrot.lane.b32.xlu1 %v1763_v13, %s3854_s9  ;;  %v4537_v13 = vor.u32 %v1910_v43, %v1907_v54  ;;  %v1140_v39 = vshrl.u32 %v3628_v55, 16  ;;  %v1143_v18 = vshll.u32 %v3628_v55, 16  ;;  %1067 = vst [vmem:[#allocation2 + $0x68] sm:$0xf] %v1066_v19  ;;  %v547_v45 = vadd.f32 %v4481_v3, %v4244_v36 }
 0x15b   : > { %5762 = vst [vmem:[#allocation4_spill] sm:$0xff] %v4552_v52  ;;  %v4557_v53 = vor.u32 %v1666_v21, %v1665_v11  ;;  %v571_v28 = vadd.f32 %v4481_v3, %v4291_v35  ;;  %vm5763_vm1 = vsmask.f32 1280  ;;  %v4575_v15 = vcombine.low %v4559_v27, %v4561_v14 }
 0x15c   : > { %v1142_v54 = vrot.slane %v1140_v39, 5  ;;  %v1145_v43 = vrot.slane %v1143_v18, 6  ;;  %v1912_v36 = vsel %vm5763_vm1, %v4473_v30, %v4537_v13  ;;  %v601_v55 = vmax.f32 %v547_v45, 0.0 }
 0x15d   : > { %5764 = vst [vmem:[#allocation5_spill] sm:$0xff] %v4575_v15  ;;  %v1664_v35 = vsel %vm1640_vm9, %v4456_v1, %v1663_v4  ;;  %v1538_v30 = vrot.slane %v4552_v52, 1  ;;  %v1668_v18 = vsel %vm1640_vm9, %v1663_v4, %v4557_v53  ;;  %v563_v1 = vadd.f32 %v4481_v3, %v4302_v40 }
 0x15e   : > { %1497 = vrot.lane.b32.xlu0 %v1405_v61, %s3852_s26  ;;  %1564 = vrot.lane.b32.xlu1 %v1535_v44, %s3851_s21  ;;  %v558_v61 = vadd.f32 %v4481_v3, %v4253_v47  ;;  %v550_v44 = vadd.f32 %v4481_v3, %v4260_v56  ;;  %v1146_v8 = vor.u32 %v1145_v43, %v1142_v54  ;;  %v1766_v47 = vrot.slane %v4552_v52, 2 }
 0x15f   : > { %v607_v56 = vmax.f32 %v571_v28, 0.0  ;;  %v3626_v39 = vpack.c.bf16 %v601_v55, %v601_v55  ;;  %v4635_v42 = vcombine.low %v4530_v58, %v4559_v27 }
 0x160   : > { %v604_v11 = vmax.f32 %v558_v61, 0.0  ;;  %v602_v21 = vmax.f32 %v550_v44, 0.0  ;;  %v1162_v57 = vsel %vm4062_vm15, %v1146_v8, %v1161_v7  ;;  %v1147_v45 = vrot.slane %v1146_v8, 4 }
 0x161   : > { %1163 = vst [vmem:[#allocation2 + $0x7c] sm:$0xc] %v1162_v57  ;;  %v3632_v43 = vpack.c.bf16 %v607_v56, %v607_v56  ;;  %v1106_v61 = vshrl.u32 %v3626_v39, 16  ;;  %v1109_v44 = vshll.u32 %v3626_v39, 16  ;;  %v1127_v56 = vld [vmem:[#allocation2 + $0x74] sm:$0xe] }
 0x162   : > { %1613 = vrot.lane.b32.xlu0 %v1537_v49, %s3853_s8  ;;  %2027 = vrot.lane.b32.xlu1 %v1912_v36, %s3857_s22  ;;  %v3629_v19 = vpack.c.bf16 %v604_v11, %v604_v11  ;;  %v3627_v54 = vpack.c.bf16 %v602_v21, %v602_v21  ;;  %v1768_v39 = vrot.slane %v4575_v15, 2  ;;  %vm5765_vm15 = vcmask 125952  }
 0x163   : > { %v1108_v4 = vrot.slane %v1106_v61, 6  ;;  %v1111_v55 = vrot.slane %v1109_v44, 7  ;;  %v1208_v11 = vshrl.u32 %v3632_v43, 16  ;;  %v1211_v21 = vshll.u32 %v3632_v43, 16  ;;  %v1227_v44 = vld [vmem:[#allocation2 + $0x90] sm:$0xf] }
 0x164   : > { %v1149_v28 = vshrl.u32 %v3629_v19, 16  ;;  %v1152_v17 = vshll.u32 %v3629_v19, 16  ;;  %v1115_v7 = vshrl.u32 %v3627_v54, 16  ;;  %v1118_v36 = vshll.u32 %v3627_v54, 16 }
 0x165   : > { %v1112_v40 = vor.u32 %v1111_v55, %v1108_v4  ;;  %v4593_v25 = vrot.slane %v1208_v11, 7  ;;  %v605_v19 = vmax.f32 %v563_v1, 0.0  ;;  %v1540_v54 = vrot.slane %v4575_v15, 1 }
 0x166   : > { %1794 = vrot.lane.b32.xlu0 %v4506_v20, %s3854_s9  ;;  %1499 = vrot.lane.b32.xlu1 %v1413_v51, %s3852_s26  ;;  %v1151_v57 = vrot.slane %v1149_v28, 5  ;;  %v1154_v50 = vrot.slane %v1152_v17, 6  ;;  %v1117_v20 = vrot.slane %v1115_v7, 6  ;;  %v1120_v8 = vrot.slane %v1118_v36, 7  ;;  %v1165_v17 = vld [vmem:[#allocation2 + $0x84] sm:$0x7] }
 0x167   : > { %v574_v43 = vadd.f32 %v4481_v3, %v4309_v60  ;;  %v1113_v28 = vrot.slane %v1112_v40, 4  ;;  %v1128_v1 = vsel %vm4068_vm0, %v1112_v40, %v1127_v56  ;;  %v1213_v7 = vor.u32 %v1211_v21, %v4593_v25  ;;  %vm5766_vm0 = vmmov %vm5765_vm15 }
 0x168   : > { %v1155_v51 = vor.u32 %v1154_v50, %v1151_v57  ;;  %v1121_v61 = vor.u32 %v1120_v8, %v1117_v20  ;;  %v1131_v50 = vld [vmem:[#allocation2 + $0x7c] sm:$0x3]  ;;  %1129 = vst [vmem:[#allocation2 + $0x74] sm:$0xe] %v1128_v1  ;;  %v3630_v4 = vpack.c.bf16 %v605_v19, %v605_v19  ;;  %v1769_v38 = vsel %vm1754_vm5, %v1766_v47, %v1768_v39 }
 0x169   : > { %v1228_v55 = vsel %vm4124_vm11, %v1213_v7, %v1227_v44  ;;  %v608_v11 = vmax.f32 %v574_v43, 0.0  ;;  %v1923_v19 = vshrl.u32 %v4635_v42, 16  ;;  %v1214_v44 = vrot.slane %v4593_v25, 4  ;;  %vm5776_vm11 = vmmov %vm5761_vm3 }
 0x16a   : > { %1566 = vrot.lane.b32.xlu0 %v1537_v49, %s3851_s21  ;;  %1727 = vrot.lane.b32.xlu1 %v1668_v18, %s3856_s16  ;;  %v4604_v49 = vsel %vm1754_vm5, %v1764_v2, %v1766_v47  ;;  %v1156_v60 = vsel %vm4075_vm14, %v1147_v45, %v1155_v51  ;;  %v1157_v18 = vrot.slane %v1155_v51, 4  ;;  %v1123_v36 = vrot.slane %v1121_v61, 4  ;;  %1229 = vst [vmem:[#allocation2 + $0x90] sm:$0xf] %v1228_v55 }
 0x16b   : > { %v4614_v2 = vcombine.low %v4470_v34, %v4539_v23  ;;  %1164 = vst.msk [vmem:[#allocation2 + $0x80] sm:$0xf] %vm5765_vm15, %v1156_v60  ;;  %v1122_v24 = vsel %vm4084_vm2, %v1113_v28, %v1121_v61  ;;  %v1174_v34 = vshll.u32 %v3630_v4, 16  ;;  %v1177_v23 = vshrl.u32 %v3630_v4, 16  ;;  %vm5784_vm15 = vmmov %vm5761_vm3 }
 0x16c   : > { %v1166_v31 = vsel %vm4092_vm4, %v1157_v18, %v1165_v17  ;;  %1130 = vst.msk [vmem:[#allocation2 + $0x78] sm:$0xf] %vm5766_vm0, %v1122_v24  ;;  %v3633_v12 = vpack.c.bf16 %v608_v11, %v608_v11  ;;  %v566_v45 = vadd.f32 %v4481_v3, %v4324_v63  ;;  %v5767_v47 = vrot.slane %v4476_v0, 1  ;;  %vm5770_vm4 = vmmov %vm5766_vm0 }
 0x16d   : > { %1167 = vst [vmem:[#allocation2 + $0x84] sm:$0x7] %v1166_v31  ;;  %v1914_v21 = vshrl.u32 %v4614_v2, 16  ;;  %v1917_v56 = vshll.u32 %v4614_v2, 16  ;;  %v1176_v57 = vrot.slane %v1174_v34, 5  ;;  %v1179_v20 = vrot.slane %v1177_v23, 4 }
 0x16e   : > { %1725 = vrot.lane.b32.xlu0 %v1664_v35, %s3856_s16  ;;  %v1132_v35 = vsel %vm4100_vm10, %v1123_v36, %v1131_v50  ;;  %1838 = vrot.lane.b32.xlu1 %v4604_v49, %s3855_s15  ;;  %vm5768_vm14 = vcmask 1046528   ;;  %v1216_v27 = vshrl.u32 %v3633_v12, 16  ;;  %v1219_v8 = vshll.u32 %v3633_v12, 16  ;;  %vm5771_vm10 = vmmov %vm5766_vm0 }
 0x16f   : > { %1133 = vst [vmem:[#allocation2 + $0x7c] sm:$0x3] %v1132_v35  ;;  %v1539_v58 = vsel %vm5768_vm14, %v5767_v47, %v1538_v30  ;;  %v606_v40 = vmax.f32 %v566_v45, 0.0  ;;  %v1926_v63 = vshll.u32 %v4635_v42, 16  ;;  %v1180_v3 = vor.u32 %v1179_v20, %v1176_v57  ;;  %vm5769_vm2 = vmmov %vm5768_vm14  ;;  %v1252_v20 = vld [vmem:[#allocation2 + $0x50] sm:$0xf] }
 0x170   : > { %v1196_v51 = vsel %vm4116_vm6, %v1176_v57, %v1195_v48  ;;  %v1541_v61 = vsel %vm5769_vm2, %v1538_v30, %v1540_v54  ;;  %v1218_v43 = vrot.slane %v1216_v27, 7  ;;  %v1916_v1 = vrot.slane %v1914_v21, 6  ;;  %vm5773_vm6 = vmmov %vm5763_vm1 }
 0x171   : > { %1197 = vst [vmem:[#allocation2 + $0x84] sm:$0x8] %v1196_v51  ;;  %v3631_v28 = vpack.c.bf16 %v606_v40, %v606_v40  ;;  %v1919_v17 = vrot.slane %v1917_v56, 7  ;;  %v1418_v50 = vshll.u32 %v4552_v52, 16  ;;  %v1181_v7 = vrot.slane %v1180_v3, 4  ;;  %vm5785_vm0 = vmmov %vm5773_vm6 }
 0x172   : > { %1840 = vrot.lane.b32.xlu0 %v1769_v38, %s3855_s15  ;;  %1615 = vrot.lane.b32.xlu1 %v1539_v58, %s3853_s8  ;;  %v1221_v60 = vor.u32 %v1219_v8, %v1218_v43  ;;  %v1223_v18 = vrot.slane %v1218_v43, 4  ;;  %v1925_v24 = vrot.slane %v1923_v19, 6  ;;  %v1928_v55 = vrot.slane %v1926_v63, 7  ;;  %v1253_v19 = vld [vmem:[#allocation2 + $0x54] sm:$0xf] }
 0x173   : > { %v1183_v36 = vshll.u32 %v3631_v28, 16  ;;  %v1187_v4 = vshrl.u32 %v3631_v28, 16  ;;  %v1422_v30 = vshrl.u32 %v4552_v52, 16  ;;  %v1430_v25 = vshrl.u32 %v4575_v15, 16 }
 0x174   : > { %v1222_v11 = vsel %vm4133_vm13, %v1214_v44, %v1221_v60  ;;  %v1232_v31 = vsel %vm4147_vm12, %v1223_v18, %v1231_v6  ;;  %v1426_v23 = vshll.u32 %v4575_v15, 16  ;;  %v1920_v21 = vor.u32 %v1919_v17, %v1916_v1  ;;  %vm5777_vm13 = vmmov %vm5761_vm3  ;;  %v1255_v6 = vld [vmem:[#allocation2 + $0x5c] sm:$0xf] }
 0x175   : > { %v1185_v35 = vrot.slane %v1183_v36, 5  ;;  %v1189_v34 = vrot.slane %v1187_v4, 4  ;;  %1230 = vst.msk [vmem:[#allocation2 + $0x94] sm:$0xf] %vm5770_vm4, %v1222_v11  ;;  %1233 = vst [vmem:[#allocation2 + $0x98] sm:$0x1] %v1232_v31  ;;  %v4684_v8 = vcombine.low %v4561_v14, %v1252_v20  ;;  %v1416_v3 = vor.u32 %v5774_v59, %v4532_v22 }
 0x176   : > { %1617 = vrot.lane.b32.xlu0 %v1541_v61, %s3853_s8  ;;  %1796 = vrot.lane.b32.xlu1 %v4604_v49, %s3854_s9  ;;  %v1929_v49 = vor.u32 %v1928_v55, %v1925_v24  ;;  %v1673_v26 = vrot.slane %v1430_v25, 1  ;;  %v1674_v45 = vrot.slane %v1426_v23, 2  ;;  %v1669_v56 = vrot.slane %v1422_v30, 1  ;;  %vm5779_vm12 = vmmov %vm5763_vm1  ;;  %v1258_v59 = vld [vmem:[#allocation2 + $0x68] sm:$0xf] }
 0x177   : > { %v1186_v48 = vsel %vm4141_vm8, %v1181_v7, %v1185_v35  ;;  %v1190_v12 = vor.u32 %v1189_v34, %v1185_v35  ;;  %v1670_v57 = vrot.slane %v1418_v50, 2  ;;  %vm5772_vm8 = vmmov %vm5763_vm1  ;;  %v1921_v40 = vsel %vm5773_vm6, %v4537_v13, %v1920_v21  ;;  %v1254_v7 = vld [vmem:[#allocation2 + $0x58] sm:$0xf] }
 0x178   : > { %1198 = vst.msk [vmem:[#allocation2 + $0x88] sm:$0xf] %vm5771_vm10, %v1186_v48  ;;  %v4681_v27 = vor.u32 %v1674_v45, %v1673_v26  ;;  %v1420_v63 = vrot.slane %v1418_v50, 1  ;;  %v1932_v51 = vshrl.u32 %v4684_v8, 16  ;;  %v4697_v43 = vcombine.low %v1252_v20, %v1253_v19  ;;  %v1256_v26 = vld [vmem:[#allocation2 + $0x60] sm:$0xf]  ;;  %vm5783_vm1 = vmmov %vm5769_vm2 }
 0x179   : > { %v1191_v47 = vrot.slane %v1190_v12, 4  ;;  %v1428_v13 = vrot.slane %v1426_v23, 1  ;;  %v4709_v36 = vcombine.low %v1254_v7, %v1255_v6  ;;  %v4722_v11 = vcombine.low %v1253_v19, %v1254_v7  ;;  %v1257_v45 = vld [vmem:[#allocation2 + $0x64] sm:$0xf]  ;;  %vm5786_vm14 = vmmov %vm5783_vm1 }
 0x17a   : > { %1798 = vrot.lane.b32.xlu0 %v1769_v38, %s3854_s9  ;;  %1568 = vrot.lane.b32.xlu1 %v1539_v58, %s3851_s21  ;;  %v1930_v38 = vsel %vm5772_vm8, %v1920_v21, %v1929_v49  ;;  %v1671_v58 = vor.u32 %v1670_v57, %v1669_v56  ;;  %v1424_v44 = vor.u32 %v1422_v30, %v1420_v63  ;;  %v1934_v1 = vrot.slane %v1932_v51, 6  ;;  %vm5789_vm10 = vmmov %vm5783_vm1 }
 0x17b   : > { %v1200_v33 = vsel %vm4161_vm7, %v1191_v47, %v1199_v37  ;;  %5775 = vst [vmem:[#allocation6_spill] sm:$0xff] %v4697_v43  ;;  %v1421_v28 = vsel %vm5776_vm11, %v1416_v3, %v1420_v63  ;;  %v1770_v50 = vrot.slane %v4697_v43, 2  ;;  %5778 = vst [vmem:[#allocation7_spill] sm:$0xff] %v4709_v36  ;;  %v1542_v24 = vrot.slane %v4697_v43, 1  ;;  %v1259_v3 = vld [vmem:[#allocation2 + $0x6c] sm:$0xf] }
 0x17c   : > { %1201 = vst [vmem:[#allocation2 + $0x8c] sm:$0xf] %v1200_v33  ;;  %v1676_v14 = vsel %vm1640_vm9, %v1671_v58, %v4681_v27  ;;  %v1429_v22 = vsel %vm5777_vm13, %v1424_v44, %v1428_v13  ;;  %v1672_v60 = vsel %vm1640_vm9, %v4557_v53, %v1671_v58  ;;  %v1434_v55 = vshll.u32 %v4697_v43, 16  ;;  %vm5780_vm7 = vmmov %vm5769_vm2 }
 0x17d   : > { %v1771_v4 = vsel %vm1754_vm5, %v1768_v39, %v1770_v50  ;;  %v1772_v53 = vrot.slane %v4709_v36, 2  ;;  %v1543_v31 = vsel %vm5780_vm7, %v1540_v54, %v1542_v24  ;;  %v1432_v39 = vor.u32 %v1430_v25, %v1428_v13  ;;  %vm5790_vm6 = vmmov %vm5785_vm0 }
 0x17e   : > { %1570 = vrot.lane.b32.xlu0 %v1541_v61, %s3851_s21  ;;  %2031 = vrot.lane.b32.xlu1 %v1930_v38, %s3857_s22  ;;  %v1935_v61 = vshll.u32 %v4684_v8, 16  ;;  %v1436_v35 = vrot.slane %v1434_v55, 1  ;;  %v1438_v23 = vshrl.u32 %v4697_v43, 16  ;;  %v1446_v48 = vshrl.u32 %v4709_v36, 16  ;;  %vm5791_vm13 = vmmov %vm5761_vm3 }
 0x17f   : > { %v1773_v34 = vsel %vm1754_vm5, %v1770_v50, %v1772_v53  ;;  %v1442_v12 = vshll.u32 %v4709_v36, 16  ;;  %v1941_v54 = vshrl.u32 %v4722_v11, 16  ;;  %v1544_v37 = vrot.slane %v4709_v36, 1 }
 0x180   : > { %v1937_v17 = vrot.slane %v1935_v61, 7  ;;  %v1437_v25 = vsel %vm5761_vm3, %v1432_v39, %v1436_v35  ;;  %v1677_v21 = vrot.slane %v1438_v23, 1  ;;  %v1678_v56 = vrot.slane %v1434_v55, 2 }
 0x181   : > { %v1681_v57 = vrot.slane %v1446_v48, 1  ;;  %v1943_v20 = vrot.slane %v1941_v54, 6  ;;  %v1682_v33 = vrot.slane %v1442_v12, 2  ;;  %v4745_v38 = vcombine.low %v1255_v6, %v1256_v26 }
 0x182   : > { %2029 = vrot.lane.b32.xlu0 %v1921_v40, %s3857_s22  ;;  %1731 = vrot.lane.b32.xlu1 %v1676_v14, %s3856_s16  ;;  %v4707_v18 = vor.u32 %v1937_v17, %v1934_v1  ;;  %v1440_v58 = vor.u32 %v1438_v23, %v1436_v35  ;;  %v1444_v40 = vrot.slane %v1442_v12, 1  ;;  %v4749_v63 = vcombine.low %v1256_v26, %v1257_v45  ;;  %v4777_v12 = vld [vmem:[#allocation2 + $0xc] sm:$0xf] }
 0x183   : > { %v1950_v51 = vshrl.u32 %v4745_v38, 16  ;;  %v1953_v61 = vshll.u32 %v4745_v38, 16  ;;  %v4754_v14 = vcombine.low %v1258_v59, %v1259_v3  ;;  %v1545_v44 = vsel %vm5783_vm1, %v1542_v24, %v1544_v37 }
 0x184   : > { %v1939_v30 = vsel %vm5779_vm12, %v1929_v49, %v4707_v18  ;;  %v1944_v49 = vshll.u32 %v4722_v11, 16  ;;  %5781 = vst [vmem:[#allocation8_spill] sm:$0xff] %v4749_v63  ;;  %v4758_v1 = vor.u32 %v1682_v33, %v1681_v57  ;;  %v1445_v17 = vsel %vm5784_vm15, %v1440_v58, %v1444_v40  ;;  %v4815_v58 = vld [vmem:[#allocation2 + $0x74] sm:$0xf]  ;;  %vm5792_vm12 = vmmov %vm5761_vm3 }
 0x185   : > { %5782 = vst [vmem:[#allocation9_spill] sm:$0xff] %v4754_v14  ;;  %v1774_v7 = vrot.slane %v4749_v63, 2  ;;  %v1546_v6 = vrot.slane %v4749_v63, 1  ;;  %v1955_v24 = vrot.slane %v1953_v61, 7  ;;  %v5704_v55 = vrot.slane %v4754_v14, 2  ;;  %vm5800_vm15 = vmmov %vm5789_vm10 }
 0x186   : > { %1501 = vrot.lane.b32.xlu0 %v1421_v28, %s3852_s26  ;;  %1503 = vrot.lane.b32.xlu1 %v1429_v22, %s3852_s26  ;;  %v1946_v47 = vrot.slane %v1944_v49, 7  ;;  %v1679_v28 = vor.u32 %v1678_v56, %v1677_v21  ;;  %v1458_v39 = vshll.u32 %v4754_v14, 16  ;;  %v4774_v35 = vcombine.low %v1257_v45, %v1258_v59 }
 0x187   : > { %v5706_v23 = vshrl.u32 %v4754_v14, 16  ;;  %v4795_v56 = vsel %vm1754_vm5, %v1772_v53, %v1774_v7  ;;  %v4798_v57 = vsel %vm5786_vm14, %v1544_v37, %v1546_v6  ;;  %vm5788_vm2 = vcmask 1040384   ;;  %vm5803_vm14 = vmmov %vm5790_vm6 }
 0x188   : > { %v1947_v13 = vor.u32 %v1946_v47, %v1943_v20  ;;  %v1684_v26 = vsel %vm1640_vm9, %v1679_v28, %v4758_v1  ;;  %v5787_v20 = vrot.slane %v4299_v32, 7  ;;  %v4812_v53 = vsel %vm1754_vm5, %v1774_v7, %v5704_v55  ;;  %vm5796_vm3 = vmmov %vm5788_vm2 }
 0x189   : > { %v1548_v33 = vrot.slane %v4754_v14, 1  ;;  %v1959_v59 = vshrl.u32 %v4774_v35, 16  ;;  %v1962_v32 = vshll.u32 %v4774_v35, 16  ;;  %v1690_v61 = vrot.slane %v1458_v39, 2 }
 0x18a   : > { %1729 = vrot.lane.b32.xlu0 %v1672_v60, %s3856_s16  ;;  %1842 = vrot.lane.b32.xlu1 %v1771_v4, %s3855_s15  ;;  %v5705_v60 = vrot.slane %v4438_v41, 7  ;;  %v1948_v49 = vsel %vm5785_vm0, %v4707_v18, %v1947_v13  ;;  %v1454_v18 = vshrl.u32 %v4749_v63, 16  ;;  %vm2122_vm4 = vcmask 261120  }
 0x18b   : > { %vm2155_vm8 = vcmask 392192   ;;  %vm2220_vm11 = vcmask 654336   ;;  %vm5793_vm7 = vcmask 130048   ;;  %vm2253_vm1 = vcmask 785408  }
 0x18c   : > { %v1685_v54 = vrot.slane %v1454_v18, 1  ;;  %vm5802_vm0 = vmmov %vm5793_vm7 }
 0x18e   : > { %2033 = vrot.lane.b32.xlu0 %v1939_v30, %s3857_s22  ;;  %1619 = vrot.lane.b32.xlu1 %v1543_v31, %s3853_s8  ;;  %v1450_v30 = vshll.u32 %v4749_v63, 16 }
 0x190   : > { %v1452_v37 = vrot.slane %v1450_v30, 1  ;;  %v1686_v55 = vrot.slane %v1450_v30, 2 }
 0x192   : > { %1844 = vrot.lane.b32.xlu0 %v1773_v34, %s3855_s15  ;;  %1800 = vrot.lane.b32.xlu1 %v1771_v4, %s3854_s9  ;;  %v1952_v4 = vrot.slane %v1950_v51, 6  ;;  %v1689_v51 = vrot.slane %v5706_v23, 1  ;;  %v1964_v23 = vrot.slane %v1962_v32, 7  ;;  %v1687_v36 = vor.u32 %v1686_v55, %v1685_v54 }
 0x194   : > { %v4807_v47 = vor.u32 %v1955_v24, %v1952_v4  ;;  %v4841_v30 = vor.u32 %v1690_v61, %v1689_v51 }
 0x195   : > { %v4747_v19 = vpop.permute.xlu1 %1556 }
 0x196   : > { %1505 = vrot.lane.b32.xlu0 %v1437_v25, %s3852_s26  ;;  %1572 = vrot.lane.b32.xlu1 %v1543_v31, %s3851_s21  ;;  %v4771_v31 = vld [vmem:[#allocation2 + $0x8] sm:$0xe]  ;;  %v1680_v25 = vsel %vm1640_vm9, %v4681_v27, %v1679_v28  ;;  %v2061_v27 = vsel %vm5788_vm2, %v5787_v20, %v5705_v60  ;;  %v1448_v28 = vor.u32 %v1446_v48, %v1444_v40  ;;  %v1460_v20 = vrot.slane %v1458_v39, 1 }
 0x197   : > { %v2388_v7 = vshll.u32 %v2061_v27, 16  ;;  %v4835_v48 = vsel %vm5789_vm10, %v1546_v6, %v1548_v33  ;;  %v1961_v39 = vrot.slane %v1959_v59, 6  ;;  %v5711_v6 = vrot.slane %v4486_v9, 7  ;;  %vm5804_vm10 = vmmov %vm5792_vm12 }
 0x198   : > { %vm2286_vm2 = vcmask 916480  }
 0x199   : > { %v1965_v54 = vor.u32 %v1964_v23, %v1961_v39  ;;  %v4888_v39 = vsel %vm1640_vm9, %v4758_v1, %v1687_v36 }
 0x19a   : > { %1621 = vrot.lane.b32.xlu0 %v1545_v44, %s3853_s8  ;;  %v4761_v22 = vpop.permute.xlu0 %1489  ;;  %1507 = vrot.lane.b32.xlu1 %v1445_v17, %s3852_s26  ;;  %v2385_v17 = vshrl.u32 %v2061_v27, 16  ;;  %v1957_v27 = vsel %vm5790_vm6, %v1947_v13, %v4807_v47  ;;  %vm5805_vm6 = vmmov %vm5796_vm3 }
 0x19b   : > { %v4763_v50 = vpop.permute.xlu1 %1558 }
 0x19e   : > { %1802 = vrot.lane.b32.xlu0 %v1773_v34, %s3854_s9  ;;  %v4788_v45 = vpop.permute.xlu0 %1605  ;;  %v1260_v34 = vld [vmem:[#allocation2 + $0x70] sm:$0xf]  ;;  %2035 = vrot.lane.b32.xlu1 %v1948_v49, %s3857_s22 }
 0x19f   : > { %v4790_v21 = vpop.permute.xlu1 %1607  ;;  %v4824_v4 = vcombine.low %v1259_v3, %v1260_v34  ;;  %v4831_v60 = vcombine.low %v1260_v34, %v4815_v58  ;;  %v2387_v34 = vrot.slane %v2385_v17, 1  ;;  %v4861_v17 = vsel %vm1640_vm9, %v1687_v36, %v4841_v30 }
 0x1a1   : > { %v1968_v40 = vshrl.u32 %v4824_v4, 16  ;;  %v1971_v3 = vshll.u32 %v4824_v4, 16  ;;  %v1466_v59 = vshll.u32 %v4831_v60, 16 }
 0x1a2   : > { %1574 = vrot.lane.b32.xlu0 %v1545_v44, %s3851_s21  ;;  %v4826_v24 = vpop.permute.xlu0 %1786  ;;  %1735 = vrot.lane.b32.xlu1 %v1684_v26, %s3856_s16  ;;  %v1456_v44 = vor.u32 %v1454_v18, %v1452_v37  ;;  %v2390_v26 = vrot.slane %v2388_v7, 2  ;;  %v5712_v18 = vshrl.u32 %v4831_v60, 16  ;;  %v5794_v7 = vshrl.u32 %v4754_v14, 16 }
 0x1a3   : > { %v4828_v49 = vpop.permute.xlu1 %1788  ;;  %v1970_v51 = vrot.slane %v1968_v40, 6  ;;  %v1973_v61 = vrot.slane %v1971_v3, 7  ;;  %v1263_v40 = vld [vmem:[#allocation2 + $0x7c] sm:$0xf]  ;;  %v5798_v3 = vrot.slane %v4754_v14, 2 }
 0x1a4   : > { %v4855_v32 = vsel %vm5792_vm12, %v1456_v44, %v1460_v20  ;;  %v1464_v13 = vor.u32 %v5794_v7, %v1460_v20  ;;  %v4866_v52 = vor.u32 %v2390_v26, %v2387_v34  ;;  %v1262_v44 = vld [vmem:[#allocation2 + $0x78] sm:$0xf]  ;;  %v5797_v20 = vrot.slane %v4831_v60, 2  ;;  %vm5807_vm12 = vmmov %vm5803_vm14 }
 0x1a5   : > { %v5799_v34 = vrot.slane %v4831_v60, 1  ;;  %v4895_v26 = vrot.slane %v1466_v59, 1  ;;  %v5801_v7 = vcombine.low %v4771_v31, %v4777_v12  ;;  %v4906_v1 = vor.u32 %v1973_v61, %v1970_v51  ;;  %v4918_v12 = vld [vmem:[#allocation2 + $0x90] sm:$0xf] }
 0x1a6   : > { %1733 = vrot.lane.b32.xlu0 %v1680_v25, %s3856_s16  ;;  %v1492_v63 = vpop.permute.xlu0 %1491  ;;  %1846 = vrot.lane.b32.xlu1 %v4795_v56, %s3855_s15  ;;  %v1453_v25 = vsel %vm5791_vm13, %v1448_v28, %v1452_v37  ;;  %v1693_v37 = vrot.slane %v5712_v18, 1  ;;  %v1694_v28 = vrot.slane %v1466_v59, 2  ;;  %v4911_v59 = vsel %vm5803_vm14, %v4807_v47, %v1965_v54  ;;  %v4945_v18 = vld [vmem:[#allocation2 + $0x88] sm:$0xf]  ;;  %vm5810_vm14 = vmmov %vm5796_vm3 }
 0x1a7   : > { %v4846_v43 = vpop.permute.xlu1 %1560  ;;  %v2093_v55 = vsel %vm5793_vm7, %v4191_v62, %v1492_v63  ;;  %v5795_v62 = vrot.slane %v4438_v41, 7  ;;  %v4893_v41 = vsel %vm5800_vm15, %v1548_v33, %v5799_v34  ;;  %v2068_v33 = vrot.slane %v4684_v8, 7  ;;  %v4939_v34 = vld [vmem:[#allocation2 + $0x94] sm:$0xf]  ;;  %vm5809_vm15 = vmmov %vm5796_vm3 }
 0x1a8   : > { %v4915_v31 = vcombine.low %v1262_v44, %v1263_v40  ;;  %v4926_v8 = vsel %vm1640_vm9, %v4348_v10, %v4866_v52  ;;  %v4930_v47 = vsel %vm5804_vm10, %v1464_v13, %v4895_v26  ;;  %v4932_v51 = vor.u32 %v1694_v28, %v1693_v37  ;;  %v4947_v13 = vld [vmem:[#allocation2 + $0x8c] sm:$0xf]  ;;  %vm5811_vm10 = vmmov %vm5796_vm3 }
 0x1a9   : > { %v4875_v63 = vsel %vm5796_vm3, %v5795_v62, %v5711_v6  ;;  %v2091_v62 = vsel %vm5802_vm0, %v5801_v7, %v4761_v22  ;;  %v4935_v61 = vcombine.low %v4815_v58, %v1262_v44  ;;  %v1277_v7 = vld [vmem:[#allocation2 + $0x98] sm:$0x1]  ;;  %v2070_v37 = vrot.slane %v4722_v11, 7 }
 0x1aa   : > { %2037 = vrot.lane.b32.xlu0 %v1957_v27, %s3857_s22  ;;  %v4877_v23 = vpop.permute.xlu0 %1830  ;;  %v4884_v27 = vsel %vm1754_vm5, %v5798_v3, %v5797_v20  ;;  %v2126_v20 = vsel %vm2122_vm4, %v2093_v55, %v4763_v50  ;;  %1623 = vrot.lane.b32.xlu1 %v4798_v57, %s3853_s8  ;;  %v4913_v3 = vld [vmem:[#allocation2 + $0x80] sm:$0xf]  ;;  %v2402_v22 = vshrl.u32 %v4875_v63, 16  ;;  %v5714_v50 = vrot.slane %v4635_v42, 7  ;;  %v4937_v55 = vld [vmem:[#allocation2 + $0x84] sm:$0xf] }
 0x1ab   : > { %v2124_v6 = vsel %vm2122_vm4, %v2091_v62, %v4747_v19  ;;  %v2159_v10 = vsel %vm2155_vm8, %v2126_v20, %v4790_v21  ;;  %vm5806_vm13 = vcmask 523264   ;;  %v4960_v21 = vsel %vm5807_vm12, %v1965_v54, %v4906_v1  ;;  %vm5814_vm12 = vmmov %vm5796_vm3 }
 0x1ac   : > { %v1722_v36 = vpop.permute.xlu1 %1721  ;;  %v2069_v58 = vsel %vm5805_vm6, %v5714_v50, %v2068_v33  ;;  %v2157_v28 = vsel %vm2155_vm8, %v2124_v6, %v4788_v45  ;;  %vm5808_vm7 = vmmov %vm5806_vm13  ;;  %v4963_v14 = vrot.slane %v2402_v22, 1  ;;  %v3556_v50 = vcombine.low %v4939_v34, %v1277_v7 }
 0x1ad   : > { %v2191_v19 = vsel %vm5806_vm13, %v2159_v10, %v1722_v36  ;;  %v2453_v62 = vshrl.u32 %v2069_v58, 16  ;;  %v4973_v6 = vcombine.low %v4937_v55, %v4945_v18  ;;  %v4977_v54 = vcombine.low %v4947_v13, %v4918_v12  ;;  %vm5812_vm6 = vmmov %vm5796_vm3 }
 0x1ae   : > { %1848 = vrot.lane.b32.xlu0 %v4812_v53, %s3855_s15  ;;  %1804 = vrot.lane.b32.xlu1 %v4795_v56, %s3854_s9  ;;  %v4969_v56 = vcombine.low %v1263_v40, %v4913_v3  ;;  %v2456_v36 = vshll.u32 %v2069_v58, 16  ;;  %v2224_v7 = vsel %vm2220_vm11, %v2191_v19, %v4828_v49  ;;  %v2072_v40 = vrot.slane %v4745_v38, 7  ;;  %vm5813_vm13 = vmmov %vm5796_vm3 }
 0x1af   : > { %v2086_v16 = vrot.slane %v3556_v50, 7  ;;  %v2076_v50 = vrot.slane %v4824_v4, 7 }
 0x1b0   : > { %v1720_v44 = vpop.permute.xlu0 %1719  ;;  %v1833_v45 = vpop.permute.xlu1 %1832 }
 0x1b1   : > { %v2189_v20 = vsel %vm5808_vm7, %v2157_v28, %v1720_v44  ;;  %v2455_v28 = vrot.slane %v2453_v62, 1  ;;  %v2458_v44 = vrot.slane %v2456_v36, 2  ;;  %v2257_v58 = vsel %vm2253_vm1, %v2224_v7, %v1833_v45 }
 0x1b2   : > { %1509 = vrot.lane.b32.xlu0 %v1453_v25, %s3852_s26  ;;  %v2222_v22 = vsel %vm2220_vm11, %v2189_v20, %v4826_v24  ;;  %v2071_v25 = vsel %vm5796_vm3, %v2068_v33, %v2070_v37  ;;  %1576 = vrot.lane.b32.xlu1 %v4798_v57, %s3851_s21  ;;  %v2073_v24 = vsel %vm5809_vm15, %v2070_v37, %v2072_v40  ;;  %v2074_v20 = vrot.slane %v4774_v35, 7  ;;  %vm5815_vm15 = vmmov %vm5802_vm0 }
 0x1b3   : > { %v2470_v11 = vshrl.u32 %v2071_v25, 16  ;;  %v2473_v15 = vshll.u32 %v2071_v25, 16  ;;  %v2255_v38 = vsel %vm2253_vm1, %v2222_v22, %v4877_v23  ;;  %v2487_v19 = vshrl.u32 %v2073_v24, 16 }
 0x1b4   : > { %v1494_v10 = vpop.permute.xlu0 %1493  ;;  %v2490_v62 = vshll.u32 %v2073_v24, 16  ;;  %v2075_v45 = vsel %vm5810_vm14, %v2072_v40, %v2074_v20  ;;  %v5000_v37 = vor.u32 %v2458_v44, %v2455_v28  ;;  %vm5819_vm14 = vmmov %vm5815_vm15 }
 0x1b5   : > { %v2095_v49 = vsel %vm5802_vm0, %v4241_v29, %v1494_v10  ;;  %v2472_v57 = vrot.slane %v2470_v11, 1  ;;  %v2475_v33 = vrot.slane %v2473_v15, 2  ;;  %v2504_v36 = vshrl.u32 %v2075_v45, 16  ;;  %vm5816_vm0 = vmmov %vm5796_vm3 }
 0x1b6   : > { %1625 = vrot.lane.b32.xlu0 %v4835_v48, %s3853_s8  ;;  %1511 = vrot.lane.b32.xlu1 %v4855_v32, %s3852_s26  ;;  %v2507_v7 = vshll.u32 %v2075_v45, 16  ;;  %v2489_v23 = vrot.slane %v2487_v19, 1  ;;  %v2492_v11 = vrot.slane %v2490_v62, 2  ;;  %v2077_v15 = vsel %vm5811_vm10, %v2074_v20, %v2076_v50 }
 0x1b7   : > { %v2476_v29 = vor.u32 %v2475_v33, %v2472_v57  ;;  %v2506_v32 = vrot.slane %v2504_v36, 1  ;;  %vm5820_vm10 = vcmask 1046528  }
 0x1b8   : > { %v2022_v35 = vpop.permute.xlu0 %2021  ;;  %v2024_v22 = vpop.permute.xlu1 %2023  ;;  %v2493_v44 = vor.u32 %v2492_v11, %v2489_v23  ;;  %v2509_v24 = vrot.slane %v2507_v7, 2  ;;  %v2524_v11 = vshll.u32 %v2077_v15, 16 }
 0x1b9   : > { %v2288_v25 = vsel %vm2286_vm2, %v2255_v38, %v2022_v35  ;;  %v5008_v4 = vsel %vm1640_vm9, %v5000_v37, %v2476_v29  ;;  %v2290_v28 = vsel %vm2286_vm2, %v2257_v58, %v2024_v22  ;;  %v2521_v38 = vshrl.u32 %v2077_v15, 16 }
 0x1ba   : > { %v2344_v10 = vshrl.u32 %v2288_v25, 16  ;;  %v2347_v40 = vshll.u32 %v2288_v25, 16  ;;  %1806 = vrot.lane.b32.xlu0 %v4812_v53, %s3854_s9  ;;  %v2351_v57 = vshrl.u32 %v2290_v28, 16  ;;  %v2354_v33 = vshll.u32 %v2290_v28, 16  ;;  %2039 = vrot.lane.b32.xlu1 %v4911_v59, %s3857_s22 }
 0x1bb   : > { %v2084_v53 = vrot.slane %v4977_v54, 7  ;;  %v5015_v45 = vsel %vm1640_vm9, %v2476_v29, %v2493_v44  ;;  %v2510_v35 = vor.u32 %v2509_v24, %v2506_v32  ;;  %v2523_v36 = vrot.slane %v2521_v38, 1 }
 0x1bc   : > { %v2346_v19 = vrot.slane %v2344_v10, 1  ;;  %v2349_v20 = vrot.slane %v2347_v40, 2  ;;  %v1610_v62 = vpop.permute.xlu0 %1609  ;;  %v2353_v25 = vrot.slane %v2351_v57, 1  ;;  %v2356_v58 = vrot.slane %v2354_v33, 2  ;;  %v5017_v7 = vpop.permute.xlu1 %1495 }
 0x1bd   : > { %v2128_v59 = vsel %vm2122_vm4, %v2095_v49, %v4846_v43  ;;  %v5024_v22 = vsel %vm1640_vm9, %v2493_v44, %v2510_v35  ;;  %v2078_v29 = vrot.slane %v4935_v61, 7  ;;  %v2080_v10 = vrot.slane %v4969_v56, 7 }
 0x1be   : > { %v2350_v23 = vor.u32 %v2349_v20, %v2346_v19  ;;  %1578 = vrot.lane.b32.xlu0 %v4835_v48, %s3851_s21  ;;  %v5028_v40 = vor.u32 %v2356_v58, %v2353_v25  ;;  %1739 = vrot.lane.b32.xlu1 %v4861_v17, %s3856_s16  ;;  %v2526_v28 = vrot.slane %v2524_v11, 2  ;;  %v2082_v48 = vrot.slane %v4973_v6, 7 }
 0x1bf   : > { %v2087_v15 = vsel %vm5812_vm6, %v2084_v53, %v2086_v16  ;;  %v2161_v43 = vsel %vm2155_vm8, %v2128_v59, %v1610_v62  ;;  %v2079_v49 = vsel %vm5813_vm13, %v2076_v50, %v2078_v29  ;;  %v2081_v44 = vsel %vm5814_vm12, %v2078_v29, %v2080_v10  ;;  %vm5822_vm6 = vmmov %vm5820_vm10 }
 0x1c0   : > { %v1791_v32 = vpop.permute.xlu0 %1790  ;;  %v2606_v24 = vshrl.u32 %v2087_v15, 16  ;;  %v1724_v38 = vpop.permute.xlu1 %1723  ;;  %v2358_v57 = vsel %vm1640_vm9, %v2350_v23, %v5028_v40  ;;  %v2527_v17 = vor.u32 %v2526_v28, %v2523_v36  ;;  %v2538_v33 = vshrl.u32 %v2079_v49, 16  ;;  %vm5826_vm12 = vmmov %vm5816_vm0 }
 0x1c1   : > { %v2541_v19 = vshll.u32 %v2079_v49, 16  ;;  %v2193_v20 = vsel %vm5808_vm7, %v2161_v43, %v1724_v38  ;;  %2765 = vmatmul.mubr.bf16.vlgmr.msra.gmra.mrb[0].mxu1 %v2358_v57  ;;  %v2555_v16 = vshrl.u32 %v2081_v44, 16  ;;  %v2558_v62 = vshll.u32 %v2081_v44, 16  ;;  %vm5827_vm7 = vmmov %vm5819_vm14 }
 0x1c2   : > { %1737 = vrot.lane.b32.xlu0 %v4888_v39, %s3856_s16  ;;  %v2083_v50 = vsel %vm5796_vm3, %v2080_v10, %v2082_v48  ;;  %1850 = vrot.lane.b32.xlu1 %v4884_v27, %s3855_s15  ;;  %v5050_v39 = vsel %vm1640_vm9, %v2510_v35, %v2527_v17  ;;  %v2540_v36 = vrot.slane %v2538_v33, 1  ;;  %v2609_v23 = vshll.u32 %v2087_v15, 16  ;;  %v1267_v15 = vld [vmem:[#allocation2 + $0x84] sm:$0x7] }
 0x1c3   : > { %3568 = vmatprep.mubr.msk.bf16.mxu1 %vm5815_vm15, %v4926_v8  ;;  %v2543_v58 = vrot.slane %v2541_v19, 2  ;;  %v2226_v11 = vsel %vm2220_vm11, %v2193_v20, %v1791_v32  ;;  %v2557_v59 = vrot.slane %v2555_v16, 1  ;;  %v2560_v29 = vrot.slane %v2558_v62, 2 }
 0x1c4   : > { %v5047_v25 = vpop.permute.xlu0 %1562  ;;  %v2572_v28 = vshrl.u32 %v2083_v50, 16  ;;  %v1835_v10 = vpop.permute.xlu1 %1834  ;;  %v2575_v49 = vshll.u32 %v2083_v50, 16  ;;  %v2085_v8 = vsel %vm5816_vm0, %v2082_v48, %v2084_v53  ;;  %v2608_v44 = vrot.slane %v2606_v24, 1  ;;  %vm5830_vm0 = vmmov %vm5822_vm6 }
 0x1c5   : > { %v2544_v43 = vor.u32 %v2543_v58, %v2540_v36  ;;  %v2259_v35 = vsel %vm2253_vm1, %v2226_v11, %v1835_v10  ;;  %v2561_v38 = vor.u32 %v2560_v29, %v2557_v59  ;;  %v2589_v33 = vshrl.u32 %v2085_v8, 16 }
 0x1c6   : > { %2041 = vrot.lane.b32.xlu0 %v4960_v21, %s3857_s22  ;;  %v2574_v57 = vrot.slane %v2572_v28, 1  ;;  %1627 = vrot.lane.b32.xlu1 %v4893_v41, %s3853_s8  ;;  %v2577_v20 = vrot.slane %v2575_v49, 2  ;;  %v2592_v21 = vshll.u32 %v2085_v8, 16  ;;  %v2611_v16 = vrot.slane %v2609_v23, 2 }
 0x1c7   : > { %v5060_v19 = vsel %vm1640_vm9, %v2527_v17, %v2544_v43  ;;  %v5817_v53 = vshll.u32 %v4875_v63, 16  ;;  %v5066_v24 = vsel %vm1640_vm9, %v2544_v43, %v2561_v38  ;;  %v2591_v50 = vrot.slane %v2589_v33, 1 }
 0x1c8   : > { %v2026_v32 = vpop.permute.xlu0 %2025  ;;  %v5068_v36 = vpop.permute.xlu1 %1611  ;;  %v2578_v17 = vor.u32 %v2577_v20, %v2574_v57  ;;  %v2594_v59 = vrot.slane %v2592_v21, 2  ;;  %v3532_v23 = vcombine.low %v4913_v3, %v1267_v15  ;;  %v1977_v29 = vshrl.u32 %v4935_v61, 16 }
 0x1c9   : > { %v2292_v62 = vsel %vm2286_vm2, %v2259_v35, %v2026_v32  ;;  %v2407_v48 = vrot.slane %v5817_v53, 2  ;;  %v1980_v63 = vshll.u32 %v4935_v61, 16  ;;  %v5075_v28 = vor.u32 %v2611_v16, %v2608_v44 }
 0x1ca   : > { %v2376_v58 = vshrl.u32 %v2292_v62, 16  ;;  %v2379_v11 = vshll.u32 %v2292_v62, 16  ;;  %1513 = vrot.lane.b32.xlu0 %v4930_v47, %s3852_s26  ;;  %1808 = vrot.lane.b32.xlu1 %v4884_v27, %s3854_s9  ;;  %v5082_v8 = vsel %vm1640_vm9, %v2561_v38, %v2578_v17  ;;  %v2595_v47 = vor.u32 %v2594_v59, %v2591_v50 }
 0x1cb   : > { %v1696_v35 = vsel %vm1640_vm9, %v4841_v30, %v4932_v51  ;;  %v1780_v57 = vrot.slane %v4915_v31, 2  ;;  %v5089_v61 = vor.u32 %v2407_v48, %v4963_v14  ;;  %v1554_v32 = vrot.slane %v3532_v23, 1 }
 0x1cc   : > { %v2378_v10 = vrot.slane %v2376_v58, 1  ;;  %v2381_v43 = vrot.slane %v2379_v11, 2  ;;  %v5079_v49 = vpop.permute.xlu0 %1836  ;;  %v5093_v33 = vpop.permute.xlu1 %1792  ;;  %v5097_v27 = vsel %vm1640_vm9, %v2578_v17, %v2595_v47  ;;  %v5101_v38 = vsel %vm1640_vm9, %v2595_v47, %v5075_v28 }
 0x1cd   : > { %v1979_v30 = vrot.slane %v1977_v29, 6  ;;  %v1982_v15 = vrot.slane %v1980_v63, 7  ;;  %v1552_v21 = vrot.slane %v4915_v31, 1  ;;  %v5818_v16 = vrot.slane %v4831_v60, 2 }
 0x1ce   : > { %v5091_v44 = vor.u32 %v2381_v43, %v2378_v10  ;;  %1741 = vrot.lane.b32.xlu0 %v1696_v35, %s3856_s16  ;;  %1580 = vrot.lane.b32.xlu1 %v4893_v41, %s3851_s21  ;;  %v2409_v53 = vsel %vm1640_vm9, %v4866_v52, %v5089_v61  ;;  %v5124_v50 = vcombine.low %v4913_v3, %v4937_v55  ;;  %v5821_v11 = vrot.slane %v4831_v60, 1 }
 0x1cf   : > { %v1781_v62 = vsel %vm1754_vm5, %v5818_v16, %v1780_v57  ;;  %v1555_v41 = vsel %vm5820_vm10, %v1552_v21, %v1554_v32  ;;  %vm5823_vm13 = vsmask.f32 1280  ;;  %v1474_v29 = vshll.u32 %v4915_v31, 16 }
 0x1d0   : > { %v5105_v14 = vpop.permute.xlu0 %1497  ;;  %v2383_v20 = vsel %vm1640_vm9, %v5028_v40, %v5091_v44  ;;  %v5117_v48 = vpop.permute.xlu1 %1564  ;;  %v1983_v40 = vor.u32 %v1982_v15, %v1979_v30  ;;  %v1553_v52 = vsel %vm5822_vm6, %v5821_v11, %v1552_v21  ;;  %v5717_v23 = vrot.slane %v5124_v50, 2  ;;  %vm5833_vm6 = vmmov %vm5827_vm7 }
 0x1d1   : > { %2773 = vmatmul.mubr.bf16.gmra.mrb[4].mxu1 %v2383_v20  ;;  %v1986_v63 = vshrl.u32 %v4969_v56, 16  ;;  %v1989_v10 = vshll.u32 %v4969_v56, 16  ;;  %v5718_v43 = vrot.slane %v4614_v2, 7  ;;  %v5824_v35 = vshrl.u32 %v4831_v60, 16 }
 0x1d2   : > { %1852 = vrot.lane.b32.xlu0 %v1781_v62, %s3855_s15  ;;  %3569 = vmatprep.mubr.msk.bf16.mxu1 %vm5819_vm14, %v2409_v53  ;;  %v1984_v59 = vsel %vm5823_vm13, %v4906_v1, %v1983_v40  ;;  %v1783_v1 = vsel %vm1754_vm5, %v1780_v57, %v5717_v23  ;;  %v1476_v15 = vrot.slane %v1474_v29, 1  ;;  %v1265_v53 = vld [vmem:[#allocation2 + $0x84] sm:$0x3]  ;;  %v2097_v57 = vsel %vm5827_vm7, %v4251_v46, %v5017_v7  ;;  %vm5831_vm14 = vmmov %vm5823_vm13 }
 0x1d3   : > { %1584 = vrot.lane.b32.xlu1 %v1555_v41, %s3851_s21  ;;  %v1472_v30 = vor.u32 %v5824_v35, %v4895_v26  ;;  %v1988_v56 = vrot.slane %v1986_v63, 6  ;;  %v1991_v16 = vrot.slane %v1989_v10, 7  ;;  %v1478_v26 = vshrl.u32 %v4915_v31, 16  ;;  %vm5834_vm13 = vmmov %vm5833_vm6 }
 0x1d4   : > { %v5127_v58 = vpop.permute.xlu0 %1613  ;;  %v2028_v17 = vpop.permute.xlu1 %2027  ;;  %vm5828_vm3 = vsmask.f32 7424  ;;  %v1601_v10 = vrot.slane %v5124_v50, 1  ;;  %vm5829_vm15 = vcmask 523264  }
 0x1d5   : > { %v1477_v63 = vsel %vm5828_vm3, %v1472_v30, %v1476_v15  ;;  %v5177_v7 = vor.u32 %v1991_v16, %v1988_v56  ;;  %v1705_v30 = vshll.u32 %v5124_v50, 16  ;;  %vm5832_vm10 = vmmov %vm5828_vm3 }
 0x1d6   : > { %1629 = vrot.lane.b32.xlu0 %v1553_v52, %s3853_s8  ;;  %v1602_v16 = vsel %vm5830_vm0, %v1552_v21, %v1601_v10  ;;  %vm5837_vm7 = vmmov %vm5829_vm15 }
 0x1d7   : > { %2043 = vrot.lane.b32.xlu1 %v1984_v59, %s3857_s22  ;;  %v2130_v59 = vsel %vm2122_vm4, %v2097_v57, %v5047_v25  ;;  %v1702_v25 = vshrl.u32 %v5124_v50, 16  ;;  %vm5839_vm3 = vmmov %vm5830_vm0 }
 0x1d8   : > { %v5138_v55 = vpop.permute.xlu0 %1794  ;;  %v5143_v47 = vpop.permute.xlu1 %1499  ;;  %v2163_v35 = vsel %vm2155_vm8, %v2130_v59, %v5068_v36  ;;  %v1697_v36 = vrot.slane %v1478_v26, 1  ;;  %vm5841_vm0 = vmmov %vm5833_vm6 }
 0x1da   : > { %1810 = vrot.lane.b32.xlu0 %v1781_v62, %s3854_s9  ;;  %v5825_v62 = vrot.slane %v4486_v9, 7  ;;  %v5172_v9 = vcombine.low %v4913_v3, %v1265_v53  ;;  %v1698_v53 = vrot.slane %v1474_v29, 2 }
 0x1db   : > { %1854 = vrot.lane.b32.xlu1 %v1783_v1, %s3855_s15 }
 0x1dc   : > { %v5153_v20 = vpop.permute.xlu0 %1566  ;;  %v2065_v41 = vsel %vm5826_vm12, %v5825_v62, %v5718_v43  ;;  %v5163_v11 = vpop.permute.xlu1 %1727  ;;  %v1482_v59 = vshll.u32 %v5172_v9, 16  ;;  %v1699_v21 = vor.u32 %v1698_v53, %v1697_v36 }
 0x1dd   : > { %v2422_v62 = vshll.u32 %v2065_v41, 16 }
 0x1de   : > { %1582 = vrot.lane.b32.xlu0 %v1553_v52, %s3851_s21  ;;  %v2419_v52 = vshrl.u32 %v2065_v41, 16  ;;  %v1480_v41 = vor.u32 %v1478_v26, %v1476_v15  ;;  %v1484_v15 = vrot.slane %v1482_v59, 1  ;;  %v3539_v59 = vcombine.low %v4918_v12, %v4939_v34 }
 0x1df   : > { %1515 = vrot.lane.b32.xlu1 %v1477_v63, %s3852_s26 }
 0x1e0   : > { %v1726_v46 = vpop.permute.xlu0 %1725  ;;  %v5182_v57 = vpop.permute.xlu1 %1838 }
 0x1e1   : > { %v2195_v23 = vsel %vm5829_vm15, %v2163_v35, %v1726_v46  ;;  %v1704_v46 = vrot.slane %v1702_v25, 1  ;;  %vm5840_vm15 = vmmov %vm5831_vm14 }
 0x1e2   : > { %v2228_v3 = vsel %vm2220_vm11, %v2195_v23, %v5093_v33  ;;  %1586 = vrot.lane.b32.xlu0 %v1554_v32, %s3851_s21  ;;  %v1993_v33 = vsel %vm5831_vm14, %v1983_v40, %v5177_v7  ;;  %v2421_v32 = vrot.slane %v2419_v52, 1  ;;  %v2424_v23 = vrot.slane %v2422_v62, 2  ;;  %v1271_v52 = vld [vmem:[#allocation2 + $0x8c] sm:$0x7]  ;;  %vm5843_vm14 = vmmov %vm5841_vm0 }
 0x1e3   : > { %v2261_v56 = vsel %vm2253_vm1, %v2228_v3, %v5079_v49  ;;  %1631 = vrot.lane.b32.xlu1 %v1602_v16, %s3853_s8  ;;  %v1707_v3 = vrot.slane %v1705_v30, 2  ;;  %v3537_v40 = vcombine.low %v4945_v18, %v4947_v13  ;;  %v1485_v62 = vsel %vm5832_vm10, %v1480_v41, %v1484_v15  ;;  %vm5844_vm10 = vmmov %vm5837_vm7 }
 0x1e4   : > { %v2294_v63 = vsel %vm2286_vm2, %v2261_v56, %v2028_v17  ;;  %v5195_v35 = vpop.permute.xlu0 %1840  ;;  %v5199_v43 = vpop.permute.xlu1 %1615  ;;  %v5205_v16 = vor.u32 %v2424_v23, %v2421_v32  ;;  %v1486_v30 = vshrl.u32 %v5172_v9, 16  ;;  %v1995_v13 = vshrl.u32 %v4973_v6, 16 }
 0x1e5   : > { %v2393_v29 = vshrl.u32 %v2294_v63, 16  ;;  %v2396_v49 = vshll.u32 %v2294_v63, 16  ;;  %v5213_v36 = vor.u32 %v1707_v3, %v1704_v46  ;;  %v2099_v41 = vsel %vm5833_vm6, %v4379_v5, %v5105_v14  ;;  %vm5845_vm6 = vmmov %vm5837_vm7 }
 0x1e6   : > { %2045 = vrot.lane.b32.xlu0 %v1993_v33, %s3857_s22  ;;  %v1998_v33 = vshll.u32 %v4973_v6, 16  ;;  %v5231_v32 = vcombine.low %v4945_v18, %v1271_v52  ;;  %v2426_v12 = vsel %vm1640_vm9, %v5089_v61, %v5205_v16  ;;  %v1488_v5 = vor.u32 %v1486_v30, %v1484_v15 }
 0x1e7   : > { %v2395_v17 = vrot.slane %v2393_v29, 1  ;;  %v2398_v26 = vrot.slane %v2396_v49, 2  ;;  %1812 = vrot.lane.b32.xlu1 %v1783_v1, %s3854_s9  ;;  %v1700_v1 = vsel %vm1640_vm9, %v4932_v51, %v1699_v21  ;;  %v5242_v14 = vrot.slane %v3537_v40, 2 }
 0x1e8   : > { %v5203_v56 = vpop.permute.xlu0 %1617  ;;  %v5215_v53 = vpop.permute.xlu1 %1796  ;;  %v2132_v18 = vsel %vm2122_vm4, %v2099_v41, %v5117_v48  ;;  %v5247_v23 = vrot.slane %v3539_v59, 2  ;;  %v1997_v29 = vrot.slane %v1995_v13, 6  ;;  %v5835_v49 = vrot.slane %v4635_v42, 7 }
 0x1e9   : > { %v5210_v25 = vor.u32 %v2398_v26, %v2395_v17  ;;  %v5836_v61 = vrot.slane %v4614_v2, 7  ;;  %v2165_v3 = vsel %vm2155_vm8, %v2132_v18, %v5127_v58  ;;  %v1711_v15 = vshrl.u32 %v5231_v32, 16 }
 0x1ea   : > { %1517 = vrot.lane.b32.xlu0 %v1485_v62, %s3852_s26  ;;  %v1714_v48 = vshll.u32 %v5231_v32, 16  ;;  %v2197_v17 = vsel %vm5837_vm7, %v2165_v3, %v5163_v11  ;;  %v1603_v42 = vrot.slane %v5231_v32, 1  ;;  %v2004_v2 = vshrl.u32 %v4977_v54, 16 }
 0x1eb   : > { %v2400_v63 = vsel %vm1640_vm9, %v5091_v44, %v5210_v25  ;;  %1743 = vrot.lane.b32.xlu1 %v1700_v1, %s3856_s16  ;;  %v1709_v44 = vsel %vm1640_vm9, %v1699_v21, %v5213_v36  ;;  %v2067_v46 = vsel %vm5826_vm12, %v5836_v61, %v5835_v49  ;;  %v2000_v21 = vrot.slane %v1998_v33, 7  ;;  %vm5847_vm12 = vmmov %vm5841_vm0 }
 0x1ec   : > { %v5234_v51 = vpop.permute.xlu0 %1798  ;;  %2781 = vmatmul.mubr.bf16.gmra.mrb[8].mxu1 %v2400_v63  ;;  %v1569_v6 = vpop.permute.xlu1 %1568  ;;  %v2007_v40 = vshll.u32 %v4977_v54, 16  ;;  %v5838_v58 = vrot.slane %v5124_v50, 2  ;;  %v2436_v62 = vshrl.u32 %v2067_v46, 16  ;;  %v2439_v30 = vshll.u32 %v2067_v46, 16 }
 0x1ed   : > { %3570 = vmatprep.mubr.msk.bf16.mxu1 %vm5834_vm13, %v2426_v12  ;;  %v1829_v11 = vsel %vm1754_vm5, %v5242_v14, %v5247_v23  ;;  %v2230_v59 = vsel %vm2220_vm11, %v2197_v17, %v5138_v55  ;;  %v2001_v13 = vor.u32 %v2000_v21, %v1997_v29  ;;  %v1713_v41 = vrot.slane %v1711_v15, 1  ;;  %vm5846_vm13 = vmmov %vm5840_vm15 }
 0x1ee   : > { %1745 = vrot.lane.b32.xlu0 %v1709_v44, %s3856_s16  ;;  %v1785_v52 = vsel %vm1754_vm5, %v5838_v58, %v5242_v14  ;;  %v1716_v54 = vrot.slane %v1714_v48, 2  ;;  %v2263_v63 = vsel %vm2253_vm1, %v2230_v59, %v5182_v57  ;;  %v1604_v12 = vsel %vm5839_vm3, %v1601_v10, %v1603_v42  ;;  %vm5848_vm7 = vmmov %vm5846_vm13 }
 0x1ef   : > { %1519 = vrot.lane.b32.xlu1 %v1488_v5, %s3852_s26  ;;  %v2006_v5 = vrot.slane %v2004_v2, 6  ;;  %v2009_v44 = vrot.slane %v2007_v40, 7  ;;  %v2438_v55 = vrot.slane %v2436_v62, 1  ;;  %v2441_v29 = vrot.slane %v2439_v30, 2  ;;  %v5842_v40 = vld [vmem:[#allocation3_spill] sm:$0xff]  ;;  %vm5849_vm3 = vmmov %vm5841_vm0 }
 0x1f0   : > { %v5261_v26 = vpop.permute.xlu0 %1570  ;;  %v2032_v1 = vpop.permute.xlu1 %2031  ;;  %v3555_v49 = vcombine.low %v4939_v34, %v4939_v34  ;;  %v2002_v3 = vsel %vm5840_vm15, %v5177_v7, %v2001_v13  ;;  %v1717_v50 = vor.u32 %v1716_v54, %v1713_v41  ;;  %v2101_v58 = vsel %vm5843_vm14, %v5842_v40, %v5143_v47  ;;  %vm5850_vm15 = vmmov %vm5841_vm0 }
 0x1f1   : > { %v2010_v17 = vor.u32 %v2009_v44, %v2006_v5  ;;  %v2442_v2 = vor.u32 %v2441_v29, %v2438_v55  ;;  %v2134_v59 = vsel %vm2122_vm4, %v2101_v58, %v5153_v20  ;;  %vm5853_vm14 = vmmov %vm5841_vm0 }
 0x1f2   : > { %1856 = vrot.lane.b32.xlu0 %v1785_v52, %s3855_s15  ;;  %v2013_v34 = vshrl.u32 %v3555_v49, 16  ;;  %v1718_v41 = vsel %vm1640_vm9, %v5213_v36, %v1717_v50  ;;  %v2167_v47 = vsel %vm2155_vm8, %v2134_v59, %v5199_v43 }
 0x1f3   : > { %1858 = vrot.lane.b32.xlu1 %v1829_v11, %s3855_s15  ;;  %v2016_v11 = vshll.u32 %v3555_v49, 16  ;;  %v2443_v36 = vsel %vm1640_vm9, %v5205_v16, %v2442_v2 }
 0x1f4   : > { %v2030_v33 = vpop.permute.xlu0 %2029  ;;  %v1732_v61 = vpop.permute.xlu1 %1731 }
 0x1f5   : > { %v2296_v18 = vsel %vm2286_vm2, %v2263_v63, %v2030_v33 }
 0x1f6   : > { %v2410_v57 = vshrl.u32 %v2296_v18, 16  ;;  %v2413_v46 = vshll.u32 %v2296_v18, 16  ;;  %1633 = vrot.lane.b32.xlu0 %v1604_v12, %s3853_s8  ;;  %v2018_v12 = vrot.slane %v2016_v11, 7  ;;  %v5852_v11 = vld [vmem:[#allocation4_spill] sm:$0xff] }
 0x1f7   : > { %2047 = vrot.lane.b32.xlu1 %v2002_v3, %s3857_s22 }
 0x1f8   : > { %v2412_v21 = vrot.slane %v2410_v57, 1  ;;  %v2415_v10 = vrot.slane %v2413_v46, 2  ;;  %v1502_v15 = vpop.permute.xlu0 %1501  ;;  %v5296_v30 = vpop.permute.xlu1 %1503 }
 0x1f9   : > { %v2103_v48 = vsel %vm5841_vm0, %v4476_v0, %v1502_v15  ;;  %v2460_v15 = vsel %vm1640_vm9, %v2442_v2, %v5000_v37  ;;  %v2105_v37 = vsel %vm5853_vm14, %v5852_v11, %v5296_v30 }
 0x1fa   : > { %v2416_v62 = vor.u32 %v2415_v10, %v2412_v21  ;;  %v2136_v7 = vsel %vm2122_vm4, %v2103_v48, %v1569_v6  ;;  %1814 = vrot.lane.b32.xlu0 %v1785_v52, %s3854_s9 }
 0x1fb   : > { %v2169_v0 = vsel %vm2155_vm8, %v2136_v7, %v5203_v56  ;;  %1747 = vrot.lane.b32.xlu1 %v1718_v41, %s3856_s16  ;;  %v2011_v56 = vsel %vm5846_vm13, %v2001_v13, %v2010_v17  ;;  %v2138_v41 = vsel %vm2122_vm4, %v2105_v37, %v5261_v26  ;;  %vm5855_vm13 = vmmov %vm5841_vm0 }
 0x1fc   : > { %v2201_v54 = vsel %vm5844_vm10, %v2169_v0, %v1732_v61  ;;  %v1730_v6 = vpop.permute.xlu0 %1729  ;;  %v2417_v52 = vsel %vm1640_vm9, %v5210_v25, %v2416_v62  ;;  %v1843_v43 = vpop.permute.xlu1 %1842  ;;  %v2015_v25 = vrot.slane %v2013_v34, 6  ;;  %vm5854_vm10 = vmmov %vm5845_vm6 }
 0x1fd   : > { %v2234_v20 = vsel %vm2220_vm11, %v2201_v54, %v5234_v51  ;;  %v2199_v63 = vsel %vm5845_vm6, %v2167_v47, %v1730_v6  ;;  %2789 = vmatmul.mubr.bf16.gmra.mrb[12].mxu1 %v2417_v52 }
 0x1fe   : > { %v2232_v33 = vsel %vm2220_vm11, %v2199_v63, %v5215_v53  ;;  %2049 = vrot.lane.b32.xlu0 %v2011_v56, %s3857_s22  ;;  %3571 = vmatprep.mubr.msk.bf16.mxu1 %vm5847_vm12, %v2443_v36  ;;  %v2267_v5 = vsel %vm2253_vm1, %v2234_v20, %v1843_v43  ;;  %v2019_v29 = vor.u32 %v2018_v12, %v2015_v25  ;;  %vm5856_vm12 = vmmov %vm5841_vm0 }
 0x1ff   : > { %v2265_v51 = vsel %vm2253_vm1, %v2232_v33, %v5195_v35  ;;  %1635 = vrot.lane.b32.xlu1 %v1603_v42, %s3853_s8 }
 0x200   : > { %v2298_v13 = vsel %vm2286_vm2, %v2265_v51, %v2032_v1  ;;  %v2034_v16 = vpop.permute.xlu0 %2033  ;;  %v1620_v55 = vpop.permute.xlu1 %1619  ;;  %v2020_v21 = vsel %vm5848_vm7, %v2010_v17, %v2019_v29  ;;  %vm5858_vm7 = vmmov %vm5841_vm0 }
 0x201   : > { %v2300_v53 = vsel %vm2286_vm2, %v2267_v5, %v2034_v16  ;;  %v2427_v44 = vshrl.u32 %v2298_v13, 16  ;;  %v2430_v18 = vshll.u32 %v2298_v13, 16  ;;  %v2171_v54 = vsel %vm2155_vm8, %v2138_v41, %v1620_v55 }
 0x202   : > { %1749 = vrot.lane.b32.xlu0 %v1717_v50, %s3856_s16  ;;  %v2444_v49 = vshrl.u32 %v2300_v53, 16  ;;  %v2447_v61 = vshll.u32 %v2300_v53, 16 }
 0x203   : > { %v2429_v35 = vrot.slane %v2427_v44, 1  ;;  %v2432_v57 = vrot.slane %v2430_v18, 2  ;;  %1816 = vrot.lane.b32.xlu1 %v5242_v14, %s3854_s9 }
 0x204   : > { %v1845_v1 = vpop.permute.xlu0 %1844  ;;  %v1801_v32 = vpop.permute.xlu1 %1800  ;;  %v2446_v42 = vrot.slane %v2444_v49, 1  ;;  %v2449_v3 = vrot.slane %v2447_v61, 2 }
 0x205   : > { %v2433_v46 = vor.u32 %v2432_v57, %v2429_v35 }
 0x206   : > { %1860 = vrot.lane.b32.xlu0 %v5247_v23, %s3855_s15  ;;  %v2450_v48 = vor.u32 %v2449_v3, %v2446_v42  ;;  %s5565_s15 = scalar_lea.vmem %s5693_s7, %s3769_s11 }
 0x207   : > { %v2434_v50 = vsel %vm1640_vm9, %v2416_v62, %v2433_v46  ;;  %2051 = vrot.lane.b32.xlu1 %v2020_v21, %s3857_s22  ;;  %v5851_v62 = vld [vmem:[#allocation5_spill] sm:$0xff] }
 0x208   : > { %v1506_v10 = vpop.permute.xlu0 %1505  ;;  %2797 = vmatmul.mubr.bf16.gmra.mrb[16].mxu1 %v2434_v50  ;;  %v1573_v14 = vpop.permute.xlu1 %1572  ;;  %v2451_v23 = vsel %vm1640_vm9, %v2433_v46, %v2450_v48  ;;  %v5857_v50 = vld [vmem:[#allocation7_spill] sm:$0xff] }
 0x209   : > { %3572 = vmatprep.mubr.msk.bf16.mxu1 %vm5849_vm3, %v2460_v15  ;;  %v2107_v7 = vsel %vm5841_vm0, %v5851_v62, %v1506_v10  ;;  %v3838_v15 = vld [vmem:[%s5691_s5] sm:$0xff]   ;;  %vm3859_vm3 = vmmov 0  }
 0x20a   : > { %v2140_v59 = vsel %vm2122_vm4, %v2107_v7, %v1573_v14  ;;  %v3858_v14 = vmov 0.0  }
 0x20b   : > { %3709 = vmatprep.subr.bf16.mxu0 %v3858_v14  ;;  %3713 = vmatprep.mubr.msk.bf16.mxu0 %vm3859_vm3, %v3858_v14 }
 0x20c   : > { %v1622_v34 = vpop.permute.xlu0 %1621  ;;  %v1508_v40 = vpop.permute.xlu1 %1507  ;;  %3710 = vmatpush3.bf16.msra.mxu0 %v3838_v15  ;;  %3765 = vmatprep.subr.bf16.mxu1 %v3858_v14 }
 0x20d   : > { %v2173_v47 = vsel %vm2155_vm8, %v2140_v59, %v1622_v34  ;;  %3711 = vmatprep.subr.bf16.mxu0 %v3858_v14  ;;  %3767 = vmatpush3.bf16.msra.mxu1 %v3838_v15 }
 0x20e   : > { %3766 = vmatprep.subr.bf16.mxu1 %v3858_v14 }
 0x210   : > { %v1803_v58 = vpop.permute.xlu0 %1802  ;;  %2805 = vmatmul.mubr.bf16.gmra.mrb[20].mxu1 %v2451_v23  ;;  %v2036_v17 = vpop.permute.xlu1 %2035 }
 0x211   : > { %3573 = vmatprep.mubr.msk.bf16.mxu1 %vm5850_vm15, %v5008_v4  ;;  %vm5860_vm15 = vmmov %vm5841_vm0 }
 0x212   : > { %vm5861_vm0 = vmmov %vm5845_vm6 }
 0x213   : > { %vm5862_vm14 = vmmov %vm5861_vm0 }
 0x214   : > { %v1575_v2 = vpop.permute.xlu0 %1574  ;;  %v1736_v0 = vpop.permute.xlu1 %1735 }
 0x215   : > { %v2205_v4 = vsel %vm5854_vm10, %v2173_v47, %v1736_v0  ;;  %vm5863_vm10 = vmmov %vm5858_vm7 }
 0x216   : > { %v2238_v30 = vsel %vm2220_vm11, %v2205_v4, %v1803_v58 }
 0x218   : > { %v1734_v6 = vpop.permute.xlu0 %1733  ;;  %v1847_v20 = vpop.permute.xlu1 %1846 }
 0x219   : > { %v2203_v52 = vsel %vm5845_vm6, %v2171_v54, %v1734_v6  ;;  %v2271_v36 = vsel %vm2253_vm1, %v2238_v30, %v1847_v20  ;;  %vm5865_vm6 = vmmov %vm5858_vm7 }
 0x21a   : > { %v2236_v63 = vsel %vm2220_vm11, %v2203_v52, %v1801_v32 }
 0x21b   : > { %v2269_v56 = vsel %vm2253_vm1, %v2236_v63, %v1845_v1 }
 0x21c   : > { %v2302_v26 = vsel %vm2286_vm2, %v2269_v56, %v2036_v17  ;;  %v2038_v43 = vpop.permute.xlu0 %2037  ;;  %v1624_v51 = vpop.permute.xlu1 %1623 }
 0x21d   : > { %v2304_v33 = vsel %vm2286_vm2, %v2271_v36, %v2038_v43  ;;  %v2461_v25 = vshrl.u32 %v2302_v26, 16  ;;  %v2464_v12 = vshll.u32 %v2302_v26, 16 }
 0x21e   : > { %v2478_v5 = vshrl.u32 %v2304_v33, 16  ;;  %v2481_v13 = vshll.u32 %v2304_v33, 16 }
 0x21f   : > { %v2463_v16 = vrot.slane %v2461_v25, 1  ;;  %v2466_v53 = vrot.slane %v2464_v12, 2 }
 0x220   : > { %v1849_v44 = vpop.permute.xlu0 %1848  ;;  %v1805_v55 = vpop.permute.xlu1 %1804  ;;  %v2480_v29 = vrot.slane %v2478_v5, 1  ;;  %v2483_v49 = vrot.slane %v2481_v13, 2 }
 0x221   : > { %v2467_v18 = vor.u32 %v2466_v53, %v2463_v16  ;;  %v5864_v53 = vld [vmem:[#allocation8_spill] sm:$0xff] }
 0x222   : > { %v2484_v1 = vor.u32 %v2483_v49, %v2480_v29 }
 0x223   : > { %v2468_v61 = vsel %vm1640_vm9, %v2450_v48, %v2467_v18  ;;  %v5859_v48 = vld [vmem:[#allocation6_spill] sm:$0xff] }
 0x224   : > { %v1510_v35 = vpop.permute.xlu0 %1509  ;;  %2813 = vmatmul.mubr.bf16.gmra.mrb[24].mxu1 %v2468_v61  ;;  %v1577_v57 = vpop.permute.xlu1 %1576  ;;  %v2485_v42 = vsel %vm1640_vm9, %v2467_v18, %v2484_v1  ;;  %v2109_v34 = vsel %vm5860_vm15, %v5859_v48, %v1508_v40  ;;  %vm5870_vm15 = vmmov %vm5865_vm6 }
 0x225   : > { %3574 = vmatprep.mubr.msk.bf16.mxu1 %vm5855_vm13, %v5015_v45  ;;  %v2111_v10 = vsel %vm5858_vm7, %v5857_v50, %v1510_v35  ;;  %v2142_v17 = vsel %vm2122_vm4, %v2109_v34, %v1575_v2  ;;  %vm5866_vm13 = vmmov %vm5861_vm0 }
 0x226   : > { %v2144_v23 = vsel %vm2122_vm4, %v2111_v10, %v1577_v57  ;;  %v2175_v7 = vsel %vm2155_vm8, %v2142_v17, %v1624_v51  ;;  %vm5868_vm7 = vmmov %vm5865_vm6 }
 0x228   : > { %v1626_v46 = vpop.permute.xlu0 %1625  ;;  %v1512_v32 = vpop.permute.xlu1 %1511 }
 0x229   : > { %v2177_v62 = vsel %vm2155_vm8, %v2144_v23, %v1626_v46 }
 0x22c   : > { %v1807_v3 = vpop.permute.xlu0 %1806  ;;  %2821 = vmatmul.mubr.bf16.gmra.mrb[28].mxu1 %v2485_v42  ;;  %v2040_v21 = vpop.permute.xlu1 %2039 }
 0x22d   : > { %3575 = vmatprep.mubr.msk.bf16.mxu1 %vm5856_vm12, %v5024_v22  ;;  %v3839_v22 = vld [vmem:[%s5691_s5 + $0x8] sm:$0xff]   ;;  %vm5867_vm12 = vmmov %vm5865_vm6 }
 0x22e   : > { %3712 = vmatpush3.bf16.msra.mxu0 %v3839_v22  ;;  %3768 = vmatpush3.bf16.msra.mxu1 %v3839_v22 }
 0x230   : > { %v1579_v45 = vpop.permute.xlu0 %1578  ;;  %v1740_v58 = vpop.permute.xlu1 %1739 }
 0x231   : > { %v2209_v11 = vsel %vm5861_vm0, %v2177_v62, %v1740_v58 }
 0x232   : > { %v2242_v41 = vsel %vm2220_vm11, %v2209_v11, %v1807_v3 }
 0x234   : > { %v1738_v37 = vpop.permute.xlu0 %1737  ;;  %v1851_v40 = vpop.permute.xlu1 %1850 }
 0x235   : > { %v2207_v59 = vsel %vm5862_vm14, %v2175_v7, %v1738_v37  ;;  %v2275_v47 = vsel %vm2253_vm1, %v2242_v41, %v1851_v40  ;;  %v5869_v7 = vld [vmem:[#allocation9_spill] sm:$0xff]  ;;  %vm5871_vm14 = vmmov %vm5865_vm6 }
 0x236   : > { %v2240_v0 = vsel %vm2220_vm11, %v2207_v59, %v1805_v55 }
 0x237   : > { %v2273_v2 = vsel %vm2253_vm1, %v2240_v0, %v1849_v44  ;;  %v2113_v44 = vsel %vm5865_vm6, %v5864_v53, %v1512_v32 }
 0x238   : > { %v2306_v54 = vsel %vm2286_vm2, %v2273_v2, %v2040_v21  ;;  %v2042_v4 = vpop.permute.xlu0 %2041  ;;  %v1628_v63 = vpop.permute.xlu1 %1627  ;;  %v2146_v55 = vsel %vm2122_vm4, %v2113_v44, %v1579_v45 }
 0x239   : > { %v2308_v6 = vsel %vm2286_vm2, %v2275_v47, %v2042_v4  ;;  %v2495_v52 = vshrl.u32 %v2306_v54, 16  ;;  %v2498_v20 = vshll.u32 %v2306_v54, 16  ;;  %v2179_v49 = vsel %vm2155_vm8, %v2146_v55, %v1628_v63 }
 0x23a   : > { %v2512_v30 = vshrl.u32 %v2308_v6, 16  ;;  %v2515_v56 = vshll.u32 %v2308_v6, 16 }
 0x23b   : > { %v2497_v36 = vrot.slane %v2495_v52, 1  ;;  %v2500_v26 = vrot.slane %v2498_v20, 2 }
 0x23c   : > { %v1514_v43 = vpop.permute.xlu0 %1513  ;;  %v1809_v25 = vpop.permute.xlu1 %1808  ;;  %v2514_v12 = vrot.slane %v2512_v30, 1  ;;  %v2517_v51 = vrot.slane %v2515_v56, 2 }
 0x23d   : > { %v2501_v33 = vor.u32 %v2500_v26, %v2497_v36  ;;  %v2115_v11 = vsel %vm5870_vm15, %v5869_v7, %v1514_v43  ;;  %vm5876_vm15 = vmmov %vm5865_vm6 }
 0x23e   : > { %v2518_v18 = vor.u32 %v2517_v51, %v2514_v12 }
 0x23f   : > { %v2502_v5 = vsel %vm1640_vm9, %v2484_v1, %v2501_v33 }
 0x240   : > { %v1742_v13 = vpop.permute.xlu0 %1741  ;;  %2829 = vmatmul.mubr.bf16.gmra.mrb[32].mxu1 %v2502_v5  ;;  %v1581_v16 = vpop.permute.xlu1 %1580  ;;  %v2519_v57 = vsel %vm1640_vm9, %v2501_v33, %v2518_v18 }
 0x241   : > { %3576 = vmatprep.mubr.msk.bf16.mxu1 %vm5863_vm10, %v5050_v39  ;;  %v2211_v61 = vsel %vm5866_vm13, %v2179_v49, %v1742_v13  ;;  %v2148_v59 = vsel %vm2122_vm4, %v2115_v11, %v1581_v16  ;;  %vm5872_vm10 = vmmov %vm5861_vm0 }
 0x242   : > { %v2244_v46 = vsel %vm2220_vm11, %v2211_v61, %v1809_v25  ;;  %vm5873_vm13 = vmmov %vm5865_vm6 }
 0x244   : > { %v1853_v29 = vpop.permute.xlu0 %1852 }
 0x245   : > { %v1585_v35 = vpop.permute.xlu1 %1584  ;;  %v2277_v39 = vsel %vm2253_vm1, %v2244_v46, %v1853_v29 }
 0x248   : > { %v1630_v1 = vpop.permute.xlu0 %1629  ;;  %2837 = vmatmul.mubr.bf16.gmra.mrb[36].mxu1 %v2519_v57 }
 0x249   : > { %3577 = vmatprep.mubr.msk.bf16.mxu1 %vm5867_vm12, %v5060_v19  ;;  %v2044_v32 = vpop.permute.xlu1 %2043  ;;  %v2181_v40 = vsel %vm2155_vm8, %v2148_v59, %v1630_v1  ;;  %vm5874_vm12 = vmmov %vm5861_vm0 }
 0x24a   : > { %v2310_v42 = vsel %vm2286_vm2, %v2277_v39, %v2044_v32 }
 0x24b   : > { %v2529_v3 = vshrl.u32 %v2310_v42, 16  ;;  %v2532_v21 = vshll.u32 %v2310_v42, 16 }
 0x24c   : > { %v1811_v50 = vpop.permute.xlu0 %1810 }
 0x24d   : > { %v2531_v10 = vrot.slane %v2529_v3, 1  ;;  %v2534_v15 = vrot.slane %v2532_v21, 2  ;;  %v1855_v45 = vpop.permute.xlu1 %1854 }
 0x24f   : > { %v2535_v22 = vor.u32 %v2534_v15, %v2531_v10 }
 0x250   : > { %v1583_v48 = vpop.permute.xlu0 %1582 }
 0x251   : > { %v1516_v34 = vpop.permute.xlu1 %1515  ;;  %v2536_v23 = vsel %vm1640_vm9, %v2518_v18, %v2535_v22 }
 0x252   : > { %2845 = vmatmul.mubr.bf16.gmra.mrb[40].mxu1 %v2536_v23 }
 0x253   : > { %3578 = vmatprep.mubr.msk.bf16.mxu1 %vm5868_vm7, %v5066_v24  ;;  %v2117_v24 = vsel %vm5871_vm14, %v4831_v60, %v1516_v34  ;;  %vm5875_vm7 = vmmov %vm5865_vm6  ;;  %vm2948_vm14 = vcmask 1041408  }
 0x254   : > { %v1587_v19 = vpop.permute.xlu0 %1586  ;;  %v2150_v63 = vsel %vm2122_vm4, %v2117_v24, %v1583_v48 }
 0x255   : > { %v1632_v58 = vpop.permute.xlu1 %1631 }
 0x256   : > { %v2183_v56 = vsel %vm2155_vm8, %v2150_v63, %v1632_v58 }
 0x258   : > { %v2046_v17 = vpop.permute.xlu0 %2045 }
 0x259   : > { %v1813_v62 = vpop.permute.xlu1 %1812 }
 0x25c   : > { %v1518_v37 = vpop.permute.xlu0 %1517 }
 0x25d   : > { %v1744_v0 = vpop.permute.xlu1 %1743  ;;  %v2119_v5 = vsel %vm5865_vm6, %v4915_v31, %v1518_v37 }
 0x25e   : > { %v2213_v41 = vsel %vm5861_vm0, %v2181_v40, %v1744_v0  ;;  %v2152_v29 = vsel %vm2122_vm4, %v2119_v5, %v1585_v35 }
 0x25f   : > { %v2246_v2 = vsel %vm2220_vm11, %v2213_v41, %v1811_v50 }
 0x260   : > { %v1746_v47 = vpop.permute.xlu0 %1745  ;;  %v2279_v54 = vsel %vm2253_vm1, %v2246_v2, %v1855_v45 }
 0x261   : > { %v2312_v4 = vsel %vm2286_vm2, %v2279_v54, %v2046_v17  ;;  %v1520_v6 = vpop.permute.xlu1 %1519  ;;  %v2215_v43 = vsel %vm5872_vm10, %v2183_v56, %v1746_v47  ;;  %v5462_v47 = vld [vmem:[%s5690_s4] ss:$0 sm:$0xff]  ;;  %vm2996_vm10 = vcmask 1042432  }
 0x262   : > { %v2546_v52 = vshrl.u32 %v2312_v4, 16  ;;  %v2549_v20 = vshll.u32 %v2312_v4, 16  ;;  %v2248_v60 = vsel %vm2220_vm11, %v2215_v43, %v1813_v62  ;;  %v2121_v46 = vsel %vm5875_vm7, %v5172_v9, %v1520_v6  ;;  %vm5885_vm7 = vmmov %vm5861_vm0 }
 0x263   : > { %v2154_v50 = vsel %vm2122_vm4, %v2121_v46, %v1587_v19 }
 0x264   : > { %v1857_v30 = vpop.permute.xlu0 %1856  ;;  %v2548_v36 = vrot.slane %v2546_v52, 1  ;;  %v2551_v26 = vrot.slane %v2549_v20, 2 }
 0x265   : > { %v1859_v33 = vpop.permute.xlu1 %1858  ;;  %v2281_v13 = vsel %vm2253_vm1, %v2248_v60, %v1857_v30 }
 0x266   : > { %v2552_v25 = vor.u32 %v2551_v26, %v2548_v36 }
 0x268   : > { %v1634_v12 = vpop.permute.xlu0 %1633  ;;  %v2553_v51 = vsel %vm1640_vm9, %v2535_v22, %v2552_v25 }
 0x269   : > { %v2048_v16 = vpop.permute.xlu1 %2047  ;;  %2853 = vmatmul.mubr.bf16.gmra.mrb[44].mxu1 %v2553_v51  ;;  %v2185_v57 = vsel %vm2155_vm8, %v2152_v29, %v1634_v12 }
 0x26a   : > { %v2314_v53 = vsel %vm2286_vm2, %v2281_v13, %v2048_v16  ;;  %3579 = vmatprep.mubr.msk.bf16.mxu1 %vm5873_vm13, %v5082_v8 }
 0x26b   : > { %v2563_v44 = vshrl.u32 %v2314_v53, 16  ;;  %v2566_v18 = vshll.u32 %v2314_v53, 16 }
 0x26c   : > { %v1815_v55 = vpop.permute.xlu0 %1814 }
 0x26d   : > { %v2565_v49 = vrot.slane %v2563_v44, 1  ;;  %v2568_v61 = vrot.slane %v2566_v18, 2  ;;  %v1748_v1 = vpop.permute.xlu1 %1747 }
 0x26e   : > { %v2217_v31 = vsel %vm5874_vm12, %v2185_v57, %v1748_v1  ;;  %vm5884_vm12 = vmmov %vm5861_vm0 }
 0x26f   : > { %v2569_v39 = vor.u32 %v2568_v61, %v2565_v49  ;;  %v2250_v32 = vsel %vm2220_vm11, %v2217_v31, %v1815_v55 }
 0x270   : > { %v2050_v42 = vpop.permute.xlu0 %2049  ;;  %v2283_v8 = vsel %vm2253_vm1, %v2250_v32, %v1859_v33 }
 0x271   : > { %v1636_v3 = vpop.permute.xlu1 %1635  ;;  %v2316_v21 = vsel %vm2286_vm2, %v2283_v8, %v2050_v42  ;;  %v2570_v35 = vsel %vm1640_vm9, %v2552_v25, %v2569_v39 }
 0x272   : > { %v2580_v10 = vshrl.u32 %v2316_v21, 16  ;;  %v2583_v15 = vshll.u32 %v2316_v21, 16  ;;  %2861 = vmatmul.mubr.bf16.gmra.mrb[48].mxu1 %v2570_v35  ;;  %v2187_v45 = vsel %vm2155_vm8, %v2154_v50, %v1636_v3  ;;  %vm5877_vm8 = vmmov %vm5865_vm6 }
 0x273   : > { %3580 = vmatprep.mubr.msk.bf16.mxu1 %vm5876_vm15, %v5097_v27  ;;  %vm5886_vm15 = vmmov %vm5861_vm0 }
 0x274   : > { %v1750_v9 = vpop.permute.xlu0 %1749  ;;  %v2582_v22 = vrot.slane %v2580_v10, 1  ;;  %v2585_v48 = vrot.slane %v2583_v15, 2 }
 0x275   : > { %v2219_v34 = vsel %vm5861_vm0, %v2187_v45, %v1750_v9  ;;  %v1817_v23 = vpop.permute.xlu1 %1816 }
 0x276   : > { %v2586_v58 = vor.u32 %v2585_v48, %v2582_v22  ;;  %v2252_v17 = vsel %vm2220_vm11, %v2219_v34, %v1817_v23  ;;  %vm5878_vm11 = vmmov %vm5865_vm6  ;;  %vm5880_vm6 = vcmask 1040384  }
 0x278   : > { %v1861_v62 = vpop.permute.xlu0 %1860  ;;  %v2587_v7 = vsel %vm1640_vm9, %v2569_v39, %v2586_v58 }
 0x279   : > { %v2285_v19 = vsel %vm2253_vm1, %v2252_v17, %v1861_v62  ;;  %v2052_v11 = vpop.permute.xlu1 %2051  ;;  %vm2943_vm1 = vcmask 1043456  }
 0x27a   : > { %v2318_v37 = vsel %vm2286_vm2, %v2285_v19, %v2052_v11  ;;  %2869 = vmatmul.mubr.bf16.gmra.mrb[52].mxu1 %v2587_v7  ;;  %vm2988_vm2 = vcmask 1044480  }
 0x27b   : > { %v2597_v59 = vshrl.u32 %v2318_v37, 16  ;;  %v2600_v27 = vshll.u32 %v2318_v37, 16  ;;  %3581 = vmatprep.mubr.msk.bf16.mxu1 %vm5877_vm8, %v5101_v38  ;;  %vm5887_vm8 = vmmov %vm5861_vm0 }
 0x27d   : > { %v2599_v40 = vrot.slane %v2597_v59, 1  ;;  %v2602_v0 = vrot.slane %v2600_v27, 2 }
 0x27f   : > { %v2603_v41 = vor.u32 %v2602_v0, %v2599_v40 }
 0x281   : > { %v2604_v2 = vsel %vm1640_vm9, %v2586_v58, %v2603_v41  ;;  %vm5879_vm9 = vcmask 1046528  }
 0x282   : > { %2877 = vmatmul.mubr.bf16.gmra.mrb[56].mxu1 %v2604_v2  ;;  %vm5881_vm13 = vmmov %vm5879_vm9 }
 0x283   : > { %3582 = vmatprep.mubr.msk.bf16.mxu1 %vm5878_vm11, %v5075_v28  ;;  %vm5888_vm11 = vmmov %vm5861_vm0 }
 0x28a   : > { %2885 = vmatmul.mubr.bf16.gmra.mrb[60].mxu1 %v2603_v41 }
 0x28b   : > { %3761 = vmatprep.mubr.msk.bf16.mxu1 %vm3859_vm3, %v3858_v14 }
 0x294   : > { %v2766_v24 = vpop.f32.mrb[0].mxu1 }
 0x295   : > { %v2767_v38 = vadd.f32 %v5462_v47, %v2766_v24  ;;  %v2768_v54 = vpop.f32.mrb[1].mxu1 }
 0x296   : > { %v2769_v4 = vpop.f32.mrb[2].mxu1 }
 0x297   : > { %v2770_v6 = vadd.f32 %v5462_v47, %v2769_v4  ;;  %v2771_v52 = vpop.f32.mrb[3].mxu1  ;;  %v2892_v20 = vmax.f32 %v2767_v38, 0.0 }
 0x299   : > { %v2893_v63 = vmax.f32 %v2770_v6, 0.0 }
 0x29b   : > { %v2923_v28 = vpack.c.bf16 %v2893_v63, %v2892_v20 }
 0x2a4   : > { %v2774_v30 = vpop.f32.mrb[4].mxu1 }
 0x2a5   : > { %v2775_v56 = vadd.f32 %v5462_v47, %v2774_v30  ;;  %v2776_v36 = vpop.f32.mrb[5].mxu1 }
 0x2a6   : > { %v2777_v26 = vpop.f32.mrb[6].mxu1 }
 0x2a7   : > { %v2778_v43 = vadd.f32 %v5462_v47, %v2777_v26  ;;  %v2779_v33 = vpop.f32.mrb[7].mxu1  ;;  %v2894_v25 = vmax.f32 %v2775_v56, 0.0 }
 0x2a9   : > { %v2895_v12 = vmax.f32 %v2778_v43, 0.0 }
 0x2ab   : > { %v2924_v60 = vpack.c.bf16 %v2895_v12, %v2894_v25 }
 0x2ad   : > { %v2940_v51 = vrot.slane %v2924_v60, 2 }
 0x2af   : > { %v2984_v5 = vsel %vm5879_vm9, %v2923_v28, %v2940_v51  ;;  %vm5889_vm9 = vmmov %vm5861_vm0 }
 0x2b0   : > { %3714 = vmatmul.mubr.msk.bf16.vlgmr.msra.gmra.mrb[32].mxu0 %vm2122_vm4, %v2984_v5 }
 0x2b1   : > { %3717 = vmatprep.mubr.msk.bf16.mxu0 %vm3859_vm3, %v3858_v14 }
 0x2bf   : > { %v2782_v13 = vpop.f32.mrb[8].mxu1 }
 0x2c0   : > { %v2783_v16 = vadd.f32 %v5462_v47, %v2782_v13  ;;  %v2784_v53 = vpop.f32.mrb[9].mxu1 }
 0x2c1   : > { %v2785_v44 = vpop.f32.mrb[10].mxu1 }
 0x2c2   : > { %v2786_v18 = vadd.f32 %v5462_v47, %v2785_v44  ;;  %v2787_v55 = vpop.f32.mrb[11].mxu1  ;;  %v2896_v29 = vmax.f32 %v2783_v16, 0.0 }
 0x2c4   : > { %v2897_v49 = vmax.f32 %v2786_v18, 0.0 }
 0x2c6   : > { %v2925_v61 = vpack.c.bf16 %v2897_v49, %v2896_v29 }
 0x2c8   : > { %v2944_v57 = vrot.slane %v2925_v61, 4 }
 0x2ca   : > { %v2987_v1 = vsel %vm1754_vm5, %v2940_v51, %v2944_v57 }
 0x2cb   : > { %3718 = vmatmul.mubr.msk.bf16.gmra.mrb[36].mxu0 %vm2122_vm4, %v2987_v1 }
 0x2cc   : > { %3721 = vmatprep.mubr.msk.bf16.mxu0 %vm3859_vm3, %v3858_v14 }
 0x2d0   : > { %v2790_v31 = vpop.f32.mrb[12].mxu1 }
 0x2d1   : > { %v2791_v46 = vadd.f32 %v5462_v47, %v2790_v31  ;;  %v2792_v39 = vpop.f32.mrb[13].mxu1 }
 0x2d2   : > { %v2793_v32 = vpop.f32.mrb[14].mxu1 }
 0x2d3   : > { %v2794_v42 = vadd.f32 %v5462_v47, %v2793_v32  ;;  %v2795_v8 = vpop.f32.mrb[15].mxu1  ;;  %v2898_v3 = vmax.f32 %v2791_v46, 0.0 }
 0x2d5   : > { %v2899_v21 = vmax.f32 %v2794_v42, 0.0 }
 0x2d7   : > { %v2926_v35 = vpack.c.bf16 %v2899_v21, %v2898_v3 }
 0x2d9   : > { %v2945_v50 = vrot.slane %v2926_v35, 4  ;;  %v2949_v10 = vrot.slane %v2926_v35, 6 }
 0x2db   : > { %v2798_v15 = vpop.f32.mrb[16].mxu1  ;;  %v2946_v45 = vsel %vm2943_vm1, %v2944_v57, %v2945_v50 }
 0x2dc   : > { %v2799_v9 = vadd.f32 %v5462_v47, %v2798_v15  ;;  %v2800_v22 = vpop.f32.mrb[17].mxu1  ;;  %v2991_v48 = vsel %vm2988_vm2, %v2946_v45, %v2949_v10 }
 0x2dd   : > { %v2801_v34 = vpop.f32.mrb[18].mxu1  ;;  %3722 = vmatmul.mubr.msk.bf16.gmra.mrb[40].mxu0 %vm2122_vm4, %v2991_v48 }
 0x2de   : > { %v2802_v23 = vadd.f32 %v5462_v47, %v2801_v34  ;;  %v2803_v58 = vpop.f32.mrb[19].mxu1  ;;  %3725 = vmatprep.mubr.msk.bf16.mxu0 %vm3859_vm3, %v3858_v14  ;;  %v2900_v17 = vmax.f32 %v2799_v9, 0.0 }
 0x2e0   : > { %v2901_v62 = vmax.f32 %v2802_v23, 0.0 }
 0x2e2   : > { %v2927_v19 = vpack.c.bf16 %v2901_v62, %v2900_v17 }
 0x2e3   : > { %v2806_v7 = vpop.f32.mrb[20].mxu1 }
 0x2e4   : > { %v2950_v11 = vrot.slane %v2927_v19, 6  ;;  %v2807_v37 = vadd.f32 %v5462_v47, %v2806_v7  ;;  %v2808_v59 = vpop.f32.mrb[21].mxu1 }
 0x2e5   : > { %v2809_v27 = vpop.f32.mrb[22].mxu1 }
 0x2e6   : > { %v2810_v40 = vadd.f32 %v5462_v47, %v2809_v27  ;;  %v2811_v0 = vpop.f32.mrb[23].mxu1  ;;  %v2951_v41 = vsel %vm2948_vm14, %v2949_v10, %v2950_v11  ;;  %v2902_v24 = vmax.f32 %v2807_v37, 0.0 }
 0x2e7   : > { %v2995_v2 = vsel %vm2943_vm1, %v2951_v41, %v2927_v19 }
 0x2e8   : > { %v2903_v38 = vmax.f32 %v2810_v40, 0.0  ;;  %3726 = vmatmul.mubr.msk.bf16.gmra.mrb[44].mxu0 %vm2122_vm4, %v2995_v2 }
 0x2e9   : > { %3729 = vmatprep.mubr.msk.bf16.mxu0 %vm3859_vm3, %v3858_v14 }
 0x2ea   : > { %v2928_v54 = vpack.c.bf16 %v2903_v38, %v2902_v24 }
 0x2ec   : > { %v2954_v43 = vrot.slane %v2928_v54, 2 }
 0x2f7   : > { %v2814_v4 = vpop.f32.mrb[24].mxu1 }
 0x2f8   : > { %v2815_v6 = vadd.f32 %v5462_v47, %v2814_v4  ;;  %v2816_v52 = vpop.f32.mrb[25].mxu1 }
 0x2f9   : > { %v2817_v20 = vpop.f32.mrb[26].mxu1 }
 0x2fa   : > { %v2818_v63 = vadd.f32 %v5462_v47, %v2817_v20  ;;  %v2819_v28 = vpop.f32.mrb[27].mxu1  ;;  %v2904_v30 = vmax.f32 %v2815_v6, 0.0 }
 0x2fc   : > { %v2905_v56 = vmax.f32 %v2818_v63, 0.0 }
 0x2fe   : > { %v2929_v36 = vpack.c.bf16 %v2905_v56, %v2904_v30 }
 0x2ff   : > { %v2822_v26 = vpop.f32.mrb[28].mxu1 }
 0x300   : > { %v2955_v33 = vrot.slane %v2929_v36, 2  ;;  %v2823_v25 = vadd.f32 %v5462_v47, %v2822_v26  ;;  %v2824_v12 = vpop.f32.mrb[29].mxu1  ;;  %v2958_v55 = vrot.slane %v2929_v36, 4 }
 0x301   : > { %v2825_v60 = vpop.f32.mrb[30].mxu1 }
 0x302   : > { %v2826_v51 = vadd.f32 %v5462_v47, %v2825_v60  ;;  %v2827_v5 = vpop.f32.mrb[31].mxu1  ;;  %v2956_v13 = vsel %vm1754_vm5, %v2954_v43, %v2955_v33  ;;  %v2906_v53 = vmax.f32 %v2823_v25, 0.0 }
 0x303   : > { %v2999_v16 = vsel %vm2996_vm10, %v2928_v54, %v2956_v13 }
 0x304   : > { %v2907_v44 = vmax.f32 %v2826_v51, 0.0  ;;  %3730 = vmatmul.mubr.msk.bf16.gmra.mrb[48].mxu0 %vm2122_vm4, %v2999_v16 }
 0x305   : > { %3733 = vmatprep.mubr.msk.bf16.mxu0 %vm3859_vm3, %v3858_v14 }
 0x306   : > { %v2930_v18 = vpack.c.bf16 %v2907_v44, %v2906_v53 }
 0x308   : > { %v2959_v29 = vrot.slane %v2930_v18, 4  ;;  %v2962_v35 = vrot.slane %v2930_v18, 6 }
 0x30a   : > { %v2960_v49 = vsel %vm2943_vm1, %v2958_v55, %v2959_v29 }
 0x30b   : > { %v3003_v61 = vsel %vm2948_vm14, %v2955_v33, %v2960_v49 }
 0x30c   : > { %3734 = vmatmul.mubr.msk.bf16.gmra.mrb[52].mxu0 %vm2122_vm4, %v3003_v61 }
 0x30d   : > { %3737 = vmatprep.mubr.msk.bf16.mxu0 %vm3859_vm3, %v3858_v14 }
 0x313   : > { %v2830_v57 = vpop.f32.mrb[32].mxu1 }
 0x314   : > { %v2831_v1 = vadd.f32 %v5462_v47, %v2830_v57  ;;  %v2832_v31 = vpop.f32.mrb[33].mxu1 }
 0x315   : > { %v2833_v46 = vpop.f32.mrb[34].mxu1 }
 0x316   : > { %v2834_v39 = vadd.f32 %v5462_v47, %v2833_v46  ;;  %v2835_v32 = vpop.f32.mrb[35].mxu1  ;;  %v2908_v42 = vmax.f32 %v2831_v1, 0.0 }
 0x318   : > { %v2909_v8 = vmax.f32 %v2834_v39, 0.0 }
 0x31a   : > { %v2931_v3 = vpack.c.bf16 %v2909_v8, %v2908_v42 }
 0x31b   : > { %v2838_v21 = vpop.f32.mrb[36].mxu1 }
 0x31c   : > { %v2963_v50 = vrot.slane %v2931_v3, 6  ;;  %v2839_v10 = vadd.f32 %v5462_v47, %v2838_v21  ;;  %v2840_v15 = vpop.f32.mrb[37].mxu1 }
 0x31d   : > { %v2841_v45 = vpop.f32.mrb[38].mxu1 }
 0x31e   : > { %v2842_v9 = vadd.f32 %v5462_v47, %v2841_v45  ;;  %v2843_v22 = vpop.f32.mrb[39].mxu1  ;;  %v2964_v48 = vsel %vm2948_vm14, %v2962_v35, %v2963_v50  ;;  %v2910_v23 = vmax.f32 %v2839_v10, 0.0 }
 0x31f   : > { %v3007_v34 = vsel %vm5880_vm6, %v2959_v29, %v2964_v48  ;;  %vm5892_vm6 = vmmov %vm5861_vm0 }
 0x320   : > { %v2911_v58 = vmax.f32 %v2842_v9, 0.0  ;;  %3738 = vmatmul.mubr.msk.bf16.gmra.mrb[56].mxu0 %vm2122_vm4, %v3007_v34 }
 0x321   : > { %3741 = vmatprep.mubr.msk.bf16.mxu0 %vm3859_vm3, %v3858_v14 }
 0x322   : > { %v2932_v17 = vpack.c.bf16 %v2911_v58, %v2910_v23 }
 0x325   : > { %v2846_v62 = vpop.f32.mrb[40].mxu1 }
 0x326   : > { %v2847_v19 = vadd.f32 %v5462_v47, %v2846_v62  ;;  %v2848_v7 = vpop.f32.mrb[41].mxu1 }
 0x327   : > { %v2849_v11 = vpop.f32.mrb[42].mxu1 }
 0x328   : > { %v2850_v37 = vadd.f32 %v5462_v47, %v2849_v11  ;;  %v2851_v59 = vpop.f32.mrb[43].mxu1  ;;  %v2912_v27 = vmax.f32 %v2847_v19, 0.0 }
 0x32a   : > { %v2913_v40 = vmax.f32 %v2850_v37, 0.0  ;;  %v3024_v37 = vld [vmem:[%s3923_s12 + $0x21] sm:$0xff] }
 0x32b   : > { %v3052_v59 = vrot.slane %v3024_v37, 2 }
 0x32c   : > { %v2933_v0 = vpack.c.bf16 %v2913_v40, %v2912_v27  ;;  %v3023_v27 = vld [vmem:[%s3923_s12 + $0x19] sm:$0x3f]  ;;  %v3022_v40 = vld [vmem:[%s3923_s12 + $0x11] sm:$0xff] }
 0x32e   : > { %v2966_v41 = vrot.slane %v2933_v0, 2 }
 0x330   : > { %v3010_v2 = vsel %vm5881_vm13, %v2932_v17, %v2966_v41  ;;  %vm5893_vm13 = vmmov %vm5861_vm0 }
 0x331   : > { %3742 = vmatmul.mubr.msk.bf16.gmra.mrb[60].mxu0 %vm2122_vm4, %v3010_v2 }
 0x332   : > { %3745 = vmatprep.mubr.msk.bf16.mxu0 %vm3859_vm3, %v3858_v14 }
 0x33c   : > { %v2854_v24 = vpop.f32.mrb[44].mxu1 }
 0x33d   : > { %v2855_v38 = vadd.f32 %v5462_v47, %v2854_v24  ;;  %v2856_v54 = vpop.f32.mrb[45].mxu1  ;;  %v3127_v24 = vsel %vm1754_vm5, %v3023_v27, %v3052_v59 }
 0x33e   : > { %v2857_v4 = vpop.f32.mrb[46].mxu1 }
 0x33f   : > { %v2858_v6 = vadd.f32 %v5462_v47, %v2857_v4  ;;  %v2859_v52 = vpop.f32.mrb[47].mxu1  ;;  %v2914_v20 = vmax.f32 %v2855_v38, 0.0 }
 0x341   : > { %v2915_v63 = vmax.f32 %v2858_v6, 0.0 }
 0x343   : > { %v2934_v28 = vpack.c.bf16 %v2915_v63, %v2914_v20 }
 0x345   : > { %v2969_v30 = vrot.slane %v2934_v28, 4  ;;  %v2862_v56 = vpop.f32.mrb[48].mxu1  ;;  %v3025_v28 = vld [vmem:[%s3923_s12 + $0x29] sm:$0x3f] }
 0x346   : > { %v2863_v36 = vadd.f32 %v5462_v47, %v2862_v56  ;;  %v2864_v26 = vpop.f32.mrb[49].mxu1  ;;  %v3053_v56 = vrot.slane %v3025_v28, 2 }
 0x347   : > { %v2865_v43 = vpop.f32.mrb[50].mxu1  ;;  %v3012_v33 = vsel %vm1754_vm5, %v2966_v41, %v2969_v30 }
 0x348   : > { %v2866_v25 = vadd.f32 %v5462_v47, %v2865_v43  ;;  %v2867_v12 = vpop.f32.mrb[51].mxu1  ;;  %3746 = vmatmul.mubr.msk.bf16.gmra.mrb[64].mxu0 %vm2122_vm4, %v3012_v33  ;;  %v2916_v60 = vmax.f32 %v2863_v36, 0.0  ;;  %v3054_v26 = vsel %vm1754_vm5, %v3052_v59, %v3053_v56  ;;  %v3031_v59 = vld [vmem:[%s3923_s12 + $0x59] sm:$0x3f] }
 0x349   : > { %3749 = vmatprep.mubr.msk.bf16.mxu0 %vm3859_vm3, %v3858_v14 }
 0x34a   : > { %v2917_v51 = vmax.f32 %v2866_v25, 0.0 }
 0x34c   : > { %v2935_v5 = vpack.c.bf16 %v2917_v51, %v2916_v60 }
 0x34d   : > { %v2870_v13 = vpop.f32.mrb[52].mxu1 }
 0x34e   : > { %v2970_v16 = vrot.slane %v2935_v5, 4  ;;  %v2973_v53 = vrot.slane %v2935_v5, 6  ;;  %v2871_v44 = vadd.f32 %v5462_v47, %v2870_v13  ;;  %v2872_v18 = vpop.f32.mrb[53].mxu1 }
 0x34f   : > { %v2873_v55 = vpop.f32.mrb[54].mxu1  ;;  %v3027_v18 = vld [vmem:[%s3923_s12 + $0x39] sm:$0x3f] }
 0x350   : > { %v2874_v29 = vadd.f32 %v5462_v47, %v2873_v55  ;;  %v2875_v49 = vpop.f32.mrb[55].mxu1  ;;  %v2971_v61 = vsel %vm2943_vm1, %v2969_v30, %v2970_v16  ;;  %v2918_v1 = vmax.f32 %v2871_v44, 0.0  ;;  %v3026_v30 = vld [vmem:[%s3923_s12 + $0x31] sm:$0xff]  ;;  %v3028_v55 = vld [vmem:[%s3923_s12 + $0x41] sm:$0xff] }
 0x351   : > { %v3015_v57 = vsel %vm2988_vm2, %v2971_v61, %v2973_v53  ;;  %v3060_v36 = vrot.slane %v3026_v30, 4  ;;  %v3068_v49 = vrot.slane %v3028_v55, 6  ;;  %vm5890_vm2 = vmmov %vm5861_vm0  ;;  %v3037_v55 = vld [vmem:[%s3923_s12 + $0x89] sm:$0x3f] }
 0x352   : > { %v2919_v31 = vmax.f32 %v2874_v29, 0.0  ;;  %3750 = vmatmul.mubr.msk.bf16.gmra.mrb[68].mxu0 %vm2122_vm4, %v3015_v57  ;;  %v3061_v29 = vrot.slane %v3027_v18, 4  ;;  %v3036_v18 = vld [vmem:[%s3923_s12 + $0x81] sm:$0xff] }
 0x353   : > { %3753 = vmatprep.mubr.msk.bf16.mxu0 %vm3859_vm3, %v3858_v14  ;;  %v3128_v12 = vsel %vm2943_vm1, %v3053_v56, %v3060_v36 }
 0x354   : > { %v2936_v46 = vpack.c.bf16 %v2919_v31, %v2918_v1  ;;  %v3062_v61 = vsel %vm2943_vm1, %v3060_v36, %v3061_v29 }
 0x355   : > { %v2878_v39 = vpop.f32.mrb[56].mxu1 }
 0x356   : > { %v2974_v32 = vrot.slane %v2936_v46, 6  ;;  %v2879_v42 = vadd.f32 %v5462_v47, %v2878_v39  ;;  %v2880_v8 = vpop.f32.mrb[57].mxu1 }
 0x357   : > { %v2881_v3 = vpop.f32.mrb[58].mxu1 }
 0x358   : > { %v2882_v21 = vadd.f32 %v5462_v47, %v2881_v3  ;;  %v2883_v35 = vpop.f32.mrb[59].mxu1  ;;  %v2975_v50 = vsel %vm2948_vm14, %v2973_v53, %v2974_v32  ;;  %v2920_v15 = vmax.f32 %v2879_v42, 0.0  ;;  %v3029_v3 = vld [vmem:[%s3923_s12 + $0x49] sm:$0x3f] }
 0x359   : > { %v3018_v10 = vsel %vm2943_vm1, %v2975_v50, %v2936_v46  ;;  %v3129_v46 = vsel %vm2948_vm14, %v3061_v29, %v3068_v49  ;;  %v3091_v29 = vrot.slane %v3036_v18, 6 }
 0x35a   : > { %v2921_v45 = vmax.f32 %v2882_v21, 0.0  ;;  %3754 = vmatmul.mubr.msk.bf16.gmra.mrb[72].mxu0 %vm2122_vm4, %v3018_v10  ;;  %v3069_v10 = vrot.slane %v3029_v3, 6 }
 0x35b   : > { %3757 = vmatprep.mubr.msk.bf16.mxu0 %vm3859_vm3, %v3858_v14  ;;  %vm5883_vm3 = vmmov %vm5861_vm0 }
 0x35c   : > { %v2937_v9 = vpack.c.bf16 %v2921_v45, %v2920_v15  ;;  %v3070_v15 = vsel %vm2948_vm14, %v3068_v49, %v3069_v10  ;;  %v3092_v49 = vrot.slane %v3037_v55, 6 }
 0x35d   : > { %v2886_v22 = vpop.f32.mrb[60].mxu1 }
 0x35e   : > { %v2887_v48 = vadd.f32 %v5462_v47, %v2886_v22  ;;  %v2888_v34 = vpop.f32.mrb[61].mxu1  ;;  %v2978_v19 = vrot.slane %v2937_v9, 2  ;;  %v5554_v47 = vld [vmem:[%s5692_s6] ss:$0 sm:$0xff] }
 0x35f   : > { %v2889_v23 = vpop.f32.mrb[62].mxu1 }
 0x360   : > { %v2922_v58 = vmax.f32 %v2887_v48, 0.0  ;;  %v2890_v17 = vpop.f32.mrb[63].mxu1  ;;  %v3030_v48 = vld [vmem:[%s3923_s12 + $0x51] sm:$0xff] }
 0x362   : > { %v2938_v62 = vpack.c.bf16 %v2922_v58, %v2922_v58 }
 0x364   : > { %v2979_v7 = vrot.slane %v2938_v62, 2 }
 0x366   : > { %3762 = vmatmul.mubr.msk.bf16.vlgmr.msra.gmra.mrb[64].mxu1 %vm2122_vm4, %v2979_v7  ;;  %v2980_v11 = vsel %vm1754_vm5, %v2978_v19, %v2979_v7 }
 0x367   : > { %v3021_v14 = vsel %vm2996_vm10, %v2937_v9, %v2980_v11  ;;  %v3032_v11 = vld [vmem:[%s3923_s12 + $0x61] sm:$0xff]  ;;  %vm5891_vm10 = vmmov %vm5861_vm0 }
 0x368   : > { %3758 = vmatmul.mubr.msk.bf16.gmra.mrb[76].mxu0 %vm2122_vm4, %v3021_v14  ;;  %vm5882_vm4 = vmmov %vm5861_vm0  ;;  %v3033_v14 = vld [vmem:[%s3923_s12 + $0x69] sm:$0x3f]  ;;  %v3075_v37 = vrot.slane %v3032_v11, 2 }
 0x369   : > { %v3076_v27 = vrot.slane %v3033_v14, 2  ;;  %v3041_v14 = vld [vmem:[%s3923_s12 + $0xa9] sm:$0x3f] }
 0x383   : > { %v3221_v0 = vpop.f32.mrb[32].mxu0 }
 0x384   : > { %v3222_v41 = vadd.f32 %v5554_v47, %v3221_v0  ;;  %v3715_v2 = vpop.f32.mrb[33].mxu0 }
 0x385   : > { %v3224_v38 = vpop.f32.mrb[34].mxu0 }
 0x386   : > { %v3323_v54 = vadd.f32 %v3222_v41, %v3022_v40  ;;  %v3225_v4 = vadd.f32 %v5554_v47, %v3224_v38  ;;  %v3716_v6 = vpop.f32.mrb[35].mxu0  ;;  %v3130_v40 = vsel %vm1754_vm5, %v3031_v59, %v3075_v37  ;;  %v3077_v38 = vsel %vm1754_vm5, %v3075_v37, %v3076_v27  ;;  %v3042_v37 = vld [vmem:[%s3923_s12 + $0xb1] sm:$0xff] }
 0x387   : > { %v3099_v59 = vrot.slane %v3041_v14, 2 }
 0x388   : > { %v3348_v52 = vmax.f32 %v3323_v54, 0.0  ;;  %v3324_v20 = vadd.f32 %v3225_v4, %v3127_v24  ;;  %v3034_v24 = vld [vmem:[%s3923_s12 + $0x71] sm:$0xff] }
 0x38a   : > { %3373 = vst.msk [vmem:[%s5565_s15] sm:$0xff] %vm5882_vm4, %v3348_v52  ;;  %v3349_v63 = vmax.f32 %v3324_v20, 0.0  ;;  %v3035_v20 = vld [vmem:[%s3923_s12 + $0x79] sm:$0x3f]  ;;  %vm5894_vm4 = vmmov %vm5861_vm0 }
 0x38b   : > { %v3084_v56 = vrot.slane %v3035_v20, 4 }
 0x38c   : > { %3374 = vst.msk [vmem:[%s5565_s15 + $0x8] sm:$0xff] %vm5883_vm3, %v3349_v63  ;;  %v3083_v63 = vrot.slane %v3034_v24, 4  ;;  %vm5895_vm3 = vmmov %vm5861_vm0 }
 0x39e   : > { %v3229_v43 = vpop.f32.mrb[36].mxu0 }
 0x39f   : > { %v3230_v33 = vadd.f32 %v5554_v47, %v3229_v43  ;;  %v3719_v25 = vpop.f32.mrb[37].mxu0 }
 0x3a0   : > { %v3232_v60 = vpop.f32.mrb[38].mxu0 }
 0x3a1   : > { %v3325_v51 = vadd.f32 %v3230_v33, %v3054_v26  ;;  %v3233_v5 = vadd.f32 %v5554_v47, %v3232_v60  ;;  %v3720_v13 = vpop.f32.mrb[39].mxu0  ;;  %v3131_v26 = vsel %vm2943_vm1, %v3076_v27, %v3083_v63  ;;  %v3106_v27 = vrot.slane %v3042_v37, 4 }
 0x3a3   : > { %v3350_v16 = vmax.f32 %v3325_v51, 0.0  ;;  %v3326_v53 = vadd.f32 %v3233_v5, %v3128_v12  ;;  %v3085_v12 = vsel %vm2943_vm1, %v3083_v63, %v3084_v56  ;;  %v3134_v24 = vsel %vm2943_vm1, %v3099_v59, %v3106_v27 }
 0x3a5   : > { %3375 = vst.msk [vmem:[%s5565_s15 + $0x10] sm:$0xff] %vm5884_vm12, %v3350_v16  ;;  %v3351_v44 = vmax.f32 %v3326_v53, 0.0  ;;  %vm5896_vm12 = vmmov %vm5861_vm0 }
 0x3a7   : > { %3376 = vst.msk [vmem:[%s5565_s15 + $0x18] sm:$0xff] %vm5885_vm7, %v3351_v44  ;;  %vm5897_vm7 = vmmov %vm5861_vm0 }
 0x3b0   : > { %v3237_v57 = vpop.f32.mrb[40].mxu0 }
 0x3b1   : > { %v3238_v1 = vadd.f32 %v5554_v47, %v3237_v57  ;;  %v3723_v31 = vpop.f32.mrb[41].mxu0 }
 0x3b2   : > { %v3240_v39 = vpop.f32.mrb[42].mxu0 }
 0x3b3   : > { %v3327_v32 = vadd.f32 %v3238_v1, %v3062_v61  ;;  %v3241_v42 = vadd.f32 %v5554_v47, %v3240_v39  ;;  %v3724_v8 = vpop.f32.mrb[43].mxu0  ;;  %v3132_v61 = vsel %vm2948_vm14, %v3084_v56, %v3091_v29 }
 0x3b5   : > { %v3352_v21 = vmax.f32 %v3327_v32, 0.0  ;;  %v3328_v35 = vadd.f32 %v3241_v42, %v3129_v46  ;;  %v3093_v46 = vsel %vm2948_vm14, %v3091_v29, %v3092_v49 }
 0x3b7   : > { %3377 = vst.msk [vmem:[%s5565_s15 + $0x20] sm:$0xff] %vm5886_vm15, %v3352_v21  ;;  %v3353_v50 = vmax.f32 %v3328_v35, 0.0  ;;  %vm5898_vm15 = vmmov %vm5861_vm0 }
 0x3b9   : > { %3378 = vst.msk [vmem:[%s5565_s15 + $0x28] sm:$0xff] %vm5861_vm0, %v3353_v50  ;;  %v3040_v50 = vld [vmem:[%s3923_s12 + $0xa1] sm:$0xff] }
 0x3ba   : > { %v3098_v10 = vrot.slane %v3040_v50, 2 }
 0x3bb   : > { %v3245_v45 = vpop.f32.mrb[44].mxu0 }
 0x3bc   : > { %v3246_v9 = vadd.f32 %v5554_v47, %v3245_v45  ;;  %v3727_v22 = vpop.f32.mrb[45].mxu0  ;;  %v3038_v45 = vld [vmem:[%s3923_s12 + $0x91] sm:$0xff] }
 0x3bd   : > { %v3248_v34 = vpop.f32.mrb[46].mxu0 }
 0x3be   : > { %v3329_v23 = vadd.f32 %v3246_v9, %v3070_v15  ;;  %v3249_v58 = vadd.f32 %v5554_v47, %v3248_v34  ;;  %v3728_v17 = vpop.f32.mrb[47].mxu0  ;;  %v3039_v15 = vld [vmem:[%s3923_s12 + $0x99] sm:$0x3f] }
 0x3bf   : > { %v3133_v34 = vsel %vm1754_vm5, %v3039_v15, %v3098_v10  ;;  %v3047_v15 = vld [vmem:[%s3923_s12 + $0xd9] sm:$0x3f] }
 0x3c0   : > { %v3354_v62 = vmax.f32 %v3329_v23, 0.0  ;;  %v3330_v19 = vadd.f32 %v3249_v58, %v3030_v48 }
 0x3c2   : > { %3379 = vst.msk [vmem:[%s5565_s15 + $0x30] sm:$0xff] %vm5887_vm8, %v3354_v62  ;;  %v3355_v7 = vmax.f32 %v3330_v19, 0.0  ;;  %vm5900_vm8 = vmmov %vm5861_vm0 }
 0x3c4   : > { %3380 = vst.msk [vmem:[%s5565_s15 + $0x38] sm:$0xff] %vm5888_vm11, %v3355_v7  ;;  %vm3397_vm11 = vcmask 519168  }
 0x3d7   : > { %v3253_v0 = vpop.f32.mrb[48].mxu0 }
 0x3d8   : > { %v3254_v41 = vadd.f32 %v5554_v47, %v3253_v0  ;;  %v3731_v2 = vpop.f32.mrb[49].mxu0 }
 0x3d9   : > { %v3256_v54 = vpop.f32.mrb[50].mxu0 }
 0x3da   : > { %v3331_v4 = vadd.f32 %v3254_v41, %v3130_v40  ;;  %v3257_v6 = vadd.f32 %v5554_v47, %v3256_v54  ;;  %v3732_v52 = vpop.f32.mrb[51].mxu0  ;;  %v3100_v40 = vsel %vm1754_vm5, %v3098_v10, %v3099_v59 }
 0x3db   : > { %v3043_v52 = vld [vmem:[%s3923_s12 + $0xb9] sm:$0x3f] }
 0x3dc   : > { %v3356_v28 = vmax.f32 %v3331_v4, 0.0  ;;  %v3332_v30 = vadd.f32 %v3257_v6, %v3077_v38 }
 0x3de   : > { %3381 = vst.msk [vmem:[%s5565_s15 + $0x40] sm:$0xff] %vm5889_vm9, %v3356_v28  ;;  %v3357_v36 = vmax.f32 %v3332_v30, 0.0  ;;  %v3044_v28 = vld [vmem:[%s3923_s12 + $0xc1] sm:$0xff]  ;;  %v3107_v30 = vrot.slane %v3043_v52, 4  ;;  %vm5902_vm9 = vmmov %vm5861_vm0 }
 0x3df   : > { %v3261_v43 = vpop.f32.mrb[52].mxu0 }
 0x3e0   : > { %3382 = vst.msk [vmem:[%s5565_s15 + $0x48] sm:$0xff] %vm5890_vm2, %v3357_v36  ;;  %v3262_v33 = vadd.f32 %v5554_v47, %v3261_v43  ;;  %v3735_v25 = vpop.f32.mrb[53].mxu0  ;;  %v3114_v36 = vrot.slane %v3044_v28, 6  ;;  %vm5903_vm2 = vmmov %vm5861_vm0 }
 0x3e1   : > { %v3264_v60 = vpop.f32.mrb[54].mxu0 }
 0x3e2   : > { %v3333_v51 = vadd.f32 %v3262_v33, %v3131_v26  ;;  %v3265_v5 = vadd.f32 %v5554_v47, %v3264_v60  ;;  %v3736_v13 = vpop.f32.mrb[55].mxu0  ;;  %v3108_v26 = vsel %vm2943_vm1, %v3106_v27, %v3107_v30  ;;  %v3135_v60 = vsel %vm2948_vm14, %v3107_v30, %v3114_v36  ;;  %vm5899_vm1 = vmmov %vm5861_vm0 }
 0x3e4   : > { %v3358_v16 = vmax.f32 %v3333_v51, 0.0  ;;  %v3334_v53 = vadd.f32 %v3265_v5, %v3085_v12  ;;  %v3045_v12 = vld [vmem:[%s3923_s12 + $0xc9] sm:$0x3f] }
 0x3e6   : > { %3383 = vst.msk [vmem:[%s5565_s15 + $0x50] sm:$0xff] %vm5891_vm10, %v3358_v16  ;;  %v3359_v44 = vmax.f32 %v3334_v53, 0.0  ;;  %v3115_v53 = vrot.slane %v3045_v12, 6 }
 0x3e8   : > { %3384 = vst.msk [vmem:[%s5565_s15 + $0x58] sm:$0xff] %vm5892_vm6, %v3359_v44  ;;  %v3116_v29 = vsel %vm2948_vm14, %v3114_v36, %v3115_v53  ;;  %vm5901_vm14 = vmmov %vm5861_vm0 }
 0x3f3   : > { %v3269_v57 = vpop.f32.mrb[56].mxu0 }
 0x3f4   : > { %v3270_v1 = vadd.f32 %v5554_v47, %v3269_v57  ;;  %v3739_v31 = vpop.f32.mrb[57].mxu0 }
 0x3f5   : > { %v3272_v39 = vpop.f32.mrb[58].mxu0 }
 0x3f6   : > { %v3335_v32 = vadd.f32 %v3270_v1, %v3132_v61  ;;  %v3273_v42 = vadd.f32 %v5554_v47, %v3272_v39  ;;  %v3740_v8 = vpop.f32.mrb[59].mxu0  ;;  %v3046_v1 = vld [vmem:[%s3923_s12 + $0xd1] sm:$0xff] }
 0x3f8   : > { %v3360_v3 = vmax.f32 %v3335_v32, 0.0  ;;  %v3336_v21 = vadd.f32 %v3273_v42, %v3093_v46 }
 0x3fa   : > { %3385 = vst.msk [vmem:[%s5565_s15 + $0x60] sm:$0xff] %vm5893_vm13, %v3360_v3  ;;  %v3361_v35 = vmax.f32 %v3336_v21, 0.0  ;;  %v3048_v21 = vld [vmem:[%s3923_s12 + $0xe1] sm:$0xff] }
 0x3fb   : > { %v3121_v50 = vrot.slane %v3048_v21, 2 }
 0x3fc   : > { %3386 = vst.msk [vmem:[%s5565_s15 + $0x68] sm:$0xff] %vm5894_vm4, %v3361_v35  ;;  %v3049_v35 = vld [vmem:[%s3923_s12 + $0xe9] sm:$0x3f] }
 0x3fd   : > { %v3122_v10 = vrot.slane %v3049_v35, 2 }
 0x404   : > { %v3277_v9 = vpop.f32.mrb[60].mxu0 }
 0x405   : > { %v3278_v22 = vadd.f32 %v5554_v47, %v3277_v9  ;;  %v3743_v48 = vpop.f32.mrb[61].mxu0 }
 0x406   : > { %v3280_v23 = vpop.f32.mrb[62].mxu0  ;;  %v3136_v48 = vsel %vm1754_vm5, %v3047_v15, %v3121_v50 }
 0x407   : > { %v3337_v58 = vadd.f32 %v3278_v22, %v3038_v45  ;;  %v3281_v17 = vadd.f32 %v5554_v47, %v3280_v23  ;;  %v3744_v62 = vpop.f32.mrb[63].mxu0 }
 0x409   : > { %v3362_v19 = vmax.f32 %v3337_v58, 0.0  ;;  %v3338_v7 = vadd.f32 %v3281_v17, %v3133_v34 }
 0x40b   : > { %3387 = vst.msk [vmem:[%s5565_s15 + $0x70] sm:$0xff] %vm5895_vm3, %v3362_v19  ;;  %v3363_v11 = vmax.f32 %v3338_v7, 0.0  ;;  %v3123_v7 = vsel %vm1754_vm5, %v3121_v50, %v3122_v10 }
 0x40d   : > { %3388 = vst.msk [vmem:[%s5565_s15 + $0x78] sm:$0xff] %vm5896_vm12, %v3363_v11 }
 0x41b   : > { %v3285_v0 = vpop.f32.mrb[64].mxu0 }
 0x41c   : > { %v3286_v41 = vadd.f32 %v5554_v47, %v3285_v0  ;;  %v3747_v2 = vpop.f32.mrb[65].mxu0 }
 0x41d   : > { %v3288_v38 = vpop.f32.mrb[66].mxu0 }
 0x41e   : > { %v3339_v54 = vadd.f32 %v3286_v41, %v3100_v40  ;;  %v3289_v4 = vadd.f32 %v5554_v47, %v3288_v38  ;;  %v3748_v6 = vpop.f32.mrb[67].mxu0 }
 0x420   : > { %v3364_v20 = vmax.f32 %v3339_v54, 0.0  ;;  %v3340_v63 = vadd.f32 %v3289_v4, %v3134_v24 }
 0x422   : > { %3389 = vst.msk [vmem:[%s5565_s15 + $0x80] sm:$0xff] %vm5897_vm7, %v3364_v20  ;;  %v3365_v56 = vmax.f32 %v3340_v63, 0.0 }
 0x424   : > { %3390 = vst.msk [vmem:[%s5565_s15 + $0x88] sm:$0xff] %vm5898_vm15, %v3365_v56 }
 0x425   : > { %v3293_v43 = vpop.f32.mrb[68].mxu0 }
 0x426   : > { %v3294_v33 = vadd.f32 %v5554_v47, %v3293_v43  ;;  %v3751_v25 = vpop.f32.mrb[69].mxu0 }
 0x427   : > { %v3296_v51 = vpop.f32.mrb[70].mxu0 }
 0x428   : > { %v3341_v5 = vadd.f32 %v3294_v33, %v3108_v26  ;;  %v3297_v13 = vadd.f32 %v5554_v47, %v3296_v51  ;;  %v3752_v16 = vpop.f32.mrb[71].mxu0 }
 0x42a   : > { %v3366_v44 = vmax.f32 %v3341_v5, 0.0  ;;  %v3342_v18 = vadd.f32 %v3297_v13, %v3135_v60 }
 0x42c   : > { %3391 = vst.msk [vmem:[%s5565_s15 + $0x90] sm:$0xff] %vm5861_vm0, %v3366_v44  ;;  %v3367_v55 = vmax.f32 %v3342_v18, 0.0 }
 0x42d   : > { %v3301_v49 = vpop.f32.mrb[72].mxu0 }
 0x42e   : > { %3392 = vst.msk [vmem:[%s5565_s15 + $0x98] sm:$0xff] %vm5899_vm1, %v3367_v55  ;;  %v3302_v61 = vadd.f32 %v5554_v47, %v3301_v49  ;;  %v3755_v57 = vpop.f32.mrb[73].mxu0 }
 0x42f   : > { %v3304_v31 = vpop.f32.mrb[74].mxu0 }
 0x430   : > { %v3343_v46 = vadd.f32 %v3302_v61, %v3116_v29  ;;  %v3305_v39 = vadd.f32 %v5554_v47, %v3304_v31  ;;  %v3756_v32 = vpop.f32.mrb[75].mxu0 }
 0x432   : > { %v3368_v42 = vmax.f32 %v3343_v46, 0.0  ;;  %v3344_v8 = vadd.f32 %v3305_v39, %v3046_v1 }
 0x434   : > { %3393 = vst.msk [vmem:[%s5565_s15 + $0xa0] sm:$0xff] %vm5900_vm8, %v3368_v42  ;;  %v3369_v3 = vmax.f32 %v3344_v8, 0.0 }
 0x436   : > { %3394 = vst.msk [vmem:[%s5565_s15 + $0xa8] sm:$0xff] %vm5901_vm14, %v3369_v3 }
 0x439   : > { %v3317_v45 = vpop.f32.mrb[64].mxu1 }
 0x43a   : > { %v3318_v9 = vadd.f32 %v5554_v47, %v3317_v45  ;;  %v3763_v22 = vpop.f32.mrb[65].mxu1 }
 0x43b   : > { %v3309_v34 = vpop.f32.mrb[76].mxu0  ;;  %v3320_v23 = vpop.f32.mrb[66].mxu1 }
 0x43c   : > { %v3347_v58 = vadd.f32 %v3318_v9, %v3122_v10  ;;  %v3310_v17 = vadd.f32 %v5554_v47, %v3309_v34  ;;  %v3759_v62 = vpop.f32.mrb[77].mxu0  ;;  %v3764_v19 = vpop.f32.mrb[67].mxu1 }
 0x43d   : > { %v3312_v11 = vpop.f32.mrb[78].mxu0 }
 0x43e   : > { %v3372_v14 = vmax.f32 %v3347_v58, 0.0  ;;  %v3345_v37 = vadd.f32 %v3310_v17, %v3136_v48  ;;  %v3313_v59 = vadd.f32 %v5554_v47, %v3312_v11  ;;  %v3760_v27 = vpop.f32.mrb[79].mxu0 }
 0x440   : > { %3398 = vst.msk [vmem:[%s5565_s15 + $0xc0] sm:$0xf] %vm3397_vm11, %v3372_v14  ;;  %v3370_v40 = vmax.f32 %v3345_v37, 0.0  ;;  %v3346_v0 = vadd.f32 %v3313_v59, %v3123_v7 }
 0x442   : > { %3395 = vst.msk [vmem:[%s5565_s15 + $0xb0] sm:$0xff] %vm5902_vm9, %v3370_v40  ;;  %v3371_v41 = vmax.f32 %v3346_v0, 0.0 }
 0x444   : > { %3396 = vst.msk [vmem:[%s5565_s15 + $0xb8] sm:$0xff] %vm5903_vm2, %v3371_v41 }
 0x445 PF: > { %s17_s24 = sadd.s32 1, %s3848_s24  }
 0x446   : > { %p14_p4 = scmp.ge.s32.totalorder %s17_s24, 4  }
 0x448   :  { %16 = sbr.rel (!%p14_p4) target bundleno = 1 (0x1), region = 78 }

</bundles_post_ra>
